<compile_context>
chip_gen: v5e
topology: v5e:2x2
jax: 0.10.0
libtpu: 0.0.40
codegen_flags: <defaults>
</compile_context>

<pallas_src>
import functools

import jax
import jax.numpy as jnp
from jax import lax
from jax.experimental import pallas as pl
from jax.experimental.pallas import tpu as pltpu

_INV_SQRT2 = 0.7071067811865476
_RESIDENT_WEIGHT_LIMIT = 12 << 20     # bf16 w1+w2 bytes below which they stay VMEM-resident


def _gelu(h, approximate):
    if approximate:
        # tanh approximation -> transcendental lands on the EUP slot (v5e relief).
        return jax.nn.gelu(h, approximate=True)
    # exact erf — matches torch.nn.GELU default.
    return 0.5 * h * (1.0 + lax.erf(h * jnp.float32(_INV_SQRT2)))


def _layer_norm(x_f32, gamma, beta):
    mean = jnp.mean(x_f32, axis=-1, keepdims=True)
    centered = x_f32 - mean
    var = jnp.mean(centered * centered, axis=-1, keepdims=True)
    return centered * lax.rsqrt(var + 1e-5) * gamma + beta


# --------------------------------------------------------------------------
# Kernels
# --------------------------------------------------------------------------
def _ffn_resident_kernel(x_ref, gamma_ref, beta_ref, w1_ref, b1_ref,
                         w2_ref, b2_ref, o_ref, *, approximate):
    """Main path.  Grid = (row_tiles,).  w1/w2/b1 have constant index_maps, so
    they are fetched once and stay resident; everything is computed inline per
    row tile (no scratches, no pl.when phases)."""
    x = x_ref[...].astype(jnp.float32)
    xn = _layer_norm(x, gamma_ref[...], beta_ref[...])
    # Linear(dim -> inner_dim): bf16 x bf16 -> f32 on the MXU.
    h = jnp.dot(xn.astype(jnp.bfloat16), w1_ref[...],
                preferred_element_type=jnp.float32) + b1_ref[...]
    g = _gelu(h, approximate)
    # Linear(inner_dim -> dim): full K per MXU pass.
    out = jnp.dot(g.astype(jnp.bfloat16), w2_ref[...],
                  preferred_element_type=jnp.float32) + b2_ref[...]
    o_ref[...] = out.astype(o_ref.dtype)


def _ffn_streamed_kernel(x_ref, gamma_ref, beta_ref, w1_ref, b1_ref,
                         w2_ref, b2_ref, o_ref, xn_sc, acc_sc, *, approximate):
    """Fallback for large inner_dim that does not fit VMEM.  Grid =
    (row_tiles, k_tiles); k is a reduction over inner_dim slabs with an f32
    accumulator scratch (P3).  k MUST stay the innermost 'arbitrary' axis."""
    k = pl.program_id(1)

    @pl.when(k == 0)
    def _init():
        x = x_ref[...].astype(jnp.float32)
        xn = _layer_norm(x, gamma_ref[...], beta_ref[...])
        xn_sc[...] = xn.astype(jnp.bfloat16)
        acc_sc[...] = jnp.zeros_like(acc_sc)

    h = jnp.dot(xn_sc[...], w1_ref[...],
                preferred_element_type=jnp.float32) + b1_ref[...]
    g = _gelu(h, approximate)
    acc_sc[...] += jnp.dot(g.astype(jnp.bfloat16), w2_ref[...],
                           preferred_element_type=jnp.float32)

    @pl.when(k == pl.num_programs(1) - 1)
    def _finalize():
        o_ref[...] = (acc_sc[...] + b2_ref[...]).astype(o_ref.dtype)


# --------------------------------------------------------------------------
# Wrapper
# --------------------------------------------------------------------------
def prepare_ffn_params(gamma, beta, w1, b1, w2, b2):
    """One-time parameter preparation: bf16 weights (MXU-native operands) and
    f32 (1, n) biases/affine.  Call once, outside the per-step path, so no
    per-call HBM cast/reshape passes are inserted."""
    dim, inner_dim = w1.shape
    return {
        "gamma": gamma.reshape(1, dim).astype(jnp.float32),
        "beta": beta.reshape(1, dim).astype(jnp.float32),
        "w1": w1.astype(jnp.bfloat16),
        "b1": b1.reshape(1, inner_dim).astype(jnp.float32),
        "w2": w2.astype(jnp.bfloat16),
        "b2": b2.reshape(1, dim).astype(jnp.float32),
    }


def _pick_row_tile(m):
    """Prefer big MXU-filling row tiles, but keep >= 2 row tiles so a dual-TC
    chip (v7x) can shard the 'parallel' row axis across both cores."""
    for tm in (512, 256, 128):
        if m >= 2 * tm:
            return tm
    return max(8, min(256, ((m + 7) // 8) * 8))   # small inputs: single tile


def _pick_inner_tile(inner_dim, target=512):
    """Largest multiple-of-128 divisor of inner_dim that is <= target."""
    if inner_dim <= target:
        return inner_dim
    for cand in range(target, 0, -128):
        if cand % 128 == 0 and inner_dim % cand == 0:
            return cand
    return inner_dim


def feedforward_pallas(x, params, *, tm=None, tk=None, approximate_gelu=False):
    """x: (..., dim) -> (..., dim).  params from prepare_ffn_params
    (weights in (in, out) layout, bf16)."""
    orig_shape = x.shape
    dim = orig_shape[-1]
    w1, w2 = params["w1"], params["w2"]
    inner_dim = w1.shape[1]

    xf = x.reshape(-1, dim)
    m = xf.shape[0]
    if tm is None:
        tm = _pick_row_tile(m)
    row_tiles = pl.cdiv(m, tm)          # no jnp.pad: Pallas masks edge blocks
    itemsize = jnp.dtype(x.dtype).itemsize

    weight_bytes = 2 * dim * inner_dim * 2        # bf16 w1 + w2
    use_resident = (tk is None) and (weight_bytes <= _RESIDENT_WEIGHT_LIMIT)

    # Advisory cost for XLA scheduling: weights read exactly once.
    cost = pl.CostEstimate(
        flops=4 * m * dim * inner_dim,             # two matmuls
        transcendentals=m * inner_dim,             # erf / tanh
        bytes_accessed=(2 * m * dim * itemsize     # x in + out
                        + weight_bytes             # bf16 w1 + w2, read once
                        + (inner_dim + 3 * dim) * 4),
    )

    args = (xf, params["gamma"], params["beta"], w1, params["b1"], w2,
            params["b2"])

    if use_resident:
        vmem_needed = (
            2 * 2 * tm * dim * itemsize            # x + out blocks, double buffered
            + 2 * weight_bytes                     # resident bf16 slabs (+ buffer slack)
            + (inner_dim + 3 * dim) * 4            # biases / affine
            + tm * dim * (2 + 4)                   # xn (bf16) + out (f32) temporaries
            + 2 * tm * inner_dim * 4               # h / g f32 temporaries
        )
        # Generation-aware-ish cap: stay well under v7x's 64 MiB physical VMEM.
        vmem_limit = int(min(max(2 * vmem_needed + (4 << 20), 16 << 20), 48 << 20))

        out = pl.pallas_call(
            functools.partial(_ffn_resident_kernel, approximate=approximate_gelu),
            out_shape=jax.ShapeDtypeStruct((m, dim), x.dtype),
            grid_spec=pltpu.PrefetchScalarGridSpec(
                num_scalar_prefetch=0,
                grid=(row_tiles,),
                in_specs=[
                    pl.BlockSpec((tm, dim), lambda i: (i, 0)),          # x rows
                    pl.BlockSpec((1, dim), lambda i: (0, 0)),           # gamma
                    pl.BlockSpec((1, dim), lambda i: (0, 0)),           # beta
                    pl.BlockSpec((dim, inner_dim), lambda i: (0, 0)),   # w1 (resident)
                    pl.BlockSpec((1, inner_dim), lambda i: (0, 0)),     # b1 (resident)
                    pl.BlockSpec((inner_dim, dim), lambda i: (0, 0)),   # w2 (resident)
                    pl.BlockSpec((1, dim), lambda i: (0, 0)),           # b2
                ],
                out_specs=pl.BlockSpec((tm, dim), lambda i: (i, 0)),
            ),
            compiler_params=pltpu.CompilerParams(
                dimension_semantics=("parallel",),
                vmem_limit_bytes=vmem_limit),
            cost_estimate=cost,
        )(*args)
    else:
        # Fallback: stream inner_dim slabs with an accumulator (large inner_dim only).
        if tk is None:
            tk = _pick_inner_tile(inner_dim)
        assert inner_dim % tk == 0, "inner_dim must be divisible by inner tile"
        vmem_needed = (
            2 * 2 * tm * dim * itemsize
            + 2 * 2 * (dim * tk + tk * dim) * 2    # bf16 w1/w2 slabs, double buffered
            + tm * dim * (2 + 4)                   # xn (bf16) + acc (f32) scratch
            + 2 * tm * tk * 4                      # h / g f32 temporaries
        )
        vmem_limit = int(min(max(2 * vmem_needed + (8 << 20), 16 << 20), 48 << 20))

        out = pl.pallas_call(
            functools.partial(_ffn_streamed_kernel, approximate=approximate_gelu),
            out_shape=jax.ShapeDtypeStruct((m, dim), x.dtype),
            grid_spec=pltpu.PrefetchScalarGridSpec(
                num_scalar_prefetch=0,
                grid=(row_tiles, inner_dim // tk),
                in_specs=[
                    pl.BlockSpec((tm, dim), lambda i, k: (i, 0)),   # x rows
                    pl.BlockSpec((1, dim), lambda i, k: (0, 0)),    # gamma
                    pl.BlockSpec((1, dim), lambda i, k: (0, 0)),    # beta
                    pl.BlockSpec((dim, tk), lambda i, k: (0, k)),   # w1 slab
                    pl.BlockSpec((1, tk), lambda i, k: (0, k)),     # b1 slab
                    pl.BlockSpec((tk, dim), lambda i, k: (k, 0)),   # w2 slab
                    pl.BlockSpec((1, dim), lambda i, k: (0, 0)),    # b2
                ],
                out_specs=pl.BlockSpec((tm, dim), lambda i, k: (i, 0)),
                scratch_shapes=[
                    pltpu.VMEM((tm, dim), jnp.bfloat16),   # normalized x (resident over k)
                    pltpu.VMEM((tm, dim), jnp.float32),    # output accumulator
                ],
            ),
            compiler_params=pltpu.CompilerParams(
                dimension_semantics=("parallel", "arbitrary"),
                vmem_limit_bytes=vmem_limit),
            cost_estimate=cost,
        )(*args)

    return out.reshape(orig_shape)


def feedforward_ref(x, gamma, beta, w1, b1, w2, b2):
    """Pure-JAX f32 reference matching the PyTorch module semantics."""
    xf = x.astype(jnp.float32)
    mean = jnp.mean(xf, axis=-1, keepdims=True)
    var = jnp.mean((xf - mean) ** 2, axis=-1, keepdims=True)
    xn = (xf - mean) / jnp.sqrt(var + 1e-5) * gamma + beta
    h = xn @ w1 + b1
    g = 0.5 * h * (1.0 + lax.erf(h / jnp.sqrt(2.0)))
    return (g @ w2 + b2).astype(x.dtype)


if __name__ == "__main__":
    # Shapes consistent with a MaxViT stage: windowed tokens
    # (batch, x, y, w1, w2, dim), window_size=7, dim=128 (lane-dense),
    # mult=4 -> inner_dim=512.  Token count 2*2*2*49 = 392 rows: NOT a
    # multiple of the row tile, exercising the masked edge-block path
    # (no wrapper-side padding).
    batch, gx, gy, w, dim, mult = 2, 2, 2, 7, 128, 4
    inner_dim = dim * mult

    key = jax.random.PRNGKey(0)
    kx, kw1, kb1, kw2, kb2 = jax.random.split(key, 5)

    x = jax.random.normal(kx, (batch, gx, gy, w, w, dim), dtype=jnp.float32)

    # LayerNorm params (ones/zeros like the module); Linear weights stored as
    # (in, out) so the kernel does x @ W + b, equivalent to x @ weight.T + b.
    gamma = jnp.ones((dim,), dtype=jnp.float32)
    beta = jnp.zeros((dim,), dtype=jnp.float32)
    w1 = jax.random.normal(kw1, (dim, inner_dim), dtype=jnp.float32) * (dim ** -0.5)
    b1 = jax.random.normal(kb1, (inner_dim,), dtype=jnp.float32) * 0.02
    w2 = jax.random.normal(kw2, (inner_dim, dim), dtype=jnp.float32) * (inner_dim ** -0.5)
    b2 = jax.random.normal(kb2, (dim,), dtype=jnp.float32) * 0.02

    # One-time parameter prep (bf16 weight cast happens here, not per call).
    params = prepare_ffn_params(gamma, beta, w1, b1, w2, b2)

    out = feedforward_pallas(x, params)          # resident-weight path, 1-D grid
    out = jax.block_until_ready(out)

    ref = feedforward_ref(x, gamma, beta, w1, b1, w2, b2)
    assert out.shape == x.shape
    # bf16 MXU operands vs f32 reference -> loosened tolerance.
    assert jnp.allclose(out, ref, atol=3e-2, rtol=3e-2), "mismatch vs reference"

    # TODO(synk): MBConv / Attention / conv stem / mlp_head stages of MaxViT
    # are outside the scope of this fused FeedForward kernel.
    print("KERNEL_OK")
</pallas_src>

<mosaic_0001>
module attributes {stable_mosaic.version = 11 : i64} {
  func.func @_ffn_resident_kernel(%arg0: i32, %arg1: memref<128x128xf32, #tpu.memory_space<vmem>>, %arg2: memref<1x128xf32, #tpu.memory_space<vmem>>, %arg3: memref<1x128xf32, #tpu.memory_space<vmem>>, %arg4: memref<128x512xbf16, #tpu.memory_space<vmem>>, %arg5: memref<1x512xf32, #tpu.memory_space<vmem>>, %arg6: memref<512x128xbf16, #tpu.memory_space<vmem>>, %arg7: memref<1x128xf32, #tpu.memory_space<vmem>>, %arg8: memref<128x128xf32, #tpu.memory_space<vmem>>) attributes {dimension_semantics = [#tpu.dimension_semantics<parallel>], iteration_bounds = array<i64: 4>, scalar_prefetch = 0 : i64, scratch_operands = 0 : i64, tpu.core_type = #tpu.core_type<tc>, window_params = [{transform_indices = @transform_0, window_bounds = array<i64: 128, 128>}, {pipeline_mode = #tpu.pipeline_mode<synchronous>, transform_indices = @transform_1, window_bounds = array<i64: 1, 128>}, {pipeline_mode = #tpu.pipeline_mode<synchronous>, transform_indices = @transform_2, window_bounds = array<i64: 1, 128>}, {pipeline_mode = #tpu.pipeline_mode<synchronous>, transform_indices = @transform_3, window_bounds = array<i64: 128, 512>}, {pipeline_mode = #tpu.pipeline_mode<synchronous>, transform_indices = @transform_4, window_bounds = array<i64: 1, 512>}, {pipeline_mode = #tpu.pipeline_mode<synchronous>, transform_indices = @transform_5, window_bounds = array<i64: 512, 128>}, {pipeline_mode = #tpu.pipeline_mode<synchronous>, transform_indices = @transform_6, window_bounds = array<i64: 1, 128>}, {transform_indices = @transform_7, window_bounds = array<i64: 128, 128>}]} {
    %c0 = arith.constant 0 : index
    %c0_0 = arith.constant 0 : index
    %0 = vector.load %arg1[%c0, %c0_0] : memref<128x128xf32, #tpu.memory_space<vmem>>, vector<128x128xf32>
    %c0_1 = arith.constant 0 : index
    %c0_2 = arith.constant 0 : index
    %1 = vector.load %arg2[%c0_1, %c0_2] : memref<1x128xf32, #tpu.memory_space<vmem>>, vector<1x128xf32>
    %c0_3 = arith.constant 0 : index
    %c0_4 = arith.constant 0 : index
    %2 = vector.load %arg3[%c0_3, %c0_4] : memref<1x128xf32, #tpu.memory_space<vmem>>, vector<1x128xf32>
    %cst = arith.constant dense<0.000000e+00> : vector<128xf32>
    %3 = vector.multi_reduction <add>, %0, %cst [1] : vector<128x128xf32> to vector<128xf32>
    %4 = vector.shape_cast %3 : vector<128xf32> to vector<128x1xf32>
    %cst_5 = arith.constant 1.280000e+02 : f32
    %5 = vector.broadcast %cst_5 : f32 to vector<128x1xf32>
    %6 = arith.divf %4, %5 : vector<128x1xf32>
    %7 = vector.broadcast %6 : vector<128x1xf32> to vector<128x128xf32>
    %8 = arith.subf %0, %7 : vector<128x128xf32>
    %9 = arith.mulf %8, %8 : vector<128x128xf32>
    %cst_6 = arith.constant dense<0.000000e+00> : vector<128xf32>
    %10 = vector.multi_reduction <add>, %9, %cst_6 [1] : vector<128x128xf32> to vector<128xf32>
    %11 = vector.shape_cast %10 : vector<128xf32> to vector<128x1xf32>
    %cst_7 = arith.constant 1.280000e+02 : f32
    %12 = vector.broadcast %cst_7 : f32 to vector<128x1xf32>
    %13 = arith.divf %11, %12 : vector<128x1xf32>
    %cst_8 = arith.constant 9.99999974E-6 : f32
    %14 = vector.broadcast %cst_8 : f32 to vector<128x1xf32>
    %15 = arith.addf %13, %14 : vector<128x1xf32>
    %16 = math.rsqrt %15 : vector<128x1xf32>
    %17 = vector.broadcast %16 : vector<128x1xf32> to vector<128x128xf32>
    %18 = arith.mulf %8, %17 : vector<128x128xf32>
    %19 = vector.broadcast %1 : vector<1x128xf32> to vector<128x128xf32>
    %20 = arith.mulf %18, %19 : vector<128x128xf32>
    %21 = vector.broadcast %2 : vector<1x128xf32> to vector<128x128xf32>
    %22 = arith.addf %20, %21 : vector<128x128xf32>
    %23 = arith.truncf %22 : vector<128x128xf32> to vector<128x128xbf16>
    %c0_9 = arith.constant 0 : index
    %c0_10 = arith.constant 0 : index
    %24 = vector.load %arg4[%c0_9, %c0_10] : memref<128x512xbf16, #tpu.memory_space<vmem>>, vector<128x512xbf16>
    %cst_11 = arith.constant dense<0.000000e+00> : vector<128x512xf32>
    %25 = tpu.matmul %23, %24, %cst_11 {dimension_numbers = #tpu.dot_dimension_numbers<[1], [0], [0], [1], [0, 0, 1, 1], [], []>} : vector<128x128xbf16>, vector<128x512xbf16>, vector<128x512xf32> -> vector<128x512xf32>
    %c0_12 = arith.constant 0 : index
    %c0_13 = arith.constant 0 : index
    %26 = vector.load %arg5[%c0_12, %c0_13] : memref<1x512xf32, #tpu.memory_space<vmem>>, vector<1x512xf32>
    %27 = vector.broadcast %26 : vector<1x512xf32> to vector<128x512xf32>
    %28 = arith.addf %25, %27 : vector<128x512xf32>
    %cst_14 = arith.constant 5.000000e-01 : f32
    %29 = vector.broadcast %cst_14 : f32 to vector<128x512xf32>
    %30 = arith.mulf %29, %28 : vector<128x512xf32>
    %cst_15 = arith.constant 0.707106769 : f32
    %31 = vector.broadcast %cst_15 : f32 to vector<128x512xf32>
    %32 = arith.mulf %28, %31 : vector<128x512xf32>
    %33 = math.erf %32 : vector<128x512xf32>
    %cst_16 = arith.constant 1.000000e+00 : f32
    %34 = vector.broadcast %cst_16 : f32 to vector<128x512xf32>
    %35 = arith.addf %34, %33 : vector<128x512xf32>
    %36 = arith.mulf %30, %35 : vector<128x512xf32>
    %37 = arith.truncf %36 : vector<128x512xf32> to vector<128x512xbf16>
    %c0_17 = arith.constant 0 : index
    %c0_18 = arith.constant 0 : index
    %38 = vector.load %arg6[%c0_17, %c0_18] : memref<512x128xbf16, #tpu.memory_space<vmem>>, vector<512x128xbf16>
    %cst_19 = arith.constant dense<0.000000e+00> : vector<128x128xf32>
    %39 = tpu.matmul %37, %38, %cst_19 {dimension_numbers = #tpu.dot_dimension_numbers<[1], [0], [0], [1], [0, 0, 1, 1], [], []>} : vector<128x512xbf16>, vector<512x128xbf16>, vector<128x128xf32> -> vector<128x128xf32>
    %c0_20 = arith.constant 0 : index
    %c0_21 = arith.constant 0 : index
    %40 = vector.load %arg7[%c0_20, %c0_21] : memref<1x128xf32, #tpu.memory_space<vmem>>, vector<1x128xf32>
    %41 = vector.broadcast %40 : vector<1x128xf32> to vector<128x128xf32>
    %42 = arith.addf %39, %41 : vector<128x128xf32>
    %c0_22 = arith.constant 0 : index
    %c0_23 = arith.constant 0 : index
    %43 = vector.load %arg8[%c0_22, %c0_23] : memref<128x128xf32, #tpu.memory_space<vmem>>, vector<128x128xf32>
    tpu.vector_store %arg8[%c0_22, %c0_23], %42 {strides = array<i32>} : memref<128x128xf32, #tpu.memory_space<vmem>>, vector<128x128xf32>,
    return
  }
  func.func @transform_0(%arg0: i32) -> (i32, i32) {
    %c0_i32 = arith.constant 0 : i32
    %c0_i32_0 = arith.constant 0 : i32
    return %arg0, %c0_i32 : i32, i32
  }
  func.func @transform_1(%arg0: i32) -> (i32, i32) {
    %c0_i32 = arith.constant 0 : i32
    %c0_i32_0 = arith.constant 0 : i32
    %c0_i32_1 = arith.constant 0 : i32
    return %c0_i32, %c0_i32_0 : i32, i32
  }
  func.func @transform_2(%arg0: i32) -> (i32, i32) {
    %c0_i32 = arith.constant 0 : i32
    %c0_i32_0 = arith.constant 0 : i32
    %c0_i32_1 = arith.constant 0 : i32
    return %c0_i32, %c0_i32_0 : i32, i32
  }
  func.func @transform_3(%arg0: i32) -> (i32, i32) {
    %c0_i32 = arith.constant 0 : i32
    %c0_i32_0 = arith.constant 0 : i32
    %c0_i32_1 = arith.constant 0 : i32
    return %c0_i32, %c0_i32_0 : i32, i32
  }
  func.func @transform_4(%arg0: i32) -> (i32, i32) {
    %c0_i32 = arith.constant 0 : i32
    %c0_i32_0 = arith.constant 0 : i32
    %c0_i32_1 = arith.constant 0 : i32
    return %c0_i32, %c0_i32_0 : i32, i32
  }
  func.func @transform_5(%arg0: i32) -> (i32, i32) {
    %c0_i32 = arith.constant 0 : i32
    %c0_i32_0 = arith.constant 0 : i32
    %c0_i32_1 = arith.constant 0 : i32
    return %c0_i32, %c0_i32_0 : i32, i32
  }
  func.func @transform_6(%arg0: i32) -> (i32, i32) {
    %c0_i32 = arith.constant 0 : i32
    %c0_i32_0 = arith.constant 0 : i32
    %c0_i32_1 = arith.constant 0 : i32
    return %c0_i32, %c0_i32_0 : i32, i32
  }
  func.func @transform_7(%arg0: i32) -> (i32, i32) {
    %c0_i32 = arith.constant 0 : i32
    %c0_i32_0 = arith.constant 0 : i32
    return %arg0, %c0_i32 : i32, i32
  }
}

</mosaic_0001>

<bundles_post_ra>
// kernel: tpu_custom_call.1
= control target key start
LH: loop header
LB: loop body
LE: loop exit
PB: predicated region body
PF: predicated region fallthrough
CT: control target
= control target key end

     0   :  { %s9534_s0 = inlined_call_operand.hbm [shape: f32[392,128], index: 0, kind: input, shape index: {}]   ;;  %s9535_s1 = inlined_call_operand.hbm [shape: f32[1,128], index: 1, kind: input, shape index: {}]   ;;  %s9536_s2 = inlined_call_operand.vmem [shape: f32[1,128], index: 2, kind: input, shape index: {}]   ;;  %s9537_s3 = inlined_call_operand.hbm [shape: bf16[128,512], index: 3, kind: input, shape index: {}]   ;;  %s9538_s4 = inlined_call_operand.hbm [shape: f32[1,512], index: 4, kind: input, shape index: {}]   ;;  %s9539_s5 = inlined_call_operand.hbm [shape: bf16[512,128], index: 5, kind: input, shape index: {}]   ;;  %s9540_s6 = inlined_call_operand.vmem [shape: f32[1,128], index: 6, kind: input, shape index: {}]   ;;  %s9541_s7 = inlined_call_operand.hbm [shape: f32[392,128], index: 7, kind: output, shape index: {}]  }
   0x1   :  { %9620 = sst [smem:[#allocation84_spill]] %s9535_s1 }
   0x2   :  { %9621 = sst [smem:[#allocation85_spill]] %s9538_s4 }
   0x3   :  { %12 = vsyncpa [#allocation3], 0 }
   0x4   :  { %14 = vsyncpa [#allocation3 + $0x1], 0 }
   0x5   :  { %15 = vsyncpa [#allocation6], 0 }
   0x6   :  { %16 = vsyncpa [#allocation9], 0 }
   0x7   :  { %17 = vsyncpa [#allocation4], 0 }
   0x8   :  { %19 = vsyncpa [#allocation4 + $0x1], 0  ;;  %s5594_s24 = smov 0   ;;  %s5596_s25 = smov 0  }
   0x9   :  { %s5598_s26 = smov 0   ;;  %s5600_s27 = smov 0  }
   0xa LB: > { %s5615_s28 = sadd.s32 4294967295, %s5537_s27   ;;  %s4621_s29 = sadd.s32 4294967294, %s5537_s27   ;;  %s5537_s27 = sphi %s5600_s27, %s10038_s27   ;;  %s5533_s26 = sphi %s5598_s26, %s10042_s26   ;;  %s5529_s25 = sphi %s5596_s25, %s10041_s25   ;;  %s5525_s24 = sphi %s5594_s24, %s10040_s24  }
   0xb   : > { %s5619_s30 = sadd.s32 1, %s5537_s27   ;;  %s32_s8 = sadd.s32 1, %s5533_s26 }
   0xc   : > { %9622 = sst [smem:[#allocation16_spill]] %s5619_s30  ;;  %s29_s9 = ssub.s32 %s5537_s27, %s5619_s30 }
   0xd   : > { %p39_p0 = scmp.ne.s32.totalorder %s5533_s26, %s5529_s25  ;;  %p30_p1 = scmp.eq.s32.totalorder %s29_s9, 0 }
   0xe   : > { %p40_p2 = scmp.eq.s32.totalorder %s5537_s27, 0  ;;  %p45_p3 = scmp.ne.s32.totalorder %s5529_s25, %s5525_s24 }
   0xf   : > { %p9544_p4 = scmp.eq.s32.totalorder %s5615_s28, 0  ;;  %p195_p7 = scmp.eq.s32.totalorder %s5615_s28, 3 }
  0x10   : > { %s5631_s10 = scalar_select %p30_p1, %s5533_s26, %s32_s8  }
  0x11   : > { %p5633_p5 = por %p40_p2, %p39_p0  ;;  %p5639_p6 = por %p9544_p4, %p45_p3 }
  0x12   : > { %9623 = sst [smem:[#allocation17_spill]] %s5631_s10  ;;  %p201_p8 = scmp.eq.s32.totalorder %s4621_s29, 3 }
  0x13   : > { %p4622_p9 = scmp.ge.s32.totalorder %s5537_s27, 1  ;;  %p208_p10 = scmp.lt.s32.totalorder %s5537_s27, 5 }
  0x14   : > { %p5646_p11 = por %p195_p7, %p39_p0  ;;  %p5650_p12 = por %p201_p8, %p45_p3 }
  0x15   : > { %p5654_p13 = pnand %p4622_p9, %p208_p10  ;;  %s9629_s1 = sld [smem:[#allocation84_spill]] }
  0x16   : > { %s9627_s14 = scalar_select %p5650_p12, 1, 0 }
  0x17   : > { %p5055_p1 = pneg %p5654_p13  ;;  %s5539_s19 = smov [#allocation5]  }
  0x18   : > { %s222_s20 = sshll.u32 %s5539_s19, 4  ;;  %s9630_s4 = sld [smem:[#allocation85_spill]]  ;;  %s223_s20 = int_to_ptr.vmem [resolvable:$true] %s222_s20 }
  0x19   : > { %p5668_p0 = pnand %p5055_p1, %p9544_p4  ;;  %s5540_s8 = smov [#allocation8]  }
  0x1a   : > { %s251_s9 = sshll.u32 %s5540_s8, 4  ;;  %s234_s19 = sshll.u32 %s9537_s3, 4  ;;  %s252_s9 = int_to_ptr.vmem [resolvable:$true] %s251_s9  ;;  %s235_s19 = int_to_ptr.hbm [resolvable:$true] %s234_s19 }
  0x1b   : > { %s220_s18 = sshll.u32 %s9629_s1, 4  ;;  %s5541_s21 = smov [#allocation7]   ;;  %s221_s18 = int_to_ptr.hbm [resolvable:$true] %s220_s18 }
  0x1c   : > { %5058 = dma.hbm_to_vmem [thread:$0]  (!%p5668_p0), %s221_s18, 16, %s223_s20, [#allocation6]  }
  0x1d   : > { %s236_s22 = sshll.u32 %s5541_s21, 4  ;;  %s5542_s1 = smov 256   ;;  %s237_s22 = int_to_ptr.vmem [resolvable:$true] %s236_s22 }
  0x1e   : > { %s249_s23 = sshll.u32 %s9630_s4, 4  ;;  %s5543_s4 = smov 16   ;;  %s250_s23 = int_to_ptr.hbm [resolvable:$true] %s249_s23 }
  0x1f   : > { %5064 = dma.hbm_to_vmem [thread:$0]  (!%p5668_p0), %s250_s23, 64, %s252_s9, [#allocation9]  }
  0x20   : > { %5061 = dma.hbm_to_vmem [thread:$0]  (!%p5668_p0), %s235_s19, 4096, %s237_s22, [#allocation6], %s5542_s1, %s5542_s1, %s5543_s4  }
  0x21   : > { %s260_s18 = sshll.u32 %s9539_s5, 4  ;;  %s5544_s20 = smov [#allocation10]   ;;  %s261_s18 = int_to_ptr.hbm [resolvable:$true] %s260_s18 }
  0x22   : > { %s262_s30 = sshll.u32 %s5544_s20, 4  ;;  %s5545_s16 = smov 64   ;;  %s263_s30 = int_to_ptr.vmem [resolvable:$true] %s262_s30 }
  0x23   : > { %s5546_s17 = smov 4   ;;  %p4627_p2 = scmp.ge.s32.totalorder %s5537_s27, 4 }
  0x24   : > { %5067 = dma.hbm_to_vmem [thread:$0]  (!%p5668_p0), %s261_s18, 4096, %s263_s30, [#allocation9], %s5545_s16, %s5545_s16, %s5546_s17  }
  0x25   : > { %275 = sbr.rel (%p4627_p2) target bundleno = 78 (0x4e), region = 40 }
  0x2a   : > { %278 = sbr.rel (!%p5633_p5) target bundleno = 78 (0x4e), region = 44  ;;  %s279_s1 = sand.u32 (%p5633_p5), 1, %s5533_s26  }
  0x2b   : > { %s4629_s4 = sshll.u32 (%p5633_p5), %s5537_s27, 4  ;;  %s4628_s10 = sshll.u32 (%p5633_p5), %s279_s1, 7 }
  0x2c   : > { %s285_s23 = ssub.s32 (%p5633_p5), 49, %s4629_s4  ;;  %s5694_s30 = scalar_lea.sflag (%p5633_p5), [#allocation3], %s279_s1 }
  0x2d   : > { %p286_p3 = scmp.lt.s32.totalorder (%p5633_p5), %s285_s23, 16  ;;  %s283_s21 = scalar_lea.vmem (%p5633_p5), [#allocation2], %s4628_s10 }
  0x2f   : > { %s10044_s23 = smov (!%p286_p3, %s285_s23), 16 }
  0x30   : > { %s4630_s9 = sshll.u32 %s10044_s23, 3 }
  0x31   : > { %s289_s19 = ssub.s32 128, %s4630_s9 }
  0x32   : > { %s290_s29 = sshll.u32 %s289_s19, 4 }
  0x33   : > { %291 = vsyncadd %s5694_s30, %s290_s29  ;;  %p5697_p5 = scmp.ne.s32.totalorder %s4630_s9, 0  ;;  %s4971_s22 = sshll.u32 %s5537_s27, 7 }
  0x34   : > { %s294_s20 = scalar_lea.hbm %s9534_s0, %s4971_s22  ;;  %s5705_s16 = sshll.u32 %s283_s21, 4  ;;  %s299_s16 = int_to_ptr.vmem [resolvable:$true] %s5705_s16 }
  0x35   : > { %s296_s17 = sshll.u32 %s294_s20, 4  ;;  %s4634_s1 = sshll.u32 %s10044_s23, 7  ;;  %s5708_s17 = int_to_ptr.hbm [resolvable:$true] %s296_s17 }
  0x36   : > { %s5413_s4 = sshra.s32 %s5708_s17, 4  ;;  %s5415_s10 = sshrl.u32 %s4634_s1, 4  ;;  %s5414_s4 = int_to_ptr.hbm [resolvable:$true] %s5413_s4 }
  0x37   : > { %s5420_s9 = scalar_lea.hbm %s5414_s4, %s5415_s10  ;;  %s5424_s21 = scalar_lea.hbm %s9534_s0, 392 }
  0x38   : > { %p5421_p7 = scmp.ne.s32.totalorder %s5414_s4, %s5420_s9  ;;  %p5425_p10 = scmp.lt.s32.totalorder %s5414_s4, %s9534_s0 }
  0x39   : > { %p5426_p1 = scmp.lt.s32.totalorder %s5424_s21, %s5420_s9 }
  0x3a   : > { %p5422_p8 = pnand %p5421_p7, %p5697_p5 }
  0x3b   : > { %p5427_p0 = por %p5426_p1, %p5425_p10 }
  0x3c   : > { %p5423_p9 = pneg %p5422_p8 }
  0x3e   : > { %p5428_p2 = pnand %p5427_p0, %p5423_p9 }
  0x40   : > { %5431 = shalt.err (!%p5428_p2)
}
  0x41   : > { %s5432_s18 = sshra.s32 %s299_s16, 4  ;;  %s5547_s19 = smov [#allocation2]   ;;  %s5433_s18 = int_to_ptr.vmem [resolvable:$true] %s5432_s18 }
  0x42   : > { %s5439_s20 = scalar_lea.vmem %s5433_s18, %s5415_s10  ;;  %s5443_s29 = scalar_lea.vmem %s5547_s19, 256 }
  0x43   : > { %p5440_p3 = scmp.ne.s32.totalorder %s5433_s18, %s5439_s20  ;;  %p5445_p4 = scmp.lt.s32.totalorder %s5443_s29, %s5439_s20 }
  0x45   : > { %p5441_p7 = pnand %p5440_p3, %p5697_p5 }
  0x47   : > { %p5442_p8 = pneg %p5441_p7 }
  0x49   : > { %p5447_p12 = pnand %p5445_p4, %p5442_p8 }
  0x4b   : > { %5450 = shalt.err (!%p5447_p12)
}
  0x4c   : > { %s5548_s4 = smov 128   ;;  %s5549_s9 = smov 8  }
  0x4d   : > { %304 = dma.hbm_to_vmem [thread:$0]  (%p5697_p5), %s5708_s17, %s4634_s1, %s299_s16, %s5694_s30, %s5548_s4, %s5548_s4, %s5549_s9  }
  0x4e PF: > { %310 = sbr.rel (%p5654_p13) target bundleno = 1432 (0x598), region = 48 }
  0x53   : > { %s5737_s10 = sand.u32 1, %s5529_s25  }
  0x54   : > { %s4636_s21 = sshll.u32 %s5737_s10, 7  ;;  %s313_s22 = scalar_lea.sflag [#allocation3], %s5737_s10 }
  0x55   : > { %s5743_s8 = scalar_lea.vmem [#allocation2], %s4636_s21 }
  0x56   : > { %5508 = dma.done.wait (%p5639_p6), %s313_s22, 2048  }
  0x57   : > { %5510 = vsyncadd (%p5639_p6), %s313_s22, 4294965248  ;;  %p9633_p4 = scmp.eq.s32.totalorder %s5615_s28, 0 }
  0x59   : > { %5512 = dma.done.wait (%p9633_p4), [#allocation6], 4112   ;;  %p9634_p12 = pmov %p9633_p4 }
  0x5a   : > { %p9635_p13 = pmov %p9633_p4 }
  0x5b   : > { %5514 = vsyncadd (%p9634_p12), [#allocation6], 4294963184 }
  0x5c   : > { %5516 = dma.done.wait (%p9635_p13), [#allocation9], 4160   ;;  %p9636_p5 = pmov %p9633_p4 }
  0x5d   : > { %v380_v0 = vld [vmem:[%s5743_s8 + $0x10] sm:$0xff]  ;;  %v378_v1 = vld [vmem:[%s5743_s8] sm:$0xff]  ;;  %v381_v3 = vld [vmem:[%s5743_s8 + $0x18] sm:$0xff]  ;;  %v5550_v7 = vmov 128.0   ;;  %s9358_s17 = scalar_lea.vmem [#allocation11], %s4636_s21  ;;  %s4488_s1 = scalar_lea.sflag [#allocation4], %s5737_s10 }
  0x5e   : > { %5518 = vsyncadd (%p9636_p5), [#allocation9], 4294963136  ;;  %400 = vadd.xlane.f32.xlu1 %v380_v0  ;;  %396 = vadd.xlane.f32.xlu0 %v378_v1  ;;  %v382_v2 = vld [vmem:[%s5743_s8 + $0x20] sm:$0xff]  ;;  %v379_v4 = vld [vmem:[%s5743_s8 + $0x8] sm:$0xff]  ;;  %5129 = vrcp.f32 %v5550_v7  ;;  %s4963_s18 = sshll.u32 (%p5646_p11), %s5615_s28, 4 }
  0x5f   : > { %404 = vadd.xlane.f32.xlu2 %v382_v2  ;;  %v383_v5 = vld [vmem:[%s5743_s8 + $0x28] sm:$0xff]  ;;  %v384_v6 = vld [vmem:[%s5743_s8 + $0x30] sm:$0xff]  ;;  %v5780_v28 = vld [vmem:[%s5743_s8 + $0x38] sm:$0xff]  ;;  %s4496_s20 = ssub.s32 (%p5646_p11), 49, %s4963_s18 }
  0x60   : > { %v5795_v36 = vld [vmem:[%s5743_s8 + $0x40] sm:$0xff]  ;;  %v5806_v42 = vld [vmem:[%s5743_s8 + $0x58] sm:$0xff]  ;;  %v5809_v43 = vld [vmem:[%s5743_s8 + $0x48] sm:$0xff]  ;;  %p4497_p6 = scmp.lt.s32.totalorder (%p5646_p11), %s4496_s20, 16 }
  0x61   : > { %v5818_v46 = vld [vmem:[%s5743_s8 + $0x60] sm:$0xff]  ;;  %v5821_v47 = vld [vmem:[%s5743_s8 + $0x50] sm:$0xff]  ;;  %v5826_v48 = vld [vmem:[%s5743_s8 + $0x68] sm:$0xff] }
  0x62   : > { %v5830_v49 = vld [vmem:[%s5743_s8 + $0x70] sm:$0xff]  ;;  %v4756_v50 = vld [vmem:[#allocation7 + $0xe0] sm:$0xf]  ;;  %v5000_v52 = vld [vmem:[#allocation7 + $0xe4] sm:$0xf] }
  0x63   : > { %v5002_v51 = vld [vmem:[#allocation7 + $0xec] sm:$0xf0]  ;;  %v4758_v54 = vld [vmem:[#allocation7 + $0xf0] sm:$0xf0]  ;;  %v4764_v55 = vld [vmem:[#allocation7 + $0xe8] sm:$0xf] }
  0x64   : > { %v5130_v8 = vpop.eup %5129  ;;  %v4757_v53 = vor.u32 %v5002_v51, %v4756_v50  ;;  %v5003_v56 = vld [vmem:[#allocation7 + $0xf4] sm:$0xf0]  ;;  %v4761_v57 = vor.u32 %v5000_v52, %v4758_v54  ;;  %v5001_v59 = vld [vmem:[#allocation7 + $0xec] sm:$0xf]  ;;  %v4766_v60 = vld [vmem:[#allocation7 + $0xf8] sm:$0xf0] }
  0x65   : > { %v429_v9 = vmul.f32 128.0, %v5130_v8  ;;  %vm433_vm0 = vweird.f32 %v5130_v8  ;;  %v4765_v58 = vor.u32 %v5003_v56, %v4764_v55  ;;  %v4769_v61 = vor.u32 %v5001_v59, %v4766_v60  ;;  %v4740_v62 = vld [vmem:[#allocation7 + $0xc0] sm:$0xf]  ;;  %v4998_v63 = vld [vmem:[#allocation7 + $0xcc] sm:$0xf0] }
  0x66   : > { %402 = vadd.xlane.f32.xlu1 %v381_v3  ;;  %398 = vadd.xlane.f32.xlu0 %v379_v4  ;;  %v4997_v7 = vld [vmem:[#allocation7 + $0xcc] sm:$0xf]  ;;  %v4692_v50 = vld [vmem:[#allocation7 + $0x60] sm:$0xf]  ;;  %v4986_v51 = vld [vmem:[#allocation7 + $0x6c] sm:$0xf0] }
  0x67   : > { %406 = vadd.xlane.f32.xlu2 %v383_v5  ;;  %v430_v10 = vsub.f32 1.0, %v429_v9  ;;  %971 = vmatpush.bf16.msra.mxu0 %v4757_v53  ;;  %v4984_v52 = vld [vmem:[#allocation7 + $0x64] sm:$0xf]  ;;  %v4693_v53 = vor.u32 %v4986_v51, %v4692_v50  ;;  %v4694_v54 = vld [vmem:[#allocation7 + $0x70] sm:$0xf0] }
  0x68   : > { %1020 = vmatpush.bf16.msra.mxu1 %v4761_v57  ;;  %1069 = vmatpush.bf16.msra.mxu2 %v4765_v58  ;;  %v4700_v55 = vld [vmem:[#allocation7 + $0x68] sm:$0xf]  ;;  %v4987_v56 = vld [vmem:[#allocation7 + $0x74] sm:$0xf0]  ;;  %v4697_v57 = vor.u32 %v4984_v52, %v4694_v54  ;;  %v4985_v59 = vld [vmem:[#allocation7 + $0x6c] sm:$0xf] }
  0x69   : > { %v431_v11 = vmul.f32 %v5130_v8, %v430_v10  ;;  %1118 = vmatpush.bf16.msra.mxu3 %v4769_v61  ;;  %v4724_v10 = vld [vmem:[#allocation7 + $0xa0] sm:$0xf]  ;;  %v4701_v58 = vor.u32 %v4987_v56, %v4700_v55  ;;  %v4702_v60 = vld [vmem:[#allocation7 + $0x78] sm:$0xf0] }
  0x6a   : > { %v4705_v61 = vor.u32 %v4985_v59, %v4702_v60  ;;  %v4654_v50 = vld [vmem:[#allocation7 + $0x18] sm:$0xf0] }
  0x6b   : > { %v432_v12 = vadd.f32 %v5130_v8, %v431_v11  ;;  %v4994_v11 = vld [vmem:[#allocation7 + $0xac] sm:$0xf0] }
  0x6d   : > { %v5764_v13 = vsel %vm433_vm0, %v5130_v8, %v432_v12  ;;  %v4750_v8 = vld [vmem:[#allocation7 + $0xd8] sm:$0xf0]  ;;  %v4992_v12 = vld [vmem:[#allocation7 + $0xa4] sm:$0xf] }
  0x6e   : > { %v4753_v9 = vor.u32 %v4997_v7, %v4750_v8  ;;  %v4981_v7 = vld [vmem:[#allocation7 + $0x4c] sm:$0xf]  ;;  %v4686_v8 = vld [vmem:[#allocation7 + $0x58] sm:$0xf0] }
  0x6f   : > { %408 = vadd.xlane.f32.xlu2 %v384_v6 }
  0x70   : > { %1119 = vmatpush.bf16.msra.mxu3 %v4753_v9  ;;  %v4689_v9 = vor.u32 %v4981_v7, %v4686_v8 }
  0xd1   : > { %v401_v14 = vpop.xlane.xlu1 %400  ;;  %v397_v15 = vpop.xlane.xlu0 %396 }
  0xd2   : > { %v435_v16 = vmul.f32 %v5764_v13, %v397_v15  ;;  %v405_v18 = vpop.xlane.xlu2 %404  ;;  %v437_v27 = vmul.f32 %v5764_v13, %v401_v14  ;;  %v4725_v14 = vor.u32 %v4994_v11, %v4724_v10  ;;  %v4726_v15 = vld [vmem:[#allocation7 + $0xb0] sm:$0xf0]  ;;  %v4660_v10 = vld [vmem:[#allocation7 + $0x20] sm:$0xf]  ;;  %v4978_v11 = vld [vmem:[#allocation7 + $0x2c] sm:$0xf0] }
  0xd3   : > { %v439_v26 = vmul.f32 %v5764_v13, %v405_v18  ;;  %v4995_v18 = vld [vmem:[#allocation7 + $0xb4] sm:$0xf0] }
  0xd4   : > { %v5767_v17 = vsub.f32 %v378_v1, %v435_v16  ;;  %v5789_v33 = vsub.f32 %v380_v0, %v437_v27  ;;  %v4996_v0 = vld [vmem:[#allocation7 + $0xc4] sm:$0xf]  ;;  %v4741_v1 = vor.u32 %v4998_v63, %v4740_v62  ;;  %v4732_v16 = vld [vmem:[#allocation7 + $0xa8] sm:$0xf]  ;;  %v4990_v27 = vld [vmem:[#allocation7 + $0x8c] sm:$0xf0] }
  0xd5   : > { %v5787_v32 = vsub.f32 %v382_v2, %v439_v26  ;;  %v4742_v2 = vld [vmem:[#allocation7 + $0xd0] sm:$0xf0]  ;;  %v4708_v26 = vld [vmem:[#allocation7 + $0x80] sm:$0xf]  ;;  %v4982_v63 = vld [vmem:[#allocation7 + $0x4c] sm:$0xf0] }
  0xd6   : > { %v467_v19 = vmul.f32 %v5767_v17, %v5767_v17  ;;  %v469_v37 = vmul.f32 %v5789_v33, %v5789_v33  ;;  %972 = vmatpush.bf16.msra.mxu0 %v4741_v1  ;;  %v4676_v62 = vld [vmem:[#allocation7 + $0x40] sm:$0xf] }
  0xd7   : > { %v471_v34 = vmul.f32 %v5787_v32, %v5787_v32  ;;  %v4677_v1 = vor.u32 %v4982_v63, %v4676_v62 }
  0xd8   : > { %483 = vadd.xlane.f32.xlu0 %v467_v19  ;;  %v4729_v19 = vor.u32 %v4992_v12, %v4726_v15  ;;  %v4976_v12 = vld [vmem:[#allocation7 + $0x24] sm:$0xf]  ;;  %v4661_v15 = vor.u32 %v4978_v11, %v4660_v10 }
  0xd9   : > { %v403_v20 = vpop.xlane.xlu1 %402  ;;  %v399_v21 = vpop.xlane.xlu0 %398 }
  0xda   : > { %v438_v22 = vmul.f32 %v5764_v13, %v403_v20  ;;  %v436_v23 = vmul.f32 %v5764_v13, %v399_v21  ;;  %v407_v31 = vpop.xlane.xlu2 %406  ;;  %v4733_v20 = vor.u32 %v4995_v18, %v4732_v16  ;;  %v4993_v21 = vld [vmem:[#allocation7 + $0xac] sm:$0xf]  ;;  %973 = vmatpush.bf16.msra.mxu0 %v4725_v14  ;;  %v4662_v16 = vld [vmem:[#allocation7 + $0x30] sm:$0xf0]  ;;  %v4668_v18 = vld [vmem:[#allocation7 + $0x28] sm:$0xf] }
  0xdb   : > { %v440_v35 = vmul.f32 %v5764_v13, %v407_v31  ;;  %v4710_v31 = vld [vmem:[#allocation7 + $0x90] sm:$0xf0] }
  0xdc   : > { %v5773_v24 = vsub.f32 %v381_v3, %v438_v22  ;;  %v5775_v25 = vsub.f32 %v379_v4, %v436_v23  ;;  %v4748_v3 = vld [vmem:[#allocation7 + $0xc8] sm:$0xf]  ;;  %v4999_v4 = vld [vmem:[#allocation7 + $0xd4] sm:$0xf0]  ;;  %v4734_v22 = vld [vmem:[#allocation7 + $0xb8] sm:$0xf0] }
  0xdd   : > { %v5800_v38 = vsub.f32 %v383_v5, %v440_v35  ;;  %v4745_v5 = vor.u32 %v4996_v0, %v4742_v2  ;;  %v4737_v23 = vor.u32 %v4993_v21, %v4734_v22  ;;  %v4991_v35 = vld [vmem:[#allocation7 + $0x94] sm:$0xf0]  ;;  %v4980_v0 = vld [vmem:[#allocation7 + $0x44] sm:$0xf]  ;;  %v4678_v2 = vld [vmem:[#allocation7 + $0x50] sm:$0xf0] }
  0xde   : > { %v470_v29 = vmul.f32 %v5773_v24, %v5773_v24  ;;  %v468_v30 = vmul.f32 %v5775_v25, %v5775_v25  ;;  %v4979_v21 = vld [vmem:[#allocation7 + $0x34] sm:$0xf0]  ;;  %v4977_v22 = vld [vmem:[#allocation7 + $0x2c] sm:$0xf] }
  0xdf   : > { %v472_v40 = vmul.f32 %v5800_v38, %v5800_v38  ;;  %1021 = vmatpush.bf16.msra.mxu1 %v4745_v5  ;;  %1120 = vmatpush.bf16.msra.mxu3 %v4737_v23  ;;  %v4681_v5 = vor.u32 %v4980_v0, %v4678_v2  ;;  %v4670_v23 = vld [vmem:[#allocation7 + $0x38] sm:$0xf0] }
  0xe0   : > { %489 = vadd.xlane.f32.xlu2 %v470_v29  ;;  %410 = vadd.xlane.f32.xlu0 %v5780_v28  ;;  %v4988_v29 = vld [vmem:[#allocation7 + $0x84] sm:$0xf] }
  0xe1   : > { %485 = vadd.xlane.f32.xlu1 %v468_v30  ;;  %v4709_v30 = vor.u32 %v4990_v27, %v4708_v26  ;;  %v4669_v26 = vor.u32 %v4979_v21, %v4668_v18  ;;  %v4673_v27 = vor.u32 %v4977_v22, %v4670_v23 }
  0xe2   : > { %v409_v39 = vpop.xlane.xlu2 %408 }
  0xe3   : > { %v441_v41 = vmul.f32 %v5764_v13, %v409_v39  ;;  %1022 = vmatpush.bf16.msra.mxu1 %v4729_v19  ;;  %974 = vmatpush.bf16.msra.mxu0 %v4709_v30  ;;  %v4644_v30 = vld [vmem:[#allocation7] sm:$0xf] }
  0xe5   : > { %v5812_v44 = vsub.f32 %v384_v6, %v441_v41  ;;  %v4749_v6 = vor.u32 %v4999_v4, %v4748_v3  ;;  %v4718_v41 = vld [vmem:[#allocation7 + $0x98] sm:$0xf0]  ;;  %v4684_v3 = vld [vmem:[#allocation7 + $0x48] sm:$0xf]  ;;  %v4983_v4 = vld [vmem:[#allocation7 + $0x54] sm:$0xf0] }
  0xe7   : > { %v473_v45 = vmul.f32 %v5812_v44, %v5812_v44  ;;  %1070 = vmatpush.bf16.msra.mxu2 %v4749_v6  ;;  %975 = vmatpush.bf16.msra.mxu0 %v4693_v53  ;;  %v4685_v6 = vor.u32 %v4983_v4, %v4684_v3 }
  0xe8   : > { %491 = vadd.xlane.f32.xlu2 %v471_v34  ;;  %412 = vadd.xlane.f32.xlu0 %v5795_v36  ;;  %v4716_v34 = vld [vmem:[#allocation7 + $0x88] sm:$0xf] }
  0xe9   : > { %487 = vadd.xlane.f32.xlu1 %v469_v37  ;;  %v4713_v37 = vor.u32 %v4988_v29, %v4710_v31  ;;  %v4717_v39 = vor.u32 %v4991_v35, %v4716_v34  ;;  %v4974_v31 = vld [vmem:[#allocation7 + $0xc] sm:$0xf0]  ;;  %v4972_v35 = vld [vmem:[#allocation7 + $0x4] sm:$0xf] }
  0xea   : > { %v4645_v34 = vor.u32 %v4974_v31, %v4644_v30 }
  0xeb   : > { %1071 = vmatpush.bf16.msra.mxu2 %v4733_v20  ;;  %1023 = vmatpush.bf16.msra.mxu1 %v4713_v37  ;;  %v4665_v20 = vor.u32 %v4976_v12, %v4662_v16  ;;  %v4646_v37 = vld [vmem:[#allocation7 + $0x10] sm:$0xf0] }
  0xec   : > { %976 = vmatpush.bf16.msra.mxu0 %v4677_v1 }
  0xef   : > { %1072 = vmatpush.bf16.msra.mxu2 %v4717_v39  ;;  %1024 = vmatpush.bf16.msra.mxu1 %v4697_v57  ;;  %v4652_v39 = vld [vmem:[#allocation7 + $0x8] sm:$0xf] }
  0xf0   : > { %418 = vadd.xlane.f32.xlu2 %v5806_v42  ;;  %493 = vadd.xlane.f32.xlu0 %v472_v40  ;;  %v4989_v40 = vld [vmem:[#allocation7 + $0x8c] sm:$0xf] }
  0xf1   : > { %414 = vadd.xlane.f32.xlu1 %v5809_v43  ;;  %977 = vmatpush.bf16.msra.mxu0 %v4661_v15 }
  0xf3   : > { %1073 = vmatpush.bf16.msra.mxu2 %v4701_v58  ;;  %1025 = vmatpush.bf16.msra.mxu1 %v4681_v5 }
  0xf5   : > { %978 = vmatpush.bf16.msra.mxu0 %v4645_v34 }
  0xf7   : > { %1074 = vmatpush.bf16.msra.mxu2 %v4685_v6  ;;  %1026 = vmatpush.bf16.msra.mxu1 %v4665_v20 }
  0xf8   : > { %420 = vadd.xlane.f32.xlu2 %v5818_v46  ;;  %495 = vadd.xlane.f32.xlu0 %v473_v45  ;;  %v4721_v45 = vor.u32 %v4989_v40, %v4718_v41  ;;  %v4649_v40 = vor.u32 %v4972_v35, %v4646_v37  ;;  %v4975_v41 = vld [vmem:[#allocation7 + $0x14] sm:$0xf0] }
  0xf9   : > { %416 = vadd.xlane.f32.xlu1 %v5821_v47  ;;  %v4653_v51 = vor.u32 %v4975_v41, %v4652_v39 }
  0xfa   : > { %1121 = vmatpush.bf16.msra.mxu3 %v4721_v45  ;;  %v4973_v45 = vld [vmem:[#allocation7 + $0xc] sm:$0xf] }
  0xfb   : > { %1075 = vmatpush.bf16.msra.mxu2 %v4669_v26  ;;  %v4657_v52 = vor.u32 %v4973_v45, %v4654_v50  ;;  %1027 = vmatpush.bf16.msra.mxu1 %v4649_v40 }
  0xfe   : > { %1122 = vmatpush.bf16.msra.mxu3 %v4705_v61 }
  0xff   : > { %1076 = vmatpush.bf16.msra.mxu2 %v4653_v51 }
 0x100   : > { %422 = vadd.xlane.f32.xlu0 %v5826_v48 }
 0x102   : > { %1123 = vmatpush.bf16.msra.mxu3 %v4689_v9 }
 0x106   : > { %1124 = vmatpush.bf16.msra.mxu3 %v4673_v27 }
 0x108   : > { %424 = vadd.xlane.f32.xlu0 %v5830_v49 }
 0x10a   : > { %1125 = vmatpush.bf16.msra.mxu3 %v4657_v52  ;;  %v5885_v52 = vld [vmem:[#allocation5] ss:$0 sm:$0xff] }
 0x14b   : > { %v484_v14 = vpop.xlane.xlu0 %483 }
 0x14c   : > { %v515_v19 = vmul.f32 %v484_v14, %v5764_v13 }
 0x14e   : > { %v531_v29 = vadd.f32 1e-05, %v515_v19 }
 0x150   : > { %5131 = vrsqrt.f32 %v531_v29  ;;  %vm553_vm2 = vweird.f32 %v531_v29 }
 0x153   : > { %v490_v53 = vpop.xlane.xlu2 %489  ;;  %v411_v54 = vpop.xlane.xlu0 %410 }
 0x154   : > { %v518_v55 = vmul.f32 %v490_v53, %v5764_v13  ;;  %v486_v56 = vpop.xlane.xlu1 %485  ;;  %v442_v57 = vmul.f32 %v5764_v13, %v411_v54  ;;  %v5890_v54 = vld [vmem:[%s5743_s8 + $0x78] sm:$0xff] }
 0x155   : > { %v516_v58 = vmul.f32 %v486_v56, %v5764_v13 }
 0x156   : > { %v5132_v59 = vpop.eup %5131  ;;  %v5837_v60 = vadd.f32 1e-05, %v518_v55  ;;  %v5840_v61 = vsub.f32 %v5780_v28, %v442_v57 }
 0x157   : > { %v548_v62 = vmul.f32 %v5132_v59, %v531_v29  ;;  %v532_v63 = vadd.f32 1e-05, %v516_v58  ;;  %vm554_vm1 = vweird.f32 %v5132_v59 }
 0x158   : > { %5133 = vrsqrt.f32 %v5837_v60  ;;  %v474_v0 = vmul.f32 %v5840_v61, %v5840_v61  ;;  %vm5862_vm4 = vmor %vm553_vm2, %vm554_vm1  ;;  %vm583_vm9 = vweird.f32 %v5837_v60 }
 0x159   : > { %v549_v1 = vmul.f32 %v5132_v59, %v548_v62  ;;  %5135 = vrsqrt.f32 %v532_v63  ;;  %vm563_vm3 = vweird.f32 %v532_v63 }
 0x15a   : > { %497 = vadd.xlane.f32.xlu1 %v474_v0 }
 0x15b   : > { %v550_v2 = vmul.f32 0.5, %v549_v1  ;;  %v492_v3 = vpop.xlane.xlu2 %491  ;;  %v413_v4 = vpop.xlane.xlu0 %412  ;;  %v5904_v1 = vld [vmem:[%s9536_s2] ss:$0 sm:$0xff] }
 0x15c   : > { %v488_v5 = vpop.xlane.xlu1 %487  ;;  %v443_v6 = vmul.f32 %v5764_v13, %v413_v4  ;;  %v519_v11 = vmul.f32 %v492_v3, %v5764_v13 }
 0x15d   : > { %v551_v7 = vsub.f32 1.5, %v550_v2  ;;  %v517_v28 = vmul.f32 %v488_v5, %v5764_v13 }
 0x15e   : > { %v5847_v8 = vpop.eup %5133  ;;  %v5850_v9 = vsub.f32 %v5795_v36, %v443_v6  ;;  %v5860_v36 = vadd.f32 1e-05, %v519_v11 }
 0x15f   : > { %v5136_v10 = vpop.eup %5135  ;;  %v5853_v12 = vadd.f32 1e-05, %v517_v28  ;;  %v552_v15 = vmul.f32 %v5132_v59, %v551_v7  ;;  %v578_v16 = vmul.f32 %v5847_v8, %v5837_v60  ;;  %vm584_vm10 = vweird.f32 %v5847_v8 }
 0x160   : > { %v558_v14 = vmul.f32 %v5136_v10, %v532_v63  ;;  %v475_v19 = vmul.f32 %v5850_v9, %v5850_v9  ;;  %vm564_vm5 = vweird.f32 %v5136_v10  ;;  %vm5932_vm12 = vmor %vm583_vm9, %vm584_vm10  ;;  %vm593_vm15 = vweird.f32 %v5860_v36 }
 0x161   : > { %5137 = vrsqrt.f32 %v5853_v12  ;;  %v556_v29 = vsel %vm5862_vm4, %v5132_v59, %v552_v15  ;;  %v579_v31 = vmul.f32 %v5847_v8, %v578_v16  ;;  %vm565_vm6 = vmor %vm563_vm3, %vm564_vm5  ;;  %vm573_vm7 = vweird.f32 %v5853_v12 }
 0x162   : > { %v559_v18 = vmul.f32 %v5136_v10, %v558_v14  ;;  %499 = vadd.xlane.f32.xlu1 %v475_v19  ;;  %5139 = vrsqrt.f32 %v5860_v36  ;;  %v707_v45 = vmul.f32 %v556_v29, %v5767_v17 }
 0x163   : > { %v419_v20 = vpop.xlane.xlu2 %418  ;;  %v494_v21 = vpop.xlane.xlu0 %493 }
 0x164   : > { %v560_v23 = vmul.f32 0.5, %v559_v18  ;;  %v446_v26 = vmul.f32 %v5764_v13, %v419_v20  ;;  %v415_v27 = vpop.xlane.xlu1 %414  ;;  %v520_v30 = vmul.f32 %v494_v21, %v5764_v13  ;;  %v726_v0 = vmul.f32 %v5885_v52, %v707_v45 }
 0x165   : > { %v444_v34 = vmul.f32 %v5764_v13, %v415_v27 }
 0x166   : > { %v561_v35 = vsub.f32 1.5, %v560_v23  ;;  %v5873_v37 = vsub.f32 %v5806_v42, %v446_v26  ;;  %v5875_v39 = vadd.f32 1e-05, %v520_v30  ;;  %v580_v42 = vmul.f32 0.5, %v579_v31 }
 0x167   : > { %v5138_v40 = vpop.eup %5137  ;;  %v5880_v41 = vsub.f32 %v5809_v43, %v444_v34  ;;  %v745_v15 = vadd.f32 %v5904_v1, %v726_v0 }
 0x168   : > { %v562_v50 = vmul.f32 %v5136_v10, %v561_v35  ;;  %v568_v51 = vmul.f32 %v5138_v40, %v5853_v12  ;;  %5141 = vrsqrt.f32 %v5875_v39  ;;  %v478_v53 = vmul.f32 %v5873_v37, %v5873_v37 }
 0x169   : > { %v476_v43 = vmul.f32 %v5880_v41, %v5880_v41  ;;  %v581_v2 = vsub.f32 1.5, %v580_v42  ;;  %vm574_vm8 = vweird.f32 %v5138_v40  ;;  %vm603_vm13 = vweird.f32 %v5875_v39 }
 0x16a   : > { %v566_v55 = vsel %vm565_vm6, %v5136_v10, %v562_v50  ;;  %v569_v56 = vmul.f32 %v5138_v40, %v568_v51  ;;  %505 = vadd.xlane.f32.xlu0 %v478_v53  ;;  %426 = vadd.xlane.f32.xlu1 %v5890_v54  ;;  %vm5921_vm11 = vmor %vm573_vm7, %vm574_vm8 }
 0x16b   : > { %v708_v17 = vmul.f32 %v566_v55, %v5775_v25  ;;  %v421_v57 = vpop.xlane.xlu2 %420  ;;  %v5895_v58 = vpop.xlane.xlu0 %495  ;;  %501 = vadd.xlane.f32.xlu2 %v476_v43  ;;  %v582_v60 = vmul.f32 %v5847_v8, %v581_v2 }
 0x16c   : > { %v570_v59 = vmul.f32 0.5, %v569_v56  ;;  %v447_v62 = vmul.f32 %v5764_v13, %v421_v57  ;;  %v417_v63 = vpop.xlane.xlu1 %416  ;;  %v5906_v25 = vpop.eup %5139 }
 0x16d   : > { %v445_v3 = vmul.f32 %v5764_v13, %v417_v63  ;;  %v727_v4 = vmul.f32 %v5885_v52, %v708_v17  ;;  %v588_v16 = vmul.f32 %v5906_v25, %v5860_v36  ;;  %v586_v26 = vsel %vm5932_vm12, %v5847_v8, %v582_v60 }
 0x16e   : > { %v5142_v5 = vpop.eup %5141  ;;  %v571_v6 = vsub.f32 1.5, %v570_v59  ;;  %v5911_v7 = vsub.f32 %v5818_v46, %v447_v62  ;;  %v710_v34 = vmul.f32 %v586_v26, %v5773_v24  ;;  %vm594_vm0 = vweird.f32 %v5906_v25 }
 0x16f   : > { %v598_v28 = vmul.f32 %v5142_v5, %v5875_v39  ;;  %v5917_v10 = vsub.f32 %v5821_v47, %v445_v3  ;;  %v746_v46 = vadd.f32 %v5904_v1, %v727_v4  ;;  %v589_v27 = vmul.f32 %v5906_v25, %v588_v16  ;;  %vm595_vm2 = vmor %vm593_vm15, %vm594_vm0 }
 0x170   : > { %v572_v11 = vmul.f32 %v5138_v40, %v571_v6  ;;  %v479_v19 = vmul.f32 %v5911_v7, %v5911_v7  ;;  %vm604_vm14 = vweird.f32 %v5142_v5 }
 0x171   : > { %v477_v47 = vmul.f32 %v5917_v10, %v5917_v10  ;;  %v761_v12 = vpack.c.bf16 %v746_v46, %v745_v15  ;;  %v599_v21 = vmul.f32 %v5142_v5, %v598_v28  ;;  %vm605_vm1 = vmor %vm603_vm13, %vm604_vm14 }
 0x172   : > { %v576_v20 = vsel %vm5921_vm11, %v5138_v40, %v572_v11  ;;  %507 = vadd.xlane.f32.xlu1 %v479_v19  ;;  %v590_v40 = vmul.f32 0.5, %v589_v27 }
 0x173   : > { %v423_v22 = vpop.xlane.xlu0 %422  ;;  %503 = vadd.xlane.f32.xlu2 %v477_v47  ;;  %979 = vmatmul.bf16.vlgmr.msra.gmra.mxu0 %v761_v12  ;;  %v709_v30 = vmul.f32 %v576_v20, %v5789_v33  ;;  %v600_v31 = vmul.f32 0.5, %v599_v21  ;;  %v729_v33 = vmul.f32 %v5885_v52, %v710_v34 }
 0x174   : > { %v448_v23 = vmul.f32 %v5764_v13, %v423_v22  ;;  %1028 = vmatmul.bf16.vlgmr.msra.gmra.mxu1 %v761_v12  ;;  %1077 = vmatmul.bf16.vlgmr.msra.gmra.mxu2 %v761_v12  ;;  %v591_v42 = vsub.f32 1.5, %v590_v40 }
 0x175   : > { %1126 = vmatmul.bf16.vlgmr.msra.gmra.mxu3 %v761_v12  ;;  %v728_v8 = vmul.f32 %v5885_v52, %v709_v30  ;;  %v601_v45 = vsub.f32 1.5, %v600_v31  ;;  %v748_v55 = vadd.f32 %v5904_v1, %v729_v33 }
 0x176   : > { %v5947_v29 = vsub.f32 %v5826_v48, %v448_v23  ;;  %v592_v43 = vmul.f32 %v5906_v25, %v591_v42 }
 0x177   : > { %v747_v24 = vadd.f32 %v5904_v1, %v728_v8  ;;  %v602_v53 = vmul.f32 %v5142_v5, %v601_v45 }
 0x178   : > { %v480_v35 = vmul.f32 %v5947_v29, %v5947_v29  ;;  %v596_v17 = vsel %vm595_vm2, %v5906_v25, %v592_v43  ;;  %v521_v25 = vmul.f32 %v5895_v58, %v5764_v13 }
 0x179   : > { %v762_v39 = vpack.c.bf16 %v748_v55, %v747_v24  ;;  %v711_v57 = vmul.f32 %v596_v17, %v5787_v32 }
 0x17b   : > { %v425_v50 = vpop.xlane.xlu0 %424  ;;  %509 = vadd.xlane.f32.xlu2 %v480_v35  ;;  %v730_v62 = vmul.f32 %v5885_v52, %v711_v57 }
 0x17c   : > { %v449_v51 = vmul.f32 %v5764_v13, %v425_v50 }
 0x17d   : > { %v749_v0 = vadd.f32 %v5904_v1, %v730_v62 }
 0x17e   : > { %v5957_v48 = vsub.f32 %v5830_v49, %v449_v51  ;;  %v606_v49 = vsel %vm605_vm1, %v5142_v5, %v602_v53 }
 0x17f   : > { %v712_v36 = vmul.f32 %v606_v49, %v5800_v38  ;;  %v537_v38 = vadd.f32 1e-05, %v521_v25 }
 0x180   : > { %v481_v56 = vmul.f32 %v5957_v48, %v5957_v48 }
 0x181   : > { %v731_v59 = vmul.f32 %v5885_v52, %v712_v36  ;;  %5143 = vrsqrt.f32 %v537_v38  ;;  %vm613_vm3 = vweird.f32 %v537_v38 }
 0x182   : > { %511 = vadd.xlane.f32.xlu0 %v481_v56 }
 0x183   : > { %984 = vmatmul.bf16.gmra.mxu0 %v762_v39  ;;  %v750_v63 = vadd.f32 %v5904_v1, %v731_v59 }
 0x184   : > { %1033 = vmatmul.bf16.gmra.mxu1 %v762_v39  ;;  %1082 = vmatmul.bf16.gmra.mxu2 %v762_v39 }
 0x185   : > { %1131 = vmatmul.bf16.gmra.mxu3 %v762_v39  ;;  %v763_v2 = vpack.c.bf16 %v750_v63, %v749_v0  ;;  %v801_v0 = vld [vmem:[#allocation8] sm:$0xf] }
 0x187   : > { %v5144_v3 = vpop.eup %5143 }
 0x188   : > { %v608_v32 = vmul.f32 %v5144_v3, %v537_v38  ;;  %vm614_vm4 = vweird.f32 %v5144_v3  ;;  %v5994_v38 = vperm.slane %v801_v0, 0 }
 0x189   : > { %vm615_vm5 = vmor %vm613_vm3, %vm614_vm4 }
 0x18a   : > { %v609_v5 = vmul.f32 %v5144_v3, %v608_v32  ;;  %9643 = vst [vmem:[#allocation18_spill] sm:$0xff] %v5994_v38 }
 0x18c   : > { %v610_v11 = vmul.f32 0.5, %v609_v5 }
 0x18e   : > { %v611_v14 = vsub.f32 1.5, %v610_v11 }
 0x190   : > { %v612_v16 = vmul.f32 %v5144_v3, %v611_v14 }
 0x192   : > { %v616_v18 = vsel %vm615_vm5, %v5144_v3, %v612_v16  ;;  %v6011_v16 = vperm.slane %v801_v0, 2 }
 0x193   : > { %989 = vmatmul.bf16.gmra.mxu0 %v763_v2  ;;  %v713_v21 = vmul.f32 %v616_v18, %v5812_v44 }
 0x194   : > { %1038 = vmatmul.bf16.gmra.mxu1 %v763_v2  ;;  %1087 = vmatmul.bf16.gmra.mxu2 %v763_v2  ;;  %9645 = vst [vmem:[#allocation20_spill] sm:$0xff] %v6011_v16 }
 0x195   : > { %1136 = vmatmul.bf16.gmra.mxu3 %v763_v2  ;;  %v732_v31 = vmul.f32 %v5885_v52, %v713_v21 }
 0x197   : > { %v751_v44 = vadd.f32 %v5904_v1, %v732_v31 }
 0x1cd   : > { %v498_v4 = vpop.xlane.xlu1 %497 }
 0x1ce   : > { %v522_v6 = vmul.f32 %v498_v4, %v5764_v13 }
 0x1d0   : > { %v538_v28 = vadd.f32 1e-05, %v522_v6 }
 0x1d2   : > { %5145 = vrsqrt.f32 %v538_v28  ;;  %vm623_vm7 = vweird.f32 %v538_v28 }
 0x1d5   : > { %v500_v15 = vpop.xlane.xlu1 %499 }
 0x1d8   : > { %v5146_v46 = vpop.eup %5145 }
 0x1d9   : > { %v618_v60 = vmul.f32 %v5146_v46, %v538_v28  ;;  %vm624_vm6 = vweird.f32 %v5146_v46 }
 0x1da   : > { %vm625_vm8 = vmor %vm623_vm7, %vm624_vm6 }
 0x1db   : > { %v619_v58 = vmul.f32 %v5146_v46, %v618_v60 }
 0x1dd   : > { %v620_v47 = vmul.f32 0.5, %v619_v58  ;;  %v427_v19 = vpop.xlane.xlu1 %426 }
 0x1de   : > { %v450_v20 = vmul.f32 %v5764_v13, %v427_v19 }
 0x1df   : > { %v621_v12 = vsub.f32 1.5, %v620_v47 }
 0x1e0   : > { %v5979_v23 = vsub.f32 %v5890_v54, %v450_v20  ;;  %v502_v54 = vpop.xlane.xlu2 %501 }
 0x1e1   : > { %v622_v22 = vmul.f32 %v5146_v46, %v621_v12  ;;  %v524_v8 = vmul.f32 %v502_v54, %v5764_v13 }
 0x1e2   : > { %v482_v30 = vmul.f32 %v5979_v23, %v5979_v23 }
 0x1e3   : > { %v626_v26 = vsel %vm625_vm8, %v5146_v46, %v622_v22  ;;  %v540_v50 = vadd.f32 1e-05, %v524_v8 }
 0x1e4   : > { %v714_v27 = vmul.f32 %v626_v26, %v5840_v61  ;;  %513 = vadd.xlane.f32.xlu1 %v482_v30  ;;  %v523_v61 = vmul.f32 %v500_v15, %v5764_v13 }
 0x1e5   : > { %vm643_vm9 = vweird.f32 %v540_v50 }
 0x1e6   : > { %v733_v34 = vmul.f32 %v5885_v52, %v714_v27  ;;  %v539_v45 = vadd.f32 1e-05, %v523_v61  ;;  %v6034_v27 = vperm.slane %v801_v0, 3 }
 0x1e8   : > { %v752_v35 = vadd.f32 %v5904_v1, %v733_v34  ;;  %5147 = vrsqrt.f32 %v539_v45  ;;  %vm633_vm12 = vweird.f32 %v539_v45  ;;  %v504_v28 = vpop.xlane.xlu2 %503  ;;  %9646 = vst [vmem:[#allocation21_spill] sm:$0xff] %v6034_v27 }
 0x1e9   : > { %5149 = vrsqrt.f32 %v540_v50  ;;  %v525_v14 = vmul.f32 %v504_v28, %v5764_v13 }
 0x1ea   : > { %v764_v40 = vpack.c.bf16 %v752_v35, %v751_v44 }
 0x1eb   : > { %v6013_v47 = vadd.f32 1e-05, %v525_v14 }
 0x1ec   : > { %994 = vmatmul.bf16.gmra.mxu0 %v764_v40  ;;  %1043 = vmatmul.bf16.gmra.mxu1 %v764_v40 }
 0x1ed   : > { %1092 = vmatmul.bf16.gmra.mxu2 %v764_v40  ;;  %1141 = vmatmul.bf16.gmra.mxu3 %v764_v40  ;;  %5151 = vrsqrt.f32 %v6013_v47  ;;  %vm653_vm15 = vweird.f32 %v6013_v47 }
 0x1ee   : > { %v5148_v51 = vpop.eup %5147 }
 0x1ef   : > { %v5150_v33 = vpop.eup %5149  ;;  %v628_v42 = vmul.f32 %v5148_v51, %v539_v45  ;;  %vm634_vm11 = vweird.f32 %v5148_v51 }
 0x1f0   : > { %v638_v24 = vmul.f32 %v5150_v33, %v540_v50  ;;  %vm644_vm10 = vweird.f32 %v5150_v33  ;;  %vm635_vm14 = vmor %vm633_vm12, %vm634_vm11  ;;  %v980_v3 = vpop.f32.mrf.mxu0 }
 0x1f1   : > { %v629_v53 = vmul.f32 %v5148_v51, %v628_v42  ;;  %vm645_vm13 = vmor %vm643_vm9, %vm644_vm10  ;;  %v5999_v6 = vadd.f32 %v980_v3, %v5994_v38  ;;  %v1029_v11 = vpop.f32.mrf.mxu1 }
 0x1f2   : > { %v639_v55 = vmul.f32 %v5150_v33, %v638_v24 }
 0x1f3   : > { %v630_v56 = vmul.f32 0.5, %v629_v53  ;;  %v6005_v15 = vmul.f32 0.70710677, %v5999_v6  ;;  %v6039_v35 = vpop.eup %5151 }
 0x1f4   : > { %v640_v43 = vmul.f32 0.5, %v639_v55  ;;  %v648_v8 = vmul.f32 %v6039_v35, %v6013_v47  ;;  %vm654_vm0 = vweird.f32 %v6039_v35 }
 0x1f5   : > { %v631_v39 = vsub.f32 1.5, %v630_v56  ;;  %v1295_v18 = vmul.f32 %v6005_v15, %v6005_v15  ;;  %vm6091_vm3 = vmor %vm653_vm15, %vm654_vm0 }
 0x1f6   : > { %v641_v49 = vsub.f32 1.5, %v640_v43  ;;  %v649_v53 = vmul.f32 %v6039_v35, %v648_v8 }
 0x1f7   : > { %v632_v17 = vmul.f32 %v5148_v51, %v631_v39  ;;  %v1078_v58 = vpop.f32.mrf.mxu2  ;;  %v6026_v21 = vmin.f32 %v1295_v18, 16.0 }
 0x1f8   : > { %v642_v36 = vmul.f32 %v5150_v33, %v641_v49  ;;  %v6023_v20 = vadd.f32 %v1078_v58, %v6011_v16  ;;  %v1127_v31 = vpop.f32.mrf.mxu3  ;;  %v510_v49 = vpop.xlane.xlu2 %509 }
 0x1f9   : > { %v636_v57 = vsel %vm635_vm14, %v5148_v51, %v632_v17  ;;  %v1308_v30 = vmul.f32 3.8918573e-05, %v6026_v21  ;;  %v6046_v54 = vadd.f32 %v1127_v31, %v6034_v27  ;;  %v508_v51 = vpop.xlane.xlu1 %507  ;;  %v1297_v3 = vmul.f32 2.1237322e-06, %v6026_v21  ;;  %v1031_v31 = vpop.f32.mrf.mxu1 }
 0x1fa   : > { %v646_v59 = vsel %vm645_vm13, %v5150_v33, %v642_v36  ;;  %v715_v62 = vmul.f32 %v636_v57, %v5850_v9  ;;  %v6001_v9 = vperm.slane %v801_v0, 1  ;;  %v6032_v26 = vmul.f32 0.70710677, %v6023_v20  ;;  %v982_v57 = vpop.f32.mrf.mxu0 }
 0x1fb   : > { %v716_v63 = vmul.f32 %v646_v59, %v5880_v41  ;;  %v506_v41 = vpop.xlane.xlu0 %505  ;;  %v1309_v61 = vadd.f32 0.001143296, %v1308_v30  ;;  %v6056_v42 = vmul.f32 0.70710677, %v6046_v54  ;;  %v527_v55 = vmul.f32 %v508_v51, %v5764_v13 }
 0x1fc   : > { %v734_v2 = vmul.f32 %v5885_v52, %v715_v62  ;;  %9644 = vst [vmem:[#allocation19_spill] sm:$0xff] %v6001_v9  ;;  %v526_v46 = vmul.f32 %v506_v41, %v5764_v13  ;;  %v6009_v60 = vadd.f32 %v1029_v11, %v6001_v9  ;;  %v1375_v44 = vmul.f32 %v6032_v26, %v6032_v26 }
 0x1fd   : > { %v735_v25 = vmul.f32 %v5885_v52, %v716_v63  ;;  %v1310_v24 = vmul.f32 %v1309_v61, %v6026_v21  ;;  %v1415_v17 = vmul.f32 %v6056_v42, %v6056_v42  ;;  %v650_v59 = vmul.f32 0.5, %v649_v53 }
 0x1fe   : > { %v753_v32 = vadd.f32 %v5904_v1, %v734_v2  ;;  %v6017_v12 = vadd.f32 1e-05, %v526_v46  ;;  %v6020_v19 = vmul.f32 0.70710677, %v6009_v60  ;;  %v6053_v33 = vmin.f32 %v1375_v44, 16.0 }
 0x1ff   : > { %v754_v4 = vadd.f32 %v5904_v1, %v735_v25  ;;  %v1311_v36 = vadd.f32 0.014752088, %v1310_v24  ;;  %v6065_v62 = vadd.f32 1e-05, %v527_v55  ;;  %v528_v2 = vmul.f32 %v510_v49, %v5764_v13 }
 0x200   : > { %5153 = vrsqrt.f32 %v6017_v12  ;;  %v1335_v22 = vmul.f32 %v6020_v19, %v6020_v19  ;;  %v1388_v39 = vmul.f32 3.8918573e-05, %v6053_v33  ;;  %v651_v41 = vsub.f32 1.5, %v650_v59 }
 0x201   : > { %v765_v5 = vpack.c.bf16 %v754_v4, %v753_v32  ;;  %v6070_v32 = vmin.f32 %v1415_v17, 16.0  ;;  %v6073_v4 = vadd.f32 %v982_v57, %v5994_v38  ;;  %5155 = vrsqrt.f32 %v6065_v62 }
 0x202   : > { %v6037_v34 = vmin.f32 %v1335_v22, 16.0  ;;  %v1389_v25 = vadd.f32 0.001143296, %v1388_v39  ;;  %v6079_v46 = vadd.f32 1e-05, %v528_v2  ;;  %vm663_vm1 = vweird.f32 %v6017_v12 }
 0x203   : > { %999 = vmatmul.bf16.gmra.mxu0 %v765_v5  ;;  %1048 = vmatmul.bf16.gmra.mxu1 %v765_v5  ;;  %v1298_v18 = vadd.f32 0.00028619796, %v1297_v3  ;;  %v1428_v22 = vmul.f32 3.8918573e-05, %v6070_v32  ;;  %v6085_v30 = vmul.f32 0.70710677, %v6073_v4  ;;  %v652_v47 = vmul.f32 %v6039_v35, %v651_v41 }
 0x204   : > { %1097 = vmatmul.bf16.gmra.mxu2 %v765_v5  ;;  %1146 = vmatmul.bf16.gmra.mxu3 %v765_v5  ;;  %v1348_v45 = vmul.f32 3.8918573e-05, %v6037_v34  ;;  %v1312_v5 = vmul.f32 %v1311_v36, %v6026_v21  ;;  %v1337_v28 = vmul.f32 2.1237322e-06, %v6037_v34  ;;  %v1390_v58 = vmul.f32 %v1389_v25, %v6053_v33 }
 0x205   : > { %5157 = vrsqrt.f32 %v6079_v46  ;;  %v6097_v51 = vadd.f32 %v1031_v31, %v6001_v9  ;;  %v1299_v53 = vmul.f32 %v1298_v18, %v6026_v21  ;;  %v1429_v55 = vadd.f32 0.001143296, %v1428_v22  ;;  %v512_v22 = vpop.xlane.xlu0 %511 }
 0x206   : > { %v6043_v40 = vpop.eup %5153  ;;  %v1349_v56 = vadd.f32 0.001143296, %v1348_v45  ;;  %v1313_v44 = vadd.f32 0.112945676, %v1312_v5  ;;  %v1338_v61 = vadd.f32 0.00028619796, %v1337_v28  ;;  %v656_v17 = vsel %vm6091_vm3, %v6039_v35, %v652_v47 }
 0x207   : > { %v658_v50 = vmul.f32 %v6043_v40, %v6017_v12  ;;  %vm664_vm2 = vweird.f32 %v6043_v40  ;;  %v6099_v24 = vpop.eup %5155  ;;  %v1300_v2 = vadd.f32 0.0036580483, %v1299_v53  ;;  %v1430_v25 = vmul.f32 %v1429_v55, %v6070_v32 }
 0x208   : > { %v1350_v63 = vmul.f32 %v1349_v56, %v6037_v34  ;;  %v1455_v56 = vmul.f32 %v6085_v30, %v6085_v30  ;;  %vm6105_vm4 = vmor %vm663_vm1, %vm664_vm2  ;;  %v1314_v39 = vmul.f32 %v1313_v44, %v6026_v21  ;;  %v1339_v49 = vmul.f32 %v1338_v61, %v6037_v34 }
 0x209   : > { %v659_v43 = vmul.f32 %v6043_v40, %v658_v50  ;;  %v1391_v50 = vadd.f32 0.014752088, %v1390_v58  ;;  %v668_v57 = vmul.f32 %v6099_v24, %v6065_v62  ;;  %v717_v35 = vmul.f32 %v656_v17, %v5917_v10 }
 0x20a   : > { %v1351_v11 = vadd.f32 0.014752088, %v1350_v63  ;;  %v6118_v63 = vmul.f32 0.70710677, %v6097_v51  ;;  %v6124_v3 = vmin.f32 %v1455_v56, 16.0  ;;  %v1301_v10 = vmul.f32 %v1300_v2, %v6026_v21 }
 0x20b   : > { %v660_v0 = vmul.f32 0.5, %v659_v43  ;;  %v1392_v59 = vmul.f32 %v1391_v50, %v6053_v33  ;;  %v6126_v5 = vpop.eup %5157  ;;  %v1315_v28 = vadd.f32 0.4994258, %v1314_v39  ;;  %v1340_v41 = vadd.f32 0.0036580483, %v1339_v49 }
 0x20c   : > { %v1352_v8 = vmul.f32 %v1351_v11, %v6037_v34  ;;  %v1377_v11 = vmul.f32 2.1237322e-06, %v6053_v33  ;;  %v669_v18 = vmul.f32 %v6099_v24, %v668_v57  ;;  %v1495_v31 = vmul.f32 %v6118_v63, %v6118_v63 }
 0x20d   : > { %v661_v14 = vsub.f32 1.5, %v660_v0  ;;  %v678_v44 = vmul.f32 %v6126_v5, %v6079_v46  ;;  %v1431_v61 = vadd.f32 0.014752088, %v1430_v25  ;;  %v1468_v47 = vmul.f32 3.8918573e-05, %v6124_v3 }
 0x20e   : > { %v1353_v36 = vadd.f32 0.112945676, %v1352_v8  ;;  %v1316_v8 = vmul.f32 %v1315_v28, %v6026_v21  ;;  %v1341_v45 = vmul.f32 %v1340_v41, %v6037_v34  ;;  %v736_v50 = vmul.f32 %v5885_v52, %v717_v35 }
 0x20f   : > { %v662_v12 = vmul.f32 %v6043_v40, %v661_v14  ;;  %vm673_vm5 = vweird.f32 %v6065_v62  ;;  %v1417_v53 = vmul.f32 2.1237322e-06, %v6070_v32  ;;  %v529_v55 = vmul.f32 %v512_v22, %v5764_v13 }
 0x210   : > { %v1354_v14 = vmul.f32 %v1353_v36, %v6037_v34  ;;  %v670_v56 = vmul.f32 0.5, %v669_v18  ;;  %v6146_v39 = vmin.f32 %v1495_v31, 16.0  ;;  %v679_v17 = vmul.f32 %v6126_v5, %v678_v44 }
 0x211   : > { %v666_v0 = vsel %vm6105_vm4, %v6043_v40, %v662_v12  ;;  %v1393_v40 = vadd.f32 0.112945676, %v1392_v59  ;;  %v1302_v36 = vadd.f32 0.05243302, %v1301_v10  ;;  %v1432_v57 = vmul.f32 %v1431_v61, %v6070_v32 }
 0x212   : > { %v718_v58 = vmul.f32 %v666_v0, %v5873_v37  ;;  %v1378_v37 = vadd.f32 0.00028619796, %v1377_v11  ;;  %v1355_v12 = vadd.f32 0.4994258, %v1354_v14  ;;  %v1469_v59 = vadd.f32 0.001143296, %v1468_v47 }
 0x213   : > { %v1394_v43 = vmul.f32 %v1393_v40, %v6053_v33  ;;  %v6151_v0 = vadd.f32 1.0, %v1316_v8  ;;  %v1342_v2 = vadd.f32 0.05243302, %v1341_v45  ;;  %v755_v35 = vadd.f32 %v5904_v1, %v736_v50 }
 0x214   : > { %v737_v49 = vmul.f32 %v5885_v52, %v718_v58  ;;  %v1379_v25 = vmul.f32 %v1378_v37, %v6053_v33  ;;  %vm674_vm6 = vweird.f32 %v6099_v24  ;;  %v1356_v28 = vmul.f32 %v1355_v12, %v6037_v34 }
 0x215   : > { %v1418_v41 = vadd.f32 0.00028619796, %v1417_v53  ;;  %v6157_v11 = vadd.f32 1e-05, %v529_v55  ;;  %v671_v14 = vsub.f32 1.5, %v670_v56  ;;  %v680_v22 = vmul.f32 0.5, %v679_v17  ;;  %v1080_v55 = vpop.f32.mrf.mxu2  ;;  %vm6174_vm7 = vmor %vm673_vm5, %vm674_vm6 }
 0x216   : > { %v1395_v58 = vadd.f32 0.4994258, %v1394_v43  ;;  %v1508_v18 = vmul.f32 3.8918573e-05, %v6146_v39  ;;  %v756_v40 = vadd.f32 %v5904_v1, %v737_v49  ;;  %v1303_v31 = vmul.f32 %v1302_v36, %v6026_v21 }
 0x217   : > { %v1433_v44 = vadd.f32 0.112945676, %v1432_v57  ;;  %v1470_v10 = vmul.f32 %v1469_v59, %v6124_v3  ;;  %5159 = vrcp.f32 %v6151_v0  ;;  %v1343_v61 = vmul.f32 %v1342_v2, %v6037_v34 }
 0x218   : > { %v1380_v47 = vadd.f32 0.0036580483, %v1379_v25  ;;  %v766_v8 = vpack.c.bf16 %v756_v40, %v755_v35  ;;  %v6165_v45 = vadd.f32 1.0, %v1356_v28  ;;  %v1419_v37 = vmul.f32 %v1418_v41, %v6070_v32 }
 0x219   : > { %v672_v50 = vmul.f32 %v6099_v24, %v671_v14  ;;  %v1396_v12 = vmul.f32 %v1395_v58, %v6053_v33  ;;  %v1509_v53 = vadd.f32 0.001143296, %v1508_v18  ;;  %v681_v43 = vsub.f32 1.5, %v680_v22  ;;  %v1129_v22 = vpop.f32.mrf.mxu3 }
 0x21a   : > { %1004 = vmatmul.bf16.gmra.mxu0 %v766_v8  ;;  %1053 = vmatmul.bf16.gmra.mxu1 %v766_v8  ;;  %v1304_v49 = vadd.f32 0.18741608, %v1303_v31  ;;  %v1434_v17 = vmul.f32 %v1433_v44, %v6070_v32  ;;  %v1471_v36 = vadd.f32 0.014752088, %v1470_v10  ;;  %vm683_vm8 = vweird.f32 %v6079_v46 }
 0x21b   : > { %1102 = vmatmul.bf16.gmra.mxu2 %v766_v8  ;;  %1151 = vmatmul.bf16.gmra.mxu3 %v766_v8  ;;  %v1344_v57 = vadd.f32 0.18741608, %v1343_v61  ;;  %v1381_v59 = vmul.f32 %v1380_v47, %v6053_v33  ;;  %5161 = vrsqrt.f32 %v6157_v11  ;;  %vm684_vm9 = vweird.f32 %v6126_v5 }
 0x21c   : > { %5163 = vrcp.f32 %v6165_v45  ;;  %v1420_v62 = vadd.f32 0.0036580483, %v1419_v37  ;;  %v6185_v2 = vadd.f32 %v1080_v55, %v6011_v16  ;;  %v676_v35 = vsel %vm6174_vm7, %v6099_v24, %v672_v50  ;;  %vm6200_vm10 = vmor %vm683_vm8, %vm684_vm9 }
 0x21d   : > { %v6187_v25 = vpop.eup %5159  ;;  %v6192_v28 = vadd.f32 1.0, %v1396_v12  ;;  %v1510_v41 = vmul.f32 %v1509_v53, %v6146_v39  ;;  %v682_v14 = vmul.f32 %v6126_v5, %v681_v43  ;;  %v1305_v58 = vmul.f32 %v1304_v49, %v6026_v21 }
 0x21e   : > { %v1435_v18 = vadd.f32 0.4994258, %v1434_v17  ;;  %v1472_v40 = vmul.f32 %v1471_v36, %v6124_v3  ;;  %v6205_v31 = vmul.f32 0.5, %v5999_v6  ;;  %v1345_v24 = vmul.f32 %v1344_v57, %v6037_v34 }
 0x21f   : > { %v1382_v44 = vadd.f32 0.05243302, %v1381_v59  ;;  %v1319_v10 = vmul.f32 %v6187_v25, %v6151_v0  ;;  %v6211_v21 = vmul.f32 0.5, %v6009_v60  ;;  %v1421_v61 = vmul.f32 %v1420_v62, %v6070_v32 }
 0x220   : > { %v6215_v46 = vmul.f32 0.70710677, %v6185_v2  ;;  %v6220_v8 = vmul.f32 %v676_v35, %v5911_v7  ;;  %v6223_v6 = vmul.f32 0.5, %v6023_v20  ;;  %5165 = vrcp.f32 %v6192_v28 }
 0x221   : > { %v6217_v47 = vpop.eup %5161  ;;  %v1511_v34 = vadd.f32 0.014752088, %v1510_v41  ;;  %v686_v60 = vsel %vm6200_vm10, %v6126_v5, %v682_v14  ;;  %v1306_v50 = vadd.f32 1.1283791, %v1305_v58  ;;  %v1436_v12 = vmul.f32 %v1435_v18, %v6070_v32 }
 0x222   : > { %9655 = vst [vmem:[#allocation22_spill] sm:$0xff] %v6215_v46  ;;  %v6226_v37 = vpop.eup %5163  ;;  %v1473_v53 = vadd.f32 0.112945676, %v1472_v40  ;;  %v1329_v55 = vand.u32 2147483648, %v6151_v0  ;;  %v1346_v7 = vadd.f32 1.1283791, %v1345_v24  ;;  %v1383_v56 = vmul.f32 %v1382_v44, %v6053_v33 }
 0x223   : > { %v6235_v20 = vmul.f32 0.5, %v6046_v54  ;;  %v1320_v43 = vsub.f32 1.0, %v1319_v10  ;;  %v1422_v49 = vadd.f32 0.05243302, %v1421_v61  ;;  %v1457_v17 = vmul.f32 2.1237322e-06, %v6124_v3 }
 0x224   : > { %v1535_v36 = vmul.f32 %v6215_v46, %v6215_v46  ;;  %v6241_v5 = vmul.f32 %v686_v60, %v5947_v29  ;;  %v1359_v57 = vmul.f32 %v6226_v37, %v6165_v45  ;;  %v688_v59 = vmul.f32 %v6217_v47, %v6157_v11 }
 0x225   : > { %9656 = vst [vmem:[#allocation23_spill] sm:$0xff] %v6235_v20  ;;  %v1512_v62 = vmul.f32 %v1511_v34, %v6146_v39  ;;  %v6249_v54 = vmul.f32 %v1306_v50, %v6005_v15  ;;  %v1327_v35 = vand.u32 2147483647, %v6151_v0  ;;  %v6252_v41 = vadd.f32 1.0, %v1436_v12 }
 0x226   : > { %v1474_v14 = vmul.f32 %v1473_v53, %v6124_v3  ;;  %v6255_v58 = vpop.eup %5165  ;;  %vm1323_vm11 = vweird.f32 %v6151_v0  ;;  %v1330_v29 = vor.u32 1.1754944e-38, %v1329_v55  ;;  %v6259_v18 = vmul.f32 %v1346_v7, %v6020_v19 }
 0x227   : > { %v1384_v40 = vadd.f32 0.18741608, %v1383_v56  ;;  %v1321_v24 = vmul.f32 %v6187_v25, %v1320_v43  ;;  %v1423_v15 = vmul.f32 %v1422_v49, %v6070_v32  ;;  %v1458_v44 = vadd.f32 0.00028619796, %v1457_v17 }
 0x228   : > { %v6263_v10 = vmin.f32 %v1535_v36, 16.0  ;;  %v1360_v61 = vsub.f32 1.0, %v1359_v57  ;;  %v1369_v34 = vand.u32 2147483648, %v6165_v45  ;;  %v689_v60 = vmul.f32 %v6217_v47, %v688_v59 }
 0x229   : > { %v1513_v50 = vadd.f32 0.112945676, %v1512_v62  ;;  %vm6267_vm12 = vcmp.eq.f32.partialorder %v1327_v35, 8.507059e+37  ;;  %v1399_v19 = vmul.f32 %v6255_v58, %v6192_v28  ;;  %5167 = vrcp.f32 %v6252_v41 }
 0x22a   : > { %v1475_v53 = vadd.f32 0.4994258, %v1474_v14  ;;  %v6275_v55 = vadd.f32 %v1129_v22, %v6034_v27  ;;  %vm1324_vm13 = vweird.f32 %v6187_v25  ;;  %vm1363_vm14 = vweird.f32 %v6165_v45 }
 0x22b   : > { %v1367_v7 = vand.u32 2147483647, %v6165_v45  ;;  %v1385_v56 = vmul.f32 %v1384_v40, %v6053_v33  ;;  %v1497_v43 = vmul.f32 2.1237322e-06, %v6146_v39  ;;  %v1322_v49 = vadd.f32 %v6187_v25, %v1321_v24  ;;  %vm6298_vm1 = vmor %vm1323_vm11, %vm1324_vm13 }
 0x22c   : > { %9659 = vst [vmem:[#allocation24_spill] sm:$0xff] %v6275_v55  ;;  %v1424_v17 = vadd.f32 0.18741608, %v1423_v15  ;;  %vm693_vm15 = vweird.f32 %v6157_v11  ;;  %vm694_vm0 = vweird.f32 %v6217_v47  ;;  %v1459_v36 = vmul.f32 %v1458_v44, %v6124_v3  ;;  %v5011_v15 = vld [vmem:[#allocation10 + $0x38] sm:$0xff]  ;;  %v5010_v44 = vld [vmem:[#allocation10 + $0x30] sm:$0xff] }
 0x22d   : > { %v1548_v57 = vmul.f32 3.8918573e-05, %v6263_v10  ;;  %v1361_v59 = vmul.f32 %v6226_v37, %v1360_v61  ;;  %v1409_v62 = vand.u32 2147483648, %v6192_v28  ;;  %v690_v35 = vmul.f32 0.5, %v689_v60  ;;  %vm6370_vm8 = vmor %vm693_vm15, %vm694_vm0  ;;  %v5035_v11 = vld [vmem:[#allocation10 + $0xf8] sm:$0xff]  ;;  %4275 = vmatpush.bf16.msrb.mxu0 %v5011_v15  ;;  %v5033_v15 = vld [vmem:[#allocation10 + $0xe8] sm:$0xff] }
 0x22e   : > { %v1514_v33 = vmul.f32 %v1513_v50, %v6146_v39  ;;  %v1370_v14 = vor.u32 1.1754944e-38, %v1369_v34  ;;  %v1400_v40 = vsub.f32 1.0, %v1399_v19  ;;  %v1476_v22 = vmul.f32 %v1475_v53, %v6124_v3  ;;  %4422 = vmatpush.bf16.msrb.mxu3 %v5035_v11 }
 0x22f   : > { %v6292_v24 = vmul.f32 0.70710677, %v6275_v55  ;;  %vm1364_vm2 = vweird.f32 %v6226_v37  ;;  %vm6303_vm3 = vcmp.eq.f32.partialorder %v1367_v7, 8.507059e+37  ;;  %v1386_v61 = vadd.f32 1.1283791, %v1385_v56  ;;  %v6308_v50 = vpop.eup %5167 }
 0x230   : > { %v1407_v34 = vand.u32 2147483647, %v6192_v28  ;;  %v1498_v60 = vadd.f32 0.00028619796, %v1497_v43  ;;  %v1326_v0 = vsel %vm6298_vm1, %v6187_v25, %v1322_v49  ;;  %v1425_v19 = vmul.f32 %v1424_v17, %v6070_v32  ;;  %vm6336_vm6 = vmor %vm1363_vm14, %vm1364_vm2 }
 0x231   : > { %v1460_v53 = vadd.f32 0.0036580483, %v1459_v36  ;;  %v1549_v46 = vadd.f32 0.001143296, %v1548_v57  ;;  %v1362_v20 = vadd.f32 %v6226_v37, %v1361_v59  ;;  %vm1403_vm4 = vweird.f32 %v6192_v28  ;;  %4276 = vmatpush.bf16.msrb.mxu0 %v5010_v44 }
 0x232   : > { %v6316_v7 = vor.u32 1.1754944e-38, %v1409_v62  ;;  %v691_v56 = vsub.f32 1.5, %v690_v35  ;;  %v1515_v55 = vadd.f32 0.4994258, %v1514_v33  ;;  %v1401_v43 = vmul.f32 %v6255_v58, %v1400_v40  ;;  %v985_v33 = vpop.f32.mrf.mxu0 }
 0x233   : > { %v6320_v27 = vmul.f32 0.5, %v6073_v4  ;;  %v6322_v16 = vadd.f32 1.0, %v1476_v22  ;;  %v1575_v32 = vmul.f32 %v6292_v24, %v6292_v24  ;;  %v1331_v25 = vsel %vm6267_vm12, %v1330_v29, %v1326_v0 }
 0x234   : > { %vm1404_vm5 = vweird.f32 %v6255_v58  ;;  %v1439_v49 = vmul.f32 %v6308_v50, %v6252_v41  ;;  %v1499_v17 = vmul.f32 %v1498_v60, %v6146_v39  ;;  %v6340_v36 = vadd.f32 1.1283791, %v1425_v19 }
 0x235   : > { %v1461_v12 = vmul.f32 %v1460_v53, %v6124_v3  ;;  %v1550_v29 = vmul.f32 %v1549_v46, %v6263_v10  ;;  %v738_v57 = vmul.f32 %v5885_v52, %v6220_v8  ;;  %v1366_v59 = vsel %vm6336_vm6, %v6226_v37, %v1362_v20  ;;  %v5019_v53 = vld [vmem:[#allocation10 + $0x78] sm:$0xff]  ;;  %vm6392_vm9 = vmor %vm1403_vm4, %vm1404_vm5 }
 0x236   : > { %vm6349_vm7 = vcmp.eq.f32.partialorder %v1407_v34, 8.507059e+37  ;;  %v6354_v45 = vmul.f32 %v6217_v47, %v691_v56  ;;  %v1516_v35 = vmul.f32 %v1515_v55, %v6146_v39  ;;  %v739_v46 = vmul.f32 %v5885_v52, %v6241_v5  ;;  %4324 = vmatpush.bf16.msrb.mxu1 %v5019_v53 }
 0x237   : > { %v6360_v40 = vmul.f32 %v1331_v25, %v6249_v54  ;;  %v1402_v8 = vadd.f32 %v6255_v58, %v1401_v43  ;;  %5169 = vrcp.f32 %v6322_v16  ;;  %v6364_v37 = vmin.f32 %v1575_v32, 16.0  ;;  %v5027_v54 = vld [vmem:[#allocation10 + $0xb8] sm:$0xff]  ;;  %v5026_v25 = vld [vmem:[#allocation10 + $0xb0] sm:$0xff] }
 0x238   : > { %v1440_v20 = vsub.f32 1.0, %v1439_v49  ;;  %v1500_v22 = vadd.f32 0.0036580483, %v1499_v17  ;;  %v757_v52 = vadd.f32 %v5904_v1, %v738_v57  ;;  %v758_v5 = vadd.f32 %v5904_v1, %v739_v46  ;;  %4373 = vmatpush.bf16.msrb.mxu2 %v5027_v54  ;;  %v5009_v54 = vld [vmem:[#allocation10 + $0x28] sm:$0xff] }
 0x239   : > { %v1371_v34 = vsel %vm6303_vm3, %v1370_v14, %v1366_v59  ;;  %v1462_v60 = vadd.f32 0.05243302, %v1461_v12  ;;  %v1551_v0 = vadd.f32 0.014752088, %v1550_v29  ;;  %v6379_v19 = vadd.f32 %v985_v33, %v5994_v38  ;;  %v5018_v12 = vld [vmem:[#allocation10 + $0x70] sm:$0xff]  ;;  %4277 = vmatpush.bf16.msrb.mxu0 %v5009_v54 }
 0x23a   : > { %v6382_v56 = vmul.f32 0.5, %v6097_v51  ;;  %v6384_v43 = vadd.f32 1.0, %v1516_v35  ;;  %v1537_v32 = vmul.f32 2.1237322e-06, %v6263_v10  ;;  %v767_v1 = vpack.c.bf16 %v758_v5, %v757_v52  ;;  %4325 = vmatpush.bf16.msrb.mxu1 %v5018_v12  ;;  %v5025_v5 = vld [vmem:[#allocation10 + $0xa8] sm:$0xff]  ;;  %v1034_v12 = vpop.f32.mrf.mxu1 }
 0x23b   : > { %v1387_v14 = vmul.f32 %v1386_v61, %v6032_v26  ;;  %v696_v51 = vsel %vm6370_vm8, %v6217_v47, %v6354_v45  ;;  %v1577_v17 = vmul.f32 2.1237322e-06, %v6364_v37  ;;  %v1588_v4 = vmul.f32 3.8918573e-05, %v6364_v37  ;;  %v5034_v61 = vld [vmem:[#allocation10 + $0xf0] sm:$0xff] }
 0x23c   : > { %v4770_v28 = vclamps-f32 %v6360_v40, 1.0  ;;  %v1372_v29 = vmul.f32 %v1371_v34, %v6259_v18  ;;  %v1406_v57 = vsel %vm6392_vm9, %v6255_v58, %v1402_v8  ;;  %v1441_v59 = vmul.f32 %v6308_v50, %v1440_v20  ;;  %1009 = vmatmul.bf16.gmra.mxu0 %v767_v1  ;;  %1058 = vmatmul.bf16.gmra.mxu1 %v767_v1 }
 0x23d   : > { %v6408_v47 = vpop.eup %5169  ;;  %vm1443_vm10 = vweird.f32 %v6252_v41  ;;  %v1501_v45 = vmul.f32 %v1500_v22, %v6146_v39  ;;  %v1552_v35 = vmul.f32 %v1551_v0, %v6263_v10  ;;  %v6414_v33 = vmul.f32 0.70710677, %v6379_v19  ;;  %1107 = vmatmul.bf16.gmra.mxu2 %v767_v1  ;;  %1156 = vmatmul.bf16.gmra.mxu3 %v767_v1  ;;  %v5017_v0 = vld [vmem:[#allocation10 + $0x68] sm:$0xff] }
 0x23e   : > { %v1447_v18 = vand.u32 2147483647, %v6252_v41  ;;  %5171 = vrcp.f32 %v6384_v43  ;;  %v1538_v58 = vadd.f32 0.00028619796, %v1537_v32  ;;  %4374 = vmatpush.bf16.msrb.mxu2 %v5026_v25  ;;  %v1411_v40 = vsel %vm6349_vm7, %v6316_v7, %v1406_v57  ;;  %4423 = vmatpush.bf16.msrb.mxu3 %v5034_v61 }
 0x23f   : > { %v1463_v8 = vmul.f32 %v1462_v60, %v6124_v3  ;;  %v1578_v20 = vadd.f32 0.00028619796, %v1577_v17  ;;  %v1589_v55 = vadd.f32 0.001143296, %v1588_v4  ;;  %v1442_v22 = vadd.f32 %v6308_v50, %v1441_v59  ;;  %4326 = vmatpush.bf16.msrb.mxu1 %v5017_v0 }
 0x240   : > { %vm1444_vm11 = vweird.f32 %v6308_v50  ;;  %v1479_v52 = vmul.f32 %v6408_v47, %v6322_v16  ;;  %v1449_v7 = vand.u32 2147483648, %v6252_v41  ;;  %v1502_v62 = vadd.f32 0.05243302, %v1501_v45 }
 0x241   : > { %v1553_v34 = vadd.f32 0.112945676, %v1552_v35  ;;  %v1615_v60 = vmul.f32 %v6414_v33, %v6414_v33  ;;  %v4771_v11 = vclamps-f32 %v1372_v29, 1.0  ;;  %v1412_v53 = vmul.f32 %v1411_v40, %v1387_v14  ;;  %vm6440_vm12 = vmor %vm1443_vm10, %vm1444_vm11 }
 0x242   : > { %v1539_v32 = vmul.f32 %v1538_v58, %v6263_v10  ;;  %4375 = vmatpush.bf16.msrb.mxu2 %v5025_v5  ;;  %v1427_v1 = vmul.f32 %v6340_v36, %v6056_v42  ;;  %v6445_v44 = vmul.f32 %v696_v51, %v5957_v48  ;;  %v1464_v14 = vadd.f32 0.18741608, %v1463_v8  ;;  %4424 = vmatpush.bf16.msrb.mxu3 %v5033_v15 }
 0x243   : > { %v1590_v49 = vmul.f32 %v1589_v55, %v6364_v37  ;;  %v3855_v4 = vadd.f32 1.0, %v4770_v28  ;;  %v1446_v42 = vsel %vm6440_vm12, %v6308_v50, %v1442_v22  ;;  %v1480_v41 = vsub.f32 1.0, %v1479_v52 }
 0x244   : > { %v6448_v17 = vpop.eup %5171  ;;  %v1579_v36 = vmul.f32 %v1578_v20, %v6364_v37  ;;  %v1503_v61 = vmul.f32 %v1502_v62, %v6146_v39  ;;  %v1554_v48 = vmul.f32 %v1553_v34, %v6263_v10  ;;  %v6456_v51 = vmin.f32 %v1615_v60, 16.0 }
 0x245   : > { %v3856_v29 = vadd.f32 1.0, %v4771_v11  ;;  %v4772_v57 = vclamps-f32 %v1412_v53, 1.0  ;;  %vm1448_vm13 = vcmp.eq.f32.partialorder %v1447_v18, 8.507059e+37  ;;  %v1540_v59 = vadd.f32 0.0036580483, %v1539_v32 }
 0x246   : > { %v1465_v45 = vmul.f32 %v1464_v14, %v6124_v3  ;;  %v1519_v50 = vmul.f32 %v6448_v17, %v6384_v43  ;;  %v1591_v35 = vadd.f32 0.014752088, %v1590_v49  ;;  %v1481_v40 = vmul.f32 %v6408_v47, %v1480_v41 }
 0x247   : > { %v1580_v8 = vadd.f32 0.0036580483, %v1579_v36  ;;  %v6468_v20 = vadd.f32 %v1034_v12, %v6001_v9  ;;  %v1504_v18 = vadd.f32 0.18741608, %v1503_v61  ;;  %v1555_v55 = vadd.f32 0.4994258, %v1554_v48 }
 0x248   : > { %v1617_v22 = vmul.f32 2.1237322e-06, %v6456_v51  ;;  %v6474_v52 = vmul.f32 %v3856_v29, %v6211_v21  ;;  %v3857_v5 = vadd.f32 1.0, %v4772_v57  ;;  %v1466_v15 = vadd.f32 1.1283791, %v1465_v45 }
 0x249   : > { %v1592_v62 = vmul.f32 %v1591_v35, %v6364_v37  ;;  %v1482_v60 = vadd.f32 %v6408_v47, %v1481_v40  ;;  %vm1484_vm14 = vweird.f32 %v6408_v47  ;;  %v1581_v0 = vmul.f32 %v1580_v8, %v6364_v37  ;;  %v5016_v35 = vld [vmem:[#allocation10 + $0x60] sm:$0xff] }
 0x24a   : > { %9675 = vst [vmem:[#allocation26_spill] sm:$0xff] %v6474_v52  ;;  %v6485_v21 = vmul.f32 0.70710677, %v6468_v20  ;;  %v1505_v11 = vmul.f32 %v1504_v18, %v6146_v39  ;;  %v1556_v53 = vmul.f32 %v1555_v55, %v6263_v10  ;;  %v1618_v32 = vadd.f32 0.00028619796, %v1617_v22  ;;  %v5024_v40 = vld [vmem:[#allocation10 + $0xa0] sm:$0xff]  ;;  %v987_v22 = vpop.f32.mrf.mxu0  ;;  %4327 = vmatpush.bf16.msrb.mxu1 %v5016_v35 }
 0x24b   : > { %vm1483_vm15 = vweird.f32 %v6322_v16  ;;  %v1487_v25 = vand.u32 2147483647, %v6322_v16  ;;  %v1489_v14 = vand.u32 2147483648, %v6322_v16  ;;  %v1593_v41 = vadd.f32 0.112945676, %v1592_v62  ;;  %4376 = vmatpush.bf16.msrb.mxu2 %v5024_v40  ;;  %v9686_v35 = vld [vmem:[#allocation24_spill] sm:$0xff] }
 0x24c   : > { %vm6492_vm0 = vmor %vm1483_vm15, %vm1484_vm14  ;;  %v1467_v39 = vmul.f32 %v1466_v15, %v6085_v30  ;;  %v1582_v61 = vadd.f32 0.05243302, %v1581_v0  ;;  %v1655_v16 = vmul.f32 %v6485_v21, %v6485_v21  ;;  %v6504_v48 = vadd.f32 1.0, %v1556_v53 }
 0x24d   : > { %v1619_v12 = vmul.f32 %v1618_v32, %v6456_v51  ;;  %vm1488_vm3 = vcmp.eq.f32.partialorder %v1487_v25, 8.507059e+37  ;;  %v1490_v57 = vor.u32 1.1754944e-38, %v1489_v14  ;;  %vm1524_vm5 = vweird.f32 %v6448_v17  ;;  %v1132_v25 = vpop.f32.mrf.mxu3  ;;  %v5291_v14 = vld [vmem:[#allocation5] ss:$0 sm:$0xff] }
 0x24e   : > { %v1594_v45 = vmul.f32 %v1593_v41, %v6364_v37  ;;  %vm1523_vm6 = vweird.f32 %v6384_v43  ;;  %v1529_v18 = vand.u32 2147483648, %v6384_v43  ;;  %v6522_v55 = vmin.f32 %v1655_v16, 16.0 }
 0x24f   : > { %v1583_v15 = vmul.f32 %v1582_v61, %v6364_v37  ;;  %vm6532_vm7 = vmor %vm1523_vm6, %vm1524_vm5  ;;  %v6544_v53 = vadd.f32 %v987_v22, %v5994_v38  ;;  %v6568_v40 = vmul.f32 0.5, %v9686_v35  ;;  %v5031_v22 = vld [vmem:[#allocation10 + $0xd8] sm:$0xff]  ;;  %vm1563_vm9 = vweird.f32 %v6504_v48 }
 0x250   : > { %9680 = vst [vmem:[#allocation27_spill] sm:$0xff] %v6522_v55 }
 0x257   : > { %v514_v26 = vpop.xlane.xlu1 %513 }
 0x258   : > { %v530_v46 = vmul.f32 %v514_v26, %v5764_v13  ;;  %v1450_v26 = vor.u32 1.1754944e-38, %v1449_v7  ;;  %v1520_v7 = vsub.f32 1.0, %v1519_v50 }
 0x25a   : > { %v6427_v13 = vadd.f32 1e-05, %v530_v46  ;;  %v1451_v28 = vsel %vm1448_vm13, %v1450_v26, %v1446_v42  ;;  %v6464_v46 = vmul.f32 %v3855_v4, %v6205_v31  ;;  %v1541_v31 = vmul.f32 %v1540_v59, %v6263_v10 }
 0x25b   : > { %v6476_v54 = vmul.f32 %v1451_v28, %v1427_v1  ;;  %v1521_v42 = vmul.f32 %v6448_v17, %v1520_v7  ;;  %v1486_v26 = vsel %vm6492_vm0, %v6408_v47, %v1482_v60  ;;  %v1506_v59 = vadd.f32 1.1283791, %v1505_v11  ;;  %v1083_v60 = vpop.f32.mrf.mxu2 }
 0x25c   : > { %5173 = vrsqrt.f32 %v6427_v13  ;;  %9674 = vst [vmem:[#allocation25_spill] sm:$0xff] %v6464_v46  ;;  %v1542_v49 = vadd.f32 0.05243302, %v1541_v31  ;;  %vm703_vm2 = vweird.f32 %v6427_v13  ;;  %v1491_v8 = vsel %vm1488_vm3, %v1490_v57, %v1486_v26 }
 0x25d   : > { %v1522_v47 = vadd.f32 %v6448_v17, %v1521_v42  ;;  %v1527_v31 = vand.u32 2147483647, %v6384_v43  ;;  %5175 = vrcp.f32 %v6504_v48  ;;  %v1620_v7 = vadd.f32 0.0036580483, %v1619_v12  ;;  %v9685_v12 = vld [vmem:[#allocation21_spill] sm:$0xff] }
 0x25e   : > { %v1543_v30 = vmul.f32 %v1542_v49, %v6263_v10  ;;  %v1492_v11 = vmul.f32 %v1491_v8, %v1467_v39  ;;  %v4773_v32 = vclamps-f32 %v6476_v54, 1.0  ;;  %v1507_v49 = vmul.f32 %v1506_v59, %v6118_v63  ;;  %v1036_v59 = vpop.f32.mrf.mxu1 }
 0x25f   : > { %vm1528_vm8 = vcmp.eq.f32.partialorder %v1527_v31, 8.507059e+37  ;;  %v1584_v4 = vadd.f32 0.18741608, %v1583_v15  ;;  %v1621_v42 = vmul.f32 %v1620_v7, %v6456_v51  ;;  %v6562_v63 = vmul.f32 0.70710677, %v6544_v53 }
 0x260   : > { %v1544_v43 = vadd.f32 0.18741608, %v1543_v30  ;;  %v4774_v61 = vclamps-f32 %v1492_v11, 1.0 }
 0x261   : > { %v1585_v8 = vmul.f32 %v1584_v4, %v6364_v37 }
 0x262   : > { %v6461_v58 = vpop.eup %5173  ;;  %v1545_v41 = vmul.f32 %v1544_v43, %v6263_v10  ;;  %v5292_v10 = vld [vmem:[%s9536_s2] ss:$0 sm:$0xff]  ;;  %v3859_v62 = vadd.f32 1.0, %v4774_v61 }
 0x263   : > { %v698_v3 = vmul.f32 %v6461_v58, %v6427_v13  ;;  %vm704_vm1 = vweird.f32 %v6461_v58  ;;  %v5008_v13 = vld [vmem:[#allocation10 + $0x20] sm:$0xff]  ;;  %v6555_v26 = vpop.eup %5175 }
 0x264   : > { %vm6510_vm4 = vmor %vm703_vm2, %vm704_vm1  ;;  %4278 = vmatpush.bf16.msrb.mxu0 %v5008_v13  ;;  %v1559_v31 = vmul.f32 %v6555_v26, %v6504_v48  ;;  %vm1564_vm10 = vweird.f32 %v6555_v26 }
 0x265   : > { %v699_v34 = vmul.f32 %v6461_v58, %v698_v3  ;;  %v5032_v3 = vld [vmem:[#allocation10 + $0xe0] sm:$0xff]  ;;  %vm6682_vm12 = vmor %vm1563_vm9, %vm1564_vm10 }
 0x266   : > { %4425 = vmatpush.bf16.msrb.mxu3 %v5032_v3  ;;  %v1546_v3 = vadd.f32 1.1283791, %v1545_v41  ;;  %v1134_v41 = vpop.f32.mrf.mxu3 }
 0x267   : > { %v700_v1 = vmul.f32 0.5, %v699_v34  ;;  %v6537_v34 = vmul.f32 0.5, %v6185_v2  ;;  %v1657_v2 = vmul.f32 2.1237322e-06, %v6522_v55 }
 0x269   : > { %v701_v36 = vsub.f32 1.5, %v700_v1  ;;  %v1530_v1 = vor.u32 1.1754944e-38, %v1529_v18  ;;  %v1658_v57 = vadd.f32 0.00028619796, %v1657_v2  ;;  %v1622_v18 = vadd.f32 0.05243302, %v1621_v42 }
 0x26a   : > { %4426 = vmatpush.bf16.msrb.mxu3 %v5031_v22  ;;  %v1560_v42 = vsub.f32 1.0, %v1559_v31 }
 0x26b   : > { %v702_v29 = vmul.f32 %v6461_v58, %v701_v36  ;;  %v9684_v36 = vld [vmem:[#allocation20_spill] sm:$0xff] }
 0x26c   : > { %v6553_v39 = vadd.f32 %v1083_v60, %v9684_v36 }
 0x26d   : > { %v706_v50 = vsel %vm6510_vm4, %v6461_v58, %v702_v29  ;;  %v6528_v58 = vmul.f32 %v3857_v5, %v6223_v6  ;;  %v1526_v6 = vsel %vm6532_vm7, %v6448_v17, %v1522_v47  ;;  %v1595_v5 = vadd.f32 0.4994258, %v1594_v45  ;;  %v5007_v47 = vld [vmem:[#allocation10 + $0x18] sm:$0xff] }
 0x26e   : > { %v722_v0 = vmul.f32 %v706_v50, %v5979_v23  ;;  %v740_v23 = vmul.f32 %v5291_v14, %v6445_v44  ;;  %v1531_v17 = vsel %vm1528_vm8, %v1530_v1, %v1526_v6  ;;  %v6559_v44 = vadd.f32 %v1132_v25, %v9685_v12  ;;  %v5015_v45 = vld [vmem:[#allocation10 + $0x58] sm:$0xff]  ;;  %4279 = vmatpush.bf16.msrb.mxu0 %v5007_v47  ;;  %v1085_v1 = vpop.f32.mrf.mxu2 }
 0x26f   : > { %9681 = vst [vmem:[#allocation28_spill] sm:$0xff] %v6528_v58  ;;  %v1596_v16 = vmul.f32 %v1595_v5, %v6364_v37  ;;  %v3858_v29 = vadd.f32 1.0, %v4773_v32  ;;  %v5023_v50 = vld [vmem:[#allocation10 + $0x98] sm:$0xff]  ;;  %v1532_v13 = vmul.f32 %v1531_v17, %v1507_v49  ;;  %v6574_v15 = vmul.f32 0.70710677, %v6553_v39  ;;  %4328 = vmatpush.bf16.msrb.mxu1 %v5015_v45  ;;  %v9691_v49 = vld [vmem:[#allocation22_spill] sm:$0xff] }
 0x270   : > { %v741_v54 = vmul.f32 %v5291_v14, %v722_v0  ;;  %v759_v30 = vadd.f32 %v5292_v10, %v740_v23  ;;  %v6579_v60 = vmul.f32 0.70710677, %v6559_v44  ;;  %v1775_v37 = vmul.f32 %v6562_v63, %v6562_v63  ;;  %4377 = vmatpush.bf16.msrb.mxu2 %v5023_v50  ;;  %v9687_v0 = vld [vmem:[#allocation23_spill] sm:$0xff] }
 0x271   : > { %v6576_v43 = vadd.f32 1.0, %v1596_v16  ;;  %v6584_v11 = vmul.f32 %v3858_v29, %v9687_v0  ;;  %v1569_v6 = vand.u32 2147483648, %v6504_v48  ;;  %v6588_v5 = vmul.f32 0.5, %v6379_v19 }
 0x272   : > { %v760_v28 = vadd.f32 %v5292_v10, %v741_v54  ;;  %v1659_v32 = vmul.f32 %v1658_v57, %v6522_v55  ;;  %v4775_v2 = vclamps-f32 %v1532_v13, 1.0  ;;  %v1586_v25 = vadd.f32 1.1283791, %v1585_v8 }
 0x273   : > { %9688 = vst [vmem:[#allocation24_spill] sm:$0xff] %v6584_v11  ;;  %v1623_v14 = vmul.f32 %v1622_v18, %v6456_v51  ;;  %v6593_v23 = vmul.f32 0.5, %v6468_v20  ;;  %v6596_v4 = vmul.f32 %v1546_v3, %v9691_v49  ;;  %v1567_v19 = vand.u32 2147483647, %v6504_v48 }
 0x274   : > { %v768_v7 = vpack.c.bf16 %v760_v28, %v759_v30  ;;  %9689 = vst [vmem:[#allocation23_spill] sm:$0xff] %v6588_v5  ;;  %v1695_v17 = vmul.f32 %v6574_v15, %v6574_v15  ;;  %v6602_v54 = vmul.f32 %v3859_v62, %v6320_v27  ;;  %5177 = vrcp.f32 %v6576_v43  ;;  %v990_v30 = vpop.f32.mrf.mxu0 }
 0x275   : > { %9690 = vst [vmem:[#allocation29_spill] sm:$0xff] %v6593_v23  ;;  %v1735_v20 = vmul.f32 %v6579_v60, %v6579_v60  ;;  %v6607_v61 = vmin.f32 %v1775_v37, 16.0  ;;  %v6610_v16 = vor.u32 1.1754944e-38, %v1569_v6  ;;  %v1609_v29 = vand.u32 2147483648, %v6576_v43 }
 0x276   : > { %1014 = vmatmul.bf16.gmra.mxu0 %v768_v7  ;;  %1063 = vmatmul.bf16.gmra.mxu1 %v768_v7  ;;  %9692 = vst [vmem:[#allocation22_spill] sm:$0xff] %v6602_v54  ;;  %v1660_v57 = vadd.f32 0.0036580483, %v1659_v32  ;;  %v1037_v10 = vadd.f32 %v1036_v59, %v6001_v9  ;;  %v3860_v28 = vadd.f32 1.0, %v4775_v2  ;;  %v6615_v27 = vmul.f32 %v1586_v25, %v6292_v24  ;;  %v1039_v59 = vpop.f32.mrf.mxu1 }
 0x277   : > { %1112 = vmatmul.bf16.gmra.mxu2 %v768_v7  ;;  %1161 = vmatmul.bf16.gmra.mxu3 %v768_v7  ;;  %v1624_v47 = vadd.f32 0.18741608, %v1623_v14  ;;  %v6618_v45 = vmul.f32 0.5, %v6553_v39  ;;  %v1561_v50 = vmul.f32 %v6555_v26, %v1560_v42  ;;  %v6621_v13 = vmin.f32 %v1695_v17, 16.0  ;;  %v1088_v42 = vpop.f32.mrf.mxu2 }
 0x278   : > { %v6624_v35 = vadd.f32 %v1085_v1, %v9684_v36  ;;  %v6627_v8 = vadd.f32 %v1134_v41, %v9685_v12  ;;  %v6630_v22 = vmin.f32 %v1735_v20, 16.0  ;;  %v6633_v24 = vadd.f32 %v990_v30, %v5994_v38 }
 0x279   : > { %9693 = vst [vmem:[#allocation30_spill] sm:$0xff] %v6618_v45  ;;  %v1788_v39 = vmul.f32 3.8918573e-05, %v6607_v61  ;;  %v6637_v3 = vor.u32 1.1754944e-38, %v1609_v29  ;;  %v1661_v31 = vmul.f32 %v1660_v57, %v6522_v55  ;;  %v6640_v7 = vmul.f32 0.70710677, %v1037_v10 }
 0x27a   : > { %9694 = vst [vmem:[#allocation31_spill] sm:$0xff] %v6621_v13  ;;  %v6642_v62 = vpop.eup %5177  ;;  %vm6644_vm11 = vcmp.eq.f32.partialorder %v1567_v19, 8.507059e+37  ;;  %v1625_v0 = vmul.f32 %v1624_v47, %v6456_v51  ;;  %v6650_v6 = vmul.f32 0.5, %v6559_v44  ;;  %v6653_v32 = vadd.f32 %v1039_v59, %v6001_v9  ;;  %v1137_v47 = vpop.f32.mrf.mxu3 }
 0x27b   : > { %9695 = vst [vmem:[#allocation32_spill] sm:$0xff] %v6630_v22  ;;  %v1628_v1 = vmul.f32 3.8918573e-05, %v6456_v51  ;;  %v1562_v2 = vadd.f32 %v6555_v26, %v1561_v50  ;;  %v1697_v25 = vmul.f32 2.1237322e-06, %v6621_v13  ;;  %v6665_v19 = vmul.f32 %v3860_v28, %v6382_v56 }
 0x27c   : > { %9698 = vst [vmem:[#allocation33_spill] sm:$0xff] %v6650_v6  ;;  %v6659_v14 = vmul.f32 0.70710677, %v6624_v35  ;;  %v6662_v49 = vmul.f32 0.70710677, %v6627_v8  ;;  %v1599_v20 = vmul.f32 %v6642_v62, %v6576_v43  ;;  %v6674_v57 = vmul.f32 0.5, %v6544_v53 }
 0x27d   : > { %9699 = vst [vmem:[#allocation34_spill] sm:$0xff] %v6665_v19  ;;  %v1737_v44 = vmul.f32 2.1237322e-06, %v6630_v22  ;;  %v6669_v17 = vmul.f32 0.70710677, %v6633_v24  ;;  %v1815_v30 = vmul.f32 %v6640_v7, %v6640_v7  ;;  %v6692_v53 = vadd.f32 %v1088_v42, %v9684_v36 }
 0x27e   : > { %v1789_v41 = vadd.f32 0.001143296, %v1788_v39  ;;  %v1662_v29 = vadd.f32 0.05243302, %v1661_v31  ;;  %9701 = vst [vmem:[#allocation36_spill] sm:$0xff] %v6674_v57  ;;  %v1566_v39 = vsel %vm6682_vm12, %v6555_v26, %v1562_v2  ;;  %v1855_v48 = vmul.f32 %v6659_v14, %v6659_v14 }
 0x27f   : > { %9700 = vst [vmem:[#allocation35_spill] sm:$0xff] %v6669_v17  ;;  %v6686_v28 = vadd.f32 1.1283791, %v1625_v0  ;;  %v6689_v50 = vmul.f32 0.70710677, %v6653_v32  ;;  %v1895_v18 = vmul.f32 %v6662_v49, %v6662_v49  ;;  %v1935_v6 = vmul.f32 %v6669_v17, %v6669_v17 }
 0x280   : > { %v1629_v59 = vadd.f32 0.001143296, %v1628_v1  ;;  %v1698_v31 = vadd.f32 0.00028619796, %v1697_v25  ;;  %v1738_v0 = vadd.f32 0.00028619796, %v1737_v44  ;;  %v6704_v45 = vadd.f32 %v1137_v47, %v9685_v12 }
 0x281   : > { %9704 = vst [vmem:[#allocation37_spill] sm:$0xff] %v6689_v50  ;;  %v1790_v1 = vmul.f32 %v1789_v41, %v6607_v61  ;;  %v1600_v42 = vsub.f32 1.0, %v1599_v20  ;;  %v1663_v56 = vmul.f32 %v1662_v29, %v6522_v55  ;;  %v1777_v26 = vmul.f32 2.1237322e-06, %v6607_v61 }
 0x282   : > { %v6709_v2 = vmin.f32 %v1815_v30, 16.0  ;;  %v6711_v25 = vmul.f32 0.5, %v1037_v10  ;;  %v1975_v44 = vmul.f32 %v6689_v50, %v6689_v50  ;;  %v6716_v23 = vmul.f32 0.70710677, %v6692_v53 }
 0x283   : > { %v1630_v47 = vmul.f32 %v1629_v59, %v6456_v51  ;;  %v1571_v41 = vsel %vm6644_vm11, %v6610_v16, %v1566_v39  ;;  %v1699_v20 = vmul.f32 %v1698_v31, %v6621_v13  ;;  %v6723_v29 = vmin.f32 %v1855_v48, 16.0  ;;  %v992_v31 = vpop.f32.mrf.mxu0 }
 0x284   : > { %9705 = vst [vmem:[#allocation38_spill] sm:$0xff] %v6711_v25  ;;  %v6725_v30 = vmin.f32 %v1895_v18, 16.0  ;;  %v1739_v10 = vmul.f32 %v1738_v0, %v6630_v22  ;;  %v6728_v25 = vmin.f32 %v1935_v6, 16.0  ;;  %v6731_v5 = vmul.f32 0.70710677, %v6704_v45 }
 0x285   : > { %9706 = vst [vmem:[#allocation39_spill] sm:$0xff] %v6716_v23  ;;  %v1791_v57 = vadd.f32 0.014752088, %v1790_v1  ;;  %vm1603_vm13 = vweird.f32 %v6576_v43  ;;  %vm1604_vm14 = vweird.f32 %v6642_v62  ;;  %v1664_v37 = vadd.f32 0.18741608, %v1663_v56 }
 0x286   : > { %9707 = vst [vmem:[#allocation40_spill] sm:$0xff] %v6723_v29  ;;  %v1778_v16 = vadd.f32 0.00028619796, %v1777_v26  ;;  %v1817_v59 = vmul.f32 2.1237322e-06, %v6709_v2  ;;  %v1572_v39 = vmul.f32 %v1571_v41, %v6596_v4  ;;  %v6737_v18 = vmin.f32 %v1975_v44, 16.0  ;;  %vm6776_vm0 = vmor %vm1603_vm13, %vm1604_vm14 }
 0x287   : > { %9708 = vst [vmem:[#allocation41_spill] sm:$0xff] %v6725_v30  ;;  %v2015_v6 = vmul.f32 %v6716_v23, %v6716_v23  ;;  %v1631_v48 = vadd.f32 0.014752088, %v1630_v47  ;;  %v1601_v0 = vmul.f32 %v6642_v62, %v1600_v42  ;;  %v1700_v1 = vadd.f32 0.0036580483, %v1699_v20 }
 0x288   : > { %9709 = vst [vmem:[#allocation42_spill] sm:$0xff] %v6728_v25  ;;  %v1857_v11 = vmul.f32 2.1237322e-06, %v6723_v29  ;;  %v1897_v58 = vmul.f32 2.1237322e-06, %v6725_v30  ;;  %v2055_v4 = vmul.f32 %v6731_v5, %v6731_v5  ;;  %v1792_v44 = vmul.f32 %v1791_v57, %v6607_v61 }
 0x289   : > { %9710 = vst [vmem:[#allocation43_spill] sm:$0xff] %v6731_v5  ;;  %v1740_v56 = vadd.f32 0.0036580483, %v1739_v10  ;;  %v1937_v26 = vmul.f32 2.1237322e-06, %v6728_v25  ;;  %v1665_v41 = vmul.f32 %v1664_v37, %v6522_v55  ;;  %v1779_v19 = vmul.f32 %v1778_v16, %v6607_v61 }
 0x28a   : > { %9711 = vst [vmem:[#allocation44_spill] sm:$0xff] %v6737_v18  ;;  %v1818_v47 = vadd.f32 0.00028619796, %v1817_v59  ;;  %v6751_v42 = vadd.f32 %v992_v31, %v5994_v38  ;;  %v4776_v20 = vclamps-f32 %v1572_v39, 1.0  ;;  %v9712_v52 = vand.u32 2147483647, %v6576_v43 }
 0x28b   : > { %v1977_v54 = vmul.f32 2.1237322e-06, %v6737_v18  ;;  %v6760_v5 = vmin.f32 %v2015_v6, 16.0  ;;  %v1632_v57 = vmul.f32 %v1631_v48, %v6456_v51  ;;  %v1602_v37 = vadd.f32 %v6642_v62, %v1601_v0  ;;  %v1041_v0 = vpop.f32.mrf.mxu1 }
 0x28c   : > { %vm6755_vm15 = vcmp.eq.f32.partialorder %v9712_v52, 8.507059e+37  ;;  %v1701_v16 = vmul.f32 %v1700_v1, %v6621_v13  ;;  %v1858_v59 = vadd.f32 0.00028619796, %v1857_v11  ;;  %v1898_v31 = vadd.f32 0.00028619796, %v1897_v58 }
 0x28d   : > { %9715 = vst [vmem:[#allocation45_spill] sm:$0xff] %v6760_v5  ;;  %v1741_v39 = vmul.f32 %v1740_v56, %v6630_v22  ;;  %v1938_v55 = vadd.f32 0.00028619796, %v1937_v26  ;;  %v6766_v46 = vmin.f32 %v2055_v4, 16.0  ;;  %v1793_v52 = vadd.f32 0.112945676, %v1792_v44 }
 0x28e   : > { %v1666_v23 = vadd.f32 1.1283791, %v1665_v41  ;;  %v1780_v50 = vadd.f32 0.0036580483, %v1779_v19  ;;  %v1819_v17 = vmul.f32 %v1818_v47, %v6709_v2  ;;  %v6770_v6 = vmul.f32 0.70710677, %v6751_v42 }
 0x28f   : > { %9716 = vst [vmem:[#allocation46_spill] sm:$0xff] %v6766_v46  ;;  %v6782_v58 = vmul.f32 %v6686_v28, %v6414_v33  ;;  %v1978_v48 = vadd.f32 0.00028619796, %v1977_v54  ;;  %v2017_v19 = vmul.f32 2.1237322e-06, %v6760_v5  ;;  %v1606_v56 = vsel %vm6776_vm0, %v6642_v62, %v1602_v37 }
 0x290   : > { %9717 = vst [vmem:[#allocation47_spill] sm:$0xff] %v6770_v6  ;;  %v1633_v1 = vadd.f32 0.112945676, %v1632_v57  ;;  %v1702_v26 = vadd.f32 0.05243302, %v1701_v16  ;;  %v1859_v43 = vmul.f32 %v1858_v59, %v6723_v29  ;;  %v1899_v4 = vmul.f32 %v1898_v31, %v6725_v30 }
 0x291   : > { %9720 = vst [vmem:[#allocation48_spill] sm:$0xff] %v6782_v58  ;;  %v1742_v44 = vadd.f32 0.05243302, %v1741_v39  ;;  %v1939_v41 = vmul.f32 %v1938_v55, %v6728_v25  ;;  %v2057_v33 = vmul.f32 2.1237322e-06, %v6766_v46  ;;  %v1794_v54 = vmul.f32 %v1793_v52, %v6607_v61 }
 0x292   : > { %v1781_v28 = vmul.f32 %v1780_v50, %v6607_v61  ;;  %v1820_v47 = vadd.f32 0.0036580483, %v1819_v17  ;;  %v2095_v57 = vmul.f32 %v6770_v6, %v6770_v6  ;;  %v6797_v62 = vadd.f32 %v1041_v0, %v6001_v9 }
 0x293   : > { %v3861_v37 = vadd.f32 1.0, %v4776_v20  ;;  %v1979_v16 = vmul.f32 %v1978_v48, %v6737_v18  ;;  %v2018_v59 = vadd.f32 0.00028619796, %v2017_v19  ;;  %v1634_v31 = vmul.f32 %v1633_v1, %v6456_v51  ;;  %v6812_v1 = vpop.f32.mrf.mxu0 }
 0x294   : > { %v1611_v55 = vsel %vm6755_vm15, %v6637_v3, %v1606_v56  ;;  %v1703_v39 = vmul.f32 %v1702_v26, %v6621_v13  ;;  %v1860_v50 = vadd.f32 0.0036580483, %v1859_v43  ;;  %v1900_v17 = vadd.f32 0.0036580483, %v1899_v4 }
 0x295   : > { %v1743_v52 = vmul.f32 %v1742_v44, %v6630_v22  ;;  %v1940_v11 = vadd.f32 0.0036580483, %v1939_v41  ;;  %v2058_v6 = vadd.f32 0.00028619796, %v2057_v33  ;;  %v1795_v0 = vadd.f32 0.4994258, %v1794_v54 }
 0x296   : > { %v1782_v58 = vadd.f32 0.05243302, %v1781_v28  ;;  %v1821_v20 = vmul.f32 %v1820_v47, %v6709_v2  ;;  %v6807_v48 = vmin.f32 %v2095_v57, 16.0  ;;  %v6810_v19 = vmul.f32 0.70710677, %v6797_v62 }
 0x297   : > { %v1612_v3 = vmul.f32 %v1611_v55, %v6615_v27  ;;  %v1980_v10 = vadd.f32 0.0036580483, %v1979_v16  ;;  %v2019_v56 = vmul.f32 %v2018_v59, %v6760_v5  ;;  %v1635_v26 = vadd.f32 0.4994258, %v1634_v31  ;;  %v5006_v55 = vld [vmem:[#allocation10 + $0x10] sm:$0xff] }
 0x298   : > { %9721 = vst [vmem:[#allocation49_spill] sm:$0xff] %v6807_v48  ;;  %v6817_v43 = vmul.f32 %v1666_v23, %v6485_v21  ;;  %v1704_v4 = vadd.f32 0.18741608, %v1703_v39  ;;  %v1861_v44 = vmul.f32 %v1860_v50, %v6723_v29  ;;  %v1901_v41 = vmul.f32 %v1900_v17, %v6725_v30  ;;  %v5014_v39 = vld [vmem:[#allocation10 + $0x50] sm:$0xff]  ;;  %4280 = vmatpush.bf16.msrb.mxu0 %v5006_v55 }
 0x299   : > { %v1744_v33 = vadd.f32 0.18741608, %v1743_v52  ;;  %v1941_v54 = vmul.f32 %v1940_v11, %v6728_v25  ;;  %v2059_v28 = vmul.f32 %v2058_v6, %v6766_v46  ;;  %v1796_v47 = vmul.f32 %v1795_v0, %v6607_v61  ;;  %v5022_v50 = vld [vmem:[#allocation10 + $0x90] sm:$0xff]  ;;  %4329 = vmatpush.bf16.msrb.mxu1 %v5014_v39 }
 0x29a   : > { %9722 = vst [vmem:[#allocation50_spill] sm:$0xff] %v6817_v43  ;;  %v1783_v27 = vmul.f32 %v1782_v58, %v6607_v61  ;;  %v1822_v57 = vadd.f32 0.05243302, %v1821_v20  ;;  %v2097_v16 = vmul.f32 2.1237322e-06, %v6807_v48  ;;  %v2135_v21 = vmul.f32 %v6810_v19, %v6810_v19  ;;  %v5030_v0 = vld [vmem:[#allocation10 + $0xd0] sm:$0xff]  ;;  %4378 = vmatpush.bf16.msrb.mxu2 %v5022_v50 }
 0x29b   : > { %v4777_v23 = vclamps-f32 %v1612_v3, 1.0  ;;  %v1981_v59 = vmul.f32 %v1980_v10, %v6737_v18  ;;  %v2020_v31 = vadd.f32 0.0036580483, %v2019_v56  ;;  %v1636_v17 = vmul.f32 %v1635_v26, %v6456_v51  ;;  %4427 = vmatpush.bf16.msrb.mxu3 %v5030_v0 }
 0x29c   : > { %v6831_v6 = vmul.f32 %v3861_v37, %v6537_v34  ;;  %v1705_v58 = vmul.f32 %v1704_v4, %v6621_v13  ;;  %v1862_v52 = vadd.f32 0.05243302, %v1861_v44  ;;  %v1902_v11 = vadd.f32 0.05243302, %v1901_v41 }
 0x29d   : > { %v6835_v20 = vmul.f32 0.5, %v6624_v35  ;;  %v1942_v3 = vadd.f32 0.05243302, %v1941_v54  ;;  %v2060_v43 = vadd.f32 0.0036580483, %v2059_v28  ;;  %v6837_v10 = vadd.f32 1.0, %v1796_v47 }
 0x29e   : > { %v1784_v56 = vadd.f32 0.18741608, %v1783_v27  ;;  %v1823_v51 = vmul.f32 %v1822_v57, %v6709_v2  ;;  %v2098_v26 = vadd.f32 0.00028619796, %v2097_v16  ;;  %v6840_v34 = vmin.f32 %v2135_v21, 16.0  ;;  %v1090_v27 = vpop.f32.mrf.mxu2  ;;  %v6850_v57 = vpop.f32.mrf.mxu0 }
 0x29f   : > { %9723 = vst [vmem:[#allocation51_spill] sm:$0xff] %v6835_v20  ;;  %v3862_v37 = vadd.f32 1.0, %v4777_v23  ;;  %v1982_v4 = vadd.f32 0.05243302, %v1981_v59  ;;  %v2021_v44 = vmul.f32 %v2020_v31, %v6760_v5  ;;  %v6843_v35 = vadd.f32 1.0, %v1636_v17  ;;  %v1139_v59 = vpop.f32.mrf.mxu3 }
 0x2a0   : > { %9724 = vst [vmem:[#allocation52_spill] sm:$0xff] %v6840_v34  ;;  %v1706_v41 = vadd.f32 1.1283791, %v1705_v58  ;;  %v1745_v54 = vmul.f32 %v1744_v33, %v6630_v22  ;;  %v1863_v28 = vmul.f32 %v1862_v52, %v6723_v29  ;;  %v6848_v47 = vmul.f32 0.5, %v6627_v8  ;;  %v6863_v58 = vpop.f32.mrf.mxu1 }
 0x2a1   : > { %v1903_v16 = vmul.f32 %v1902_v11, %v6725_v30  ;;  %v1943_v21 = vmul.f32 %v1942_v3, %v6728_v25  ;;  %v2061_v23 = vmul.f32 %v2060_v43, %v6766_v46  ;;  %5179 = vrcp.f32 %v6837_v10 }
 0x2a2   : > { %9725 = vst [vmem:[#allocation53_spill] sm:$0xff] %v6848_v47  ;;  %v1785_v31 = vmul.f32 %v1784_v56, %v6607_v61  ;;  %v1824_v33 = vadd.f32 0.18741608, %v1823_v51  ;;  %v2099_v55 = vmul.f32 %v2098_v26, %v6807_v48  ;;  %v2137_v8 = vmul.f32 2.1237322e-06, %v6840_v34 }
 0x2a3   : > { %v1983_v39 = vmul.f32 %v1982_v4, %v6737_v18  ;;  %v2022_v50 = vadd.f32 0.05243302, %v2021_v44  ;;  %v6861_v17 = vadd.f32 %v1090_v27, %v9684_v36  ;;  %5181 = vrcp.f32 %v6843_v35 }
 0x2a4   : > { %v6867_v43 = vmul.f32 %v3862_v37, %v6568_v40  ;;  %v1746_v52 = vadd.f32 1.1283791, %v1745_v54  ;;  %v1864_v61 = vadd.f32 0.18741608, %v1863_v28  ;;  %v6870_v11 = vadd.f32 %v1139_v59, %v9685_v12 }
 0x2a5   : > { %v6873_v0 = vmul.f32 %v1706_v41, %v6574_v15  ;;  %v1904_v3 = vadd.f32 0.18741608, %v1903_v16  ;;  %v1944_v56 = vadd.f32 0.18741608, %v1943_v21  ;;  %v2062_v51 = vadd.f32 0.05243302, %v2061_v23 }
 0x2a6   : > { %v1825_v26 = vmul.f32 %v1824_v33, %v6709_v2  ;;  %v6877_v4 = vmul.f32 0.5, %v6633_v24  ;;  %v2100_v44 = vadd.f32 0.0036580483, %v2099_v55  ;;  %v2138_v27 = vadd.f32 0.00028619796, %v2137_v8 }
 0x2a7   : > { %9726 = vst [vmem:[#allocation54_spill] sm:$0xff] %v6873_v0  ;;  %v6879_v40 = vpop.eup %5179  ;;  %v1786_v37 = vadd.f32 1.1283791, %v1785_v31  ;;  %v1984_v54 = vadd.f32 0.18741608, %v1983_v39  ;;  %v2023_v28 = vmul.f32 %v2022_v50, %v6760_v5  ;;  %v6886_v15 = vmul.f32 %v1746_v52, %v6579_v60  ;;  %v1000_v39 = vpop.f32.mrf.mxu0 }
 0x2a8   : > { %9727 = vst [vmem:[#allocation55_spill] sm:$0xff] %v6877_v4  ;;  %v6883_v59 = vmul.f32 0.70710677, %v6861_v17  ;;  %v1865_v41 = vmul.f32 %v1864_v61, %v6723_v29  ;;  %v6890_v16 = vmul.f32 0.5, %v6653_v32  ;;  %v6893_v24 = vmul.f32 0.70710677, %v6870_v11 }
 0x2a9   : > { %9728 = vst [vmem:[#allocation56_spill] sm:$0xff] %v6886_v15  ;;  %v6895_v21 = vpop.eup %5181  ;;  %v1905_v23 = vmul.f32 %v1904_v3, %v6725_v30  ;;  %v1945_v31 = vmul.f32 %v1944_v56, %v6728_v25  ;;  %v6900_v33 = vmul.f32 0.5, %v6692_v53  ;;  %v2063_v60 = vmul.f32 %v2062_v51, %v6766_v46  ;;  %v9753_v15 = vld [vmem:[#allocation26_spill] sm:$0xff]  ;;  %v9769_v29 = vld [vmem:[#allocation43_spill] sm:$0xff] }
 0x2aa   : > { %9729 = vst [vmem:[#allocation57_spill] sm:$0xff] %v6890_v16  ;;  %v1826_v55 = vadd.f32 1.1283791, %v1825_v26  ;;  %v2101_v8 = vmul.f32 %v2100_v44, %v6807_v48  ;;  %v2139_v32 = vmul.f32 %v2138_v27, %v6840_v34  ;;  %v1799_v50 = vmul.f32 %v6879_v40, %v6837_v10  ;;  %v6920_v16 = vpop.f32.mrf.mxu1 }
 0x2ab   : > { %9730 = vst [vmem:[#allocation58_spill] sm:$0xff] %v6900_v33  ;;  %v6908_v52 = vmul.f32 %v1786_v37, %v6562_v63  ;;  %v1985_v61 = vmul.f32 %v1984_v54, %v6737_v18  ;;  %v2024_v3 = vadd.f32 0.18741608, %v2023_v28  ;;  %v2175_v53 = vmul.f32 %v6883_v59, %v6883_v59  ;;  %v1093_v37 = vpop.f32.mrf.mxu2  ;;  %v9754_v18 = vld [vmem:[#allocation34_spill] sm:$0xff] }
 0x2ac   : > { %v1866_v56 = vadd.f32 1.1283791, %v1865_v41  ;;  %v6914_v51 = vmul.f32 0.5, %v6704_v45  ;;  %v2215_v26 = vmul.f32 %v6893_v24, %v6893_v24  ;;  %v1639_v44 = vmul.f32 %v6895_v21, %v6843_v35 }
 0x2ad   : > { %v1906_v27 = vadd.f32 1.1283791, %v1905_v23  ;;  %v1946_v33 = vadd.f32 1.1283791, %v1945_v31  ;;  %v2064_v63 = vadd.f32 0.18741608, %v2063_v60  ;;  %v6923_v54 = vadd.f32 %v1000_v39, %v5994_v38 }
 0x2ae   : > { %9731 = vst [vmem:[#allocation59_spill] sm:$0xff] %v6914_v51  ;;  %v6926_v28 = vmul.f32 %v1826_v55, %v6640_v7  ;;  %v2102_v45 = vadd.f32 0.05243302, %v2101_v8  ;;  %v2140_v41 = vadd.f32 0.0036580483, %v2139_v32  ;;  %v1800_v51 = vsub.f32 1.0, %v1799_v50 }
 0x2af   : > { %v1986_v4 = vadd.f32 1.1283791, %v1985_v61  ;;  %v2025_v47 = vmul.f32 %v2024_v3, %v6760_v5  ;;  %v6930_v20 = vmul.f32 0.5, %v6751_v42  ;;  %v6932_v23 = vmin.f32 %v2175_v53, 16.0 }
 0x2b0   : > { %9732 = vst [vmem:[#allocation60_spill] sm:$0xff] %v6926_v28  ;;  %v6935_v31 = vmul.f32 %v1866_v56, %v6659_v14  ;;  %v6938_v60 = vmul.f32 0.5, %v6797_v62  ;;  %v6940_v39 = vmin.f32 %v2215_v26, 16.0  ;;  %v1640_v7 = vsub.f32 1.0, %v1639_v44  ;;  %v9739_v14 = vld [vmem:[#allocation35_spill] sm:$0xff] }
 0x2b1   : > { %9733 = vst [vmem:[#allocation61_spill] sm:$0xff] %v6930_v20  ;;  %v6943_v55 = vmul.f32 %v1906_v27, %v6662_v49  ;;  %v2065_v8 = vmul.f32 %v2064_v63, %v6766_v46  ;;  %v6948_v42 = vadd.f32 %v6812_v1, %v5994_v38  ;;  %v6951_v32 = vmul.f32 0.70710677, %v6923_v54  ;;  %v9741_v49 = vld [vmem:[#allocation37_spill] sm:$0xff]  ;;  %v1142_v46 = vpop.f32.mrf.mxu3 }
 0x2b2   : > { %9734 = vst [vmem:[#allocation62_spill] sm:$0xff] %v6932_v23  ;;  %v6954_v50 = vmul.f32 %v1946_v33, %v9739_v14  ;;  %v2103_v62 = vmul.f32 %v2102_v45, %v6807_v48  ;;  %v2141_v61 = vmul.f32 %v2140_v41, %v6840_v34  ;;  %v1801_v3 = vmul.f32 %v6879_v40, %v1800_v51  ;;  %v1049_v14 = vpop.f32.mrf.mxu1 }
 0x2b3   : > { %9735 = vst [vmem:[#allocation63_spill] sm:$0xff] %v6935_v31  ;;  %v6960_v53 = vmul.f32 %v1986_v4, %v9741_v49  ;;  %v2026_v56 = vadd.f32 1.1283791, %v2025_v47  ;;  %v2177_v26 = vmul.f32 2.1237322e-06, %v6932_v23  ;;  %v6965_v1 = vadd.f32 %v6863_v58, %v6001_v9 }
 0x2b4   : > { %9736 = vst [vmem:[#allocation64_spill] sm:$0xff] %v6938_v60  ;;  %v6968_v44 = vmul.f32 0.5, %v6861_v17  ;;  %v6971_v33 = vmul.f32 0.5, %v6870_v11  ;;  %v2217_v27 = vmul.f32 2.1237322e-06, %v6940_v39  ;;  %v1641_v51 = vmul.f32 %v6895_v21, %v1640_v7 }
 0x2b5   : > { %9737 = vst [vmem:[#allocation65_spill] sm:$0xff] %v6940_v39  ;;  %v6975_v63 = vadd.f32 1.1283791, %v2065_v8  ;;  %v6978_v47 = vmul.f32 0.70710677, %v6948_v42  ;;  %v2575_v4 = vmul.f32 %v6951_v32, %v6951_v32  ;;  %vm1804_vm1 = vweird.f32 %v6879_v40  ;;  %v6990_v8 = vpop.f32.mrf.mxu2 }
 0x2b6   : > { %9738 = vst [vmem:[#allocation66_spill] sm:$0xff] %v6943_v55  ;;  %v2104_v58 = vadd.f32 0.18741608, %v2103_v62  ;;  %v2142_v17 = vadd.f32 0.05243302, %v2141_v61  ;;  %v6984_v45 = vadd.f32 %v1093_v37, %v9684_v36  ;;  %v1802_v11 = vadd.f32 %v6879_v40, %v1801_v3  ;;  %v9747_v3 = vld [vmem:[#allocation39_spill] sm:$0xff] }
 0x2b7   : > { %9740 = vst [vmem:[#allocation35_spill] sm:$0xff] %v6954_v50  ;;  %v2178_v41 = vadd.f32 0.00028619796, %v2177_v26  ;;  %v6988_v7 = vmul.f32 0.70710677, %v6965_v1  ;;  %vm1803_vm2 = vweird.f32 %v6837_v10  ;;  %v1809_v49 = vand.u32 2147483648, %v6837_v10 }
 0x2b8   : > { %9742 = vst [vmem:[#allocation37_spill] sm:$0xff] %v6960_v53  ;;  %v1642_v62 = vadd.f32 %v6895_v21, %v1641_v51  ;;  %vm1644_vm3 = vweird.f32 %v6895_v21  ;;  %vm6996_vm4 = vmor %vm1803_vm2, %vm1804_vm1  ;;  %v1807_v61 = vand.u32 2147483647, %v6837_v10  ;;  %v7002_v26 = vmul.f32 %v2026_v56, %v9747_v3  ;;  %v5013_v53 = vld [vmem:[#allocation10 + $0x48] sm:$0xff]  ;;  %v5012_v37 = vld [vmem:[#allocation10 + $0x40] sm:$0xff] }
 0x2b9   : > { %9743 = vst [vmem:[#allocation67_spill] sm:$0xff] %v6968_v44  ;;  %v2255_v44 = vmul.f32 %v6978_v47, %v6978_v47  ;;  %v7006_v60 = vmin.f32 %v2575_v4, 16.0  ;;  %v5021_v51 = vld [vmem:[#allocation10 + $0x88] sm:$0xff]  ;;  %v1649_v20 = vand.u32 2147483648, %v6843_v35  ;;  %v7010_v5 = vadd.f32 %v1049_v14, %v6001_v9  ;;  %4330 = vmatpush.bf16.msrb.mxu1 %v5013_v53  ;;  %v5028_v14 = vld [vmem:[#allocation10 + $0xc0] sm:$0xff] }
 0x2ba   : > { %9744 = vst [vmem:[#allocation68_spill] sm:$0xff] %v6971_v33  ;;  %v2218_v33 = vadd.f32 0.00028619796, %v2217_v27  ;;  %v5005_v27 = vld [vmem:[#allocation10 + $0x8] sm:$0xff]  ;;  %vm1643_vm5 = vweird.f32 %v6843_v35  ;;  %v1647_v10 = vand.u32 2147483647, %v6843_v35  ;;  %v1806_v56 = vsel %vm6996_vm4, %v6879_v40, %v1802_v11  ;;  %4379 = vmatpush.bf16.msrb.mxu2 %v5021_v51 }
 0x2bb   : > { %9748 = vst [vmem:[#allocation39_spill] sm:$0xff] %v7002_v26  ;;  %v5029_v50 = vld [vmem:[#allocation10 + $0xc8] sm:$0xff]  ;;  %v2105_v4 = vmul.f32 %v2104_v58, %v6807_v48  ;;  %v2179_v3 = vmul.f32 %v2178_v41, %v6932_v23  ;;  %v7020_v26 = vmul.f32 0.70710677, %v6984_v45  ;;  %4281 = vmatpush.bf16.msrb.mxu0 %v5005_v27  ;;  %vm7024_vm6 = vmor %vm1643_vm5, %vm1644_vm3  ;;  %v1810_v35 = vor.u32 1.1754944e-38, %v1809_v49  ;;  %v5004_v41 = vld [vmem:[#allocation10] sm:$0xff] }
 0x2bc   : > { %v2143_v55 = vmul.f32 %v2142_v17, %v6840_v34  ;;  %v7030_v40 = vadd.f32 %v1142_v46, %v9685_v12  ;;  %4428 = vmatpush.bf16.msrb.mxu3 %v5029_v50  ;;  %v1646_v58 = vsel %vm7024_vm6, %v6895_v21, %v1642_v62  ;;  %vm1808_vm7 = vcmp.eq.f32.partialorder %v1807_v61, 8.507059e+37  ;;  %v5020_v51 = vld [vmem:[#allocation10 + $0x80] sm:$0xff]  ;;  %v9751_v61 = vld [vmem:[#allocation25_spill] sm:$0xff] }
 0x2bd   : > { %v7035_v53 = vmin.f32 %v2255_v44, 16.0  ;;  %v2588_v11 = vmul.f32 3.8918573e-05, %v7006_v60  ;;  %v1650_v27 = vor.u32 1.1754944e-38, %v1649_v20  ;;  %v1811_v49 = vsel %vm1808_vm7, %v1810_v35, %v1806_v56  ;;  %4331 = vmatpush.bf16.msrb.mxu1 %v5012_v37  ;;  %v9752_v56 = vld [vmem:[#allocation22_spill] sm:$0xff]  ;;  %v1098_v48 = vpop.f32.mrf.mxu2  ;;  %v9756_v37 = vld [vmem:[#allocation24_spill] sm:$0xff] }
 0x2be   : > { %v2219_v17 = vmul.f32 %v2218_v33, %v6940_v39  ;;  %v2295_v46 = vmul.f32 %v6988_v7, %v6988_v7  ;;  %v7042_v50 = vmul.f32 0.70710677, %v7010_v5  ;;  %vm1648_vm8 = vcmp.eq.f32.partialorder %v1647_v10, 8.507059e+37  ;;  %4380 = vmatpush.bf16.msrb.mxu2 %v5020_v51 }
 0x2bf   : > { %v2180_v21 = vadd.f32 0.0036580483, %v2179_v3  ;;  %v2335_v44 = vmul.f32 %v7020_v26, %v7020_v26  ;;  %v7048_v62 = vadd.f32 %v6850_v57, %v5994_v38  ;;  %4282 = vmatpush.bf16.msrb.mxu0 %v5004_v41  ;;  %v1651_v20 = vsel %vm1648_vm8, %v1650_v27, %v1646_v58  ;;  %v9755_v57 = vld [vmem:[#allocation28_spill] sm:$0xff] }
 0x2c0   : > { %v2144_v33 = vadd.f32 0.18741608, %v2143_v55  ;;  %4429 = vmatpush.bf16.msrb.mxu3 %v5028_v14  ;;  %v3983_v35 = vpack.c.bf16 %v9752_v56, %v9751_v61  ;;  %v3984_v10 = vpack.c.bf16 %v9754_v18, %v9753_v15  ;;  %v1812_v3 = vmul.f32 %v1811_v49, %v6908_v52  ;;  %v9758_v15 = vld [vmem:[#allocation48_spill] sm:$0xff] }
 0x2c1   : > { %v2257_v31 = vmul.f32 2.1237322e-06, %v7035_v53  ;;  %v2589_v0 = vadd.f32 0.001143296, %v2588_v11  ;;  %v3985_v41 = vpack.c.bf16 %v6831_v6, %v9755_v57  ;;  %v3986_v55 = vpack.c.bf16 %v6867_v43, %v9756_v37 }
 0x2c2   : > { %v7061_v58 = vmul.f32 0.5, %v6948_v42  ;;  %v7064_v27 = vmul.f32 0.70710677, %v7030_v40  ;;  %v2615_v18 = vmul.f32 %v7042_v50, %v7042_v50  ;;  %4283 = vmatmul.bf16.vlgmr.msrb.gmra.mxu0 %v3983_v35  ;;  %4332 = vmatmul.bf16.vlgmr.msrb.gmra.mxu1 %v3984_v10  ;;  %v1652_v52 = vmul.f32 %v1651_v20, %v9758_v15 }
 0x2c3   : > { %v2181_v11 = vmul.f32 %v2180_v21, %v6932_v23  ;;  %v2220_v49 = vadd.f32 0.0036580483, %v2219_v17  ;;  %v7070_v6 = vmin.f32 %v2295_v46, 16.0  ;;  %v7072_v51 = vmin.f32 %v2335_v44, 16.0  ;;  %4381 = vmatmul.bf16.vlgmr.msrb.gmra.mxu2 %v3985_v41  ;;  %4430 = vmatmul.bf16.vlgmr.msrb.gmra.mxu3 %v3986_v55 }
 0x2c4   : > { %9757 = vst [vmem:[#allocation25_spill] sm:$0xff] %v7061_v58  ;;  %v7075_v43 = vmul.f32 0.70710677, %v7048_v62  ;;  %v7079_v42 = vadd.f32 %v6920_v16, %v6001_v9  ;;  %v7082_v14 = vadd.f32 %v1098_v48, %v9684_v36  ;;  %v4782_v20 = vclamps-f32 %v1812_v3, 1.0 }
 0x2c5   : > { %v2106_v61 = vadd.f32 1.1283791, %v2105_v4  ;;  %v2145_v17 = vmul.f32 %v2144_v33, %v6840_v34  ;;  %v2258_v46 = vadd.f32 0.00028619796, %v2257_v31  ;;  %v2590_v21 = vmul.f32 %v2589_v0, %v7006_v60 }
 0x2c6   : > { %9759 = vst [vmem:[#allocation22_spill] sm:$0xff] %v7082_v14  ;;  %v7087_v44 = vmul.f32 0.5, %v6965_v1  ;;  %v2375_v56 = vmul.f32 %v7064_v27, %v7064_v27  ;;  %v7091_v35 = vmin.f32 %v2615_v18, 16.0  ;;  %v4778_v16 = vclamps-f32 %v1652_v52, 1.0  ;;  %v1144_v52 = vpop.f32.mrf.mxu3 }
 0x2c7   : > { %v2182_v10 = vadd.f32 0.05243302, %v2181_v11  ;;  %v2221_v48 = vmul.f32 %v2220_v49, %v6940_v39  ;;  %v2297_v3 = vmul.f32 2.1237322e-06, %v7070_v6  ;;  %v2337_v4 = vmul.f32 2.1237322e-06, %v7072_v51 }
 0x2c8   : > { %9760 = vst [vmem:[#allocation26_spill] sm:$0xff] %v7087_v44  ;;  %v2415_v31 = vmul.f32 %v7075_v43, %v7075_v43  ;;  %v7099_v0 = vmul.f32 0.70710677, %v7079_v42  ;;  %v7102_v1 = vmul.f32 0.70710677, %v7082_v14  ;;  %v3867_v33 = vadd.f32 1.0, %v4782_v20 }
 0x2c9   : > { %v2146_v57 = vadd.f32 1.1283791, %v2145_v17  ;;  %v2259_v41 = vmul.f32 %v2258_v46, %v7035_v53  ;;  %v7106_v37 = vmul.f32 0.5, %v6984_v45  ;;  %v2591_v55 = vadd.f32 0.014752088, %v2590_v21  ;;  %v9765_v46 = vld [vmem:[#allocation36_spill] sm:$0xff] }
 0x2ca   : > { %v7109_v18 = vmul.f32 0.5, %v7030_v40  ;;  %v7111_v15 = vmin.f32 %v2375_v56, 16.0  ;;  %v2628_v11 = vmul.f32 3.8918573e-05, %v7091_v35  ;;  %v3863_v49 = vadd.f32 1.0, %v4778_v16 }
 0x2cb   : > { %9761 = vst [vmem:[#allocation34_spill] sm:$0xff] %v7106_v37  ;;  %v2183_v44 = vmul.f32 %v2182_v10, %v6932_v23  ;;  %v2222_v58 = vadd.f32 0.05243302, %v2221_v48  ;;  %v2298_v20 = vadd.f32 0.00028619796, %v2297_v3  ;;  %v7115_v34 = vmin.f32 %v2415_v31, 16.0 }
 0x2cc   : > { %9762 = vst [vmem:[#allocation28_spill] sm:$0xff] %v7109_v18  ;;  %v2338_v17 = vadd.f32 0.00028619796, %v2337_v4  ;;  %v2455_v45 = vmul.f32 %v7099_v0, %v7099_v0  ;;  %v2655_v40 = vmul.f32 %v7102_v1, %v7102_v1  ;;  %v3931_v21 = vmul.f32 %v3867_v33, %v9765_v46  ;;  %v9766_v4 = vld [vmem:[#allocation23_spill] sm:$0xff] }
 0x2cd   : > { %9763 = vst [vmem:[#allocation24_spill] sm:$0xff] %v7111_v15  ;;  %v2260_v56 = vadd.f32 0.0036580483, %v2259_v41  ;;  %v7124_v18 = vadd.f32 %v6990_v8, %v9684_v36  ;;  %v7127_v16 = vadd.f32 %v1144_v52, %v9685_v12  ;;  %v2592_v10 = vmul.f32 %v2591_v55, %v7006_v60  ;;  %v9767_v37 = vld [vmem:[#allocation27_spill] sm:$0xff] }
 0x2ce   : > { %9764 = vst [vmem:[#allocation48_spill] sm:$0xff] %v7115_v34  ;;  %v2377_v48 = vmul.f32 2.1237322e-06, %v7111_v15  ;;  %v2629_v3 = vadd.f32 0.001143296, %v2628_v11  ;;  %v3927_v31 = vmul.f32 %v3863_v49, %v9766_v4  ;;  %v2223_v33 = vmul.f32 %v2222_v58, %v6940_v39 }
 0x2cf   : > { %v1668_v25 = vmul.f32 3.8918573e-05, %v9767_v37  ;;  %v2184_v30 = vadd.f32 0.18741608, %v2183_v44  ;;  %v2299_v41 = vmul.f32 %v2298_v20, %v7070_v6  ;;  %v2339_v8 = vmul.f32 %v2338_v17, %v7072_v51 }
 0x2d0   : > { %v2417_v46 = vmul.f32 2.1237322e-06, %v7115_v34  ;;  %v7137_v52 = vmin.f32 %v2455_v45, 16.0  ;;  %v7139_v22 = vmin.f32 %v2655_v40, 16.0  ;;  %v3987_v55 = vpack.c.bf16 %v3931_v21, %v3927_v31 }
 0x2d1   : > { %v7143_v11 = vmul.f32 %v6975_v63, %v9769_v29  ;;  %v7146_v49 = vmul.f32 0.70710677, %v7124_v18  ;;  %v7149_v58 = vmul.f32 0.70710677, %v7127_v16  ;;  %v2593_v44 = vadd.f32 0.112945676, %v2592_v10 }
 0x2d2   : > { %9768 = vst [vmem:[#allocation36_spill] sm:$0xff] %v7137_v52  ;;  %v2261_v20 = vmul.f32 %v2260_v56, %v7035_v53  ;;  %v2378_v17 = vadd.f32 0.00028619796, %v2377_v48  ;;  %v2630_v45 = vmul.f32 %v2629_v3, %v7091_v35  ;;  %4288 = vmatmul.bf16.gmra.mxu0 %v3987_v55  ;;  %v1669_v40 = vadd.f32 0.001143296, %v1668_v25  ;;  %v9771_v63 = vld [vmem:[#allocation47_spill] sm:$0xff] }
 0x2d3   : > { %9770 = vst [vmem:[#allocation23_spill] sm:$0xff] %v7143_v11  ;;  %v2185_v21 = vmul.f32 %v2184_v30, %v6932_v23  ;;  %v2224_v4 = vadd.f32 0.18741608, %v2223_v33  ;;  %v2300_v31 = vadd.f32 0.0036580483, %v2299_v41  ;;  %v7155_v11 = vmul.f32 %v2106_v61, %v9771_v63  ;;  %v1147_v41 = vpop.f32.mrf.mxu3 }
 0x2d4   : > { %v2340_v29 = vadd.f32 0.0036580483, %v2339_v8  ;;  %v2418_v13 = vadd.f32 0.00028619796, %v2417_v46  ;;  %v2457_v28 = vmul.f32 2.1237322e-06, %v7137_v52  ;;  %v7160_v56 = vmul.f32 %v2146_v57, %v6810_v19 }
 0x2d5   : > { %9772 = vst [vmem:[#allocation27_spill] sm:$0xff] %v7155_v11  ;;  %v2668_v10 = vmul.f32 3.8918573e-05, %v7139_v22  ;;  %v2495_v48 = vmul.f32 %v7146_v49, %v7146_v49  ;;  %v2535_v25 = vmul.f32 %v7149_v58, %v7149_v58  ;;  %v2594_v30 = vmul.f32 %v2593_v44, %v7006_v60 }
 0x2d6   : > { %9773 = vst [vmem:[#allocation43_spill] sm:$0xff] %v7160_v56  ;;  %v2262_v3 = vadd.f32 0.05243302, %v2261_v20  ;;  %v7168_v61 = vmul.f32 0.5, %v7048_v62  ;;  %v2631_v33 = vadd.f32 0.014752088, %v2630_v45  ;;  %v1670_v8 = vmul.f32 %v1669_v40, %v9767_v37 }
 0x2d7   : > { %v2186_v46 = vadd.f32 1.1283791, %v2185_v21  ;;  %v2225_v19 = vmul.f32 %v2224_v4, %v6940_v39  ;;  %v2301_v57 = vmul.f32 %v2300_v31, %v7070_v6  ;;  %v2379_v55 = vmul.f32 %v2378_v17, %v7111_v15 }
 0x2d8   : > { %9774 = vst [vmem:[#allocation47_spill] sm:$0xff] %v7168_v61  ;;  %v2341_v63 = vmul.f32 %v2340_v29, %v7072_v51  ;;  %v2419_v56 = vmul.f32 %v2418_v13, %v7115_v34  ;;  %v2458_v44 = vadd.f32 0.00028619796, %v2457_v28  ;;  %v2669_v20 = vadd.f32 0.001143296, %v2668_v10 }
 0x2d9   : > { %v7176_v23 = vmin.f32 %v2495_v48, 16.0  ;;  %v7178_v62 = vmin.f32 %v2535_v25, 16.0  ;;  %v2595_v45 = vadd.f32 0.4994258, %v2594_v30  ;;  %v7181_v40 = vadd.f32 %v1147_v41, %v9685_v12 }
 0x2da   : > { %v2263_v21 = vmul.f32 %v2262_v3, %v7035_v53  ;;  %v2632_v4 = vmul.f32 %v2631_v33, %v7091_v35  ;;  %v1671_v31 = vadd.f32 0.014752088, %v1670_v8  ;;  %v1828_v17 = vmul.f32 3.8918573e-05, %v6709_v2 }
 0x2db   : > { %9775 = vst [vmem:[#allocation69_spill] sm:$0xff] %v7176_v23  ;;  %v7187_v29 = vmul.f32 %v2186_v46, %v6883_v59  ;;  %v2302_v13 = vadd.f32 0.05243302, %v2301_v57  ;;  %v2380_v28 = vadd.f32 0.0036580483, %v2379_v55  ;;  %v2459_v30 = vmul.f32 %v2458_v44, %v7137_v52 }
 0x2dc   : > { %9776 = vst [vmem:[#allocation70_spill] sm:$0xff] %v7178_v62  ;;  %v2577_v10 = vmul.f32 2.1237322e-06, %v7006_v60  ;;  %v2342_v48 = vadd.f32 0.05243302, %v2341_v63  ;;  %v2670_v41 = vmul.f32 %v2669_v20, %v7139_v22  ;;  %v2596_v8 = vmul.f32 %v2595_v45, %v7006_v60 }
 0x2dd   : > { %9777 = vst [vmem:[#allocation71_spill] sm:$0xff] %v7181_v40  ;;  %v2420_v25 = vadd.f32 0.0036580483, %v2419_v56  ;;  %v2497_v3 = vmul.f32 2.1237322e-06, %v7176_v23  ;;  %v1672_v57 = vmul.f32 %v1671_v31, %v9767_v37  ;;  %v2303_v56 = vmul.f32 %v2302_v13, %v7070_v6 }
 0x2de   : > { %9778 = vst [vmem:[#allocation72_spill] sm:$0xff] %v7187_v29  ;;  %v2537_v33 = vmul.f32 2.1237322e-06, %v7178_v62  ;;  %v7196_v61 = vmul.f32 0.70710677, %v7181_v40  ;;  %v2381_v44 = vmul.f32 %v2380_v28, %v7111_v15  ;;  %v2343_v39 = vmul.f32 %v2342_v48, %v7072_v51 }
 0x2df   : > { %v2226_v59 = vadd.f32 1.1283791, %v2225_v19  ;;  %v2633_v46 = vadd.f32 0.112945676, %v2632_v4  ;;  %v1829_v55 = vadd.f32 0.001143296, %v1828_v17  ;;  %v2421_v29 = vmul.f32 %v2420_v25, %v7115_v34 }
 0x2e0   : > { %v2264_v63 = vadd.f32 0.18741608, %v2263_v21  ;;  %v2578_v20 = vadd.f32 0.00028619796, %v2577_v10  ;;  %v2460_v11 = vadd.f32 0.0036580483, %v2459_v30  ;;  %v2695_v19 = vmul.f32 %v7196_v61, %v7196_v61 }
 0x2e1   : > { %v2671_v45 = vadd.f32 0.014752088, %v2670_v41  ;;  %v2498_v12 = vadd.f32 0.00028619796, %v2497_v3  ;;  %v2538_v40 = vadd.f32 0.00028619796, %v2537_v33  ;;  %v2634_v4 = vmul.f32 %v2633_v46, %v7091_v35 }
 0x2e2   : > { %v7203_v14 = vadd.f32 1.0, %v2596_v8  ;;  %v7208_v21 = vmul.f32 0.5, %v7079_v42  ;;  %v1673_v31 = vadd.f32 0.112945676, %v1672_v57  ;;  %v1830_v17 = vmul.f32 %v1829_v55, %v6709_v2 }
 0x2e3   : > { %v2265_v13 = vmul.f32 %v2264_v63, %v7035_v53  ;;  %v2304_v28 = vadd.f32 0.18741608, %v2303_v56  ;;  %v2382_v10 = vadd.f32 0.05243302, %v2381_v44  ;;  %v2579_v48 = vmul.f32 %v2578_v20, %v7006_v60 }
 0x2e4   : > { %9779 = vst [vmem:[#allocation73_spill] sm:$0xff] %v7208_v21  ;;  %v2344_v25 = vadd.f32 0.18741608, %v2343_v39  ;;  %v2422_v30 = vadd.f32 0.05243302, %v2421_v29  ;;  %v2461_v41 = vmul.f32 %v2460_v11, %v7137_v52  ;;  %v2672_v3 = vmul.f32 %v2671_v45, %v7139_v22 }
 0x2e5   : > { %v2499_v42 = vmul.f32 %v2498_v12, %v7176_v23  ;;  %v2539_v33 = vmul.f32 %v2538_v40, %v7178_v62  ;;  %5183 = vrcp.f32 %v7203_v14  ;;  %v7219_v8 = vmin.f32 %v2695_v19, 16.0 }
 0x2e6   : > { %v2617_v46 = vmul.f32 2.1237322e-06, %v7091_v35  ;;  %v2635_v57 = vadd.f32 0.4994258, %v2634_v4  ;;  %v1674_v55 = vmul.f32 %v1673_v31, %v9767_v37  ;;  %v1831_v63 = vadd.f32 0.014752088, %v1830_v17 }
 0x2e7   : > { %v2266_v39 = vadd.f32 1.1283791, %v2265_v13  ;;  %v2305_v29 = vmul.f32 %v2304_v28, %v7070_v6  ;;  %v2383_v11 = vmul.f32 %v2382_v10, %v7111_v15  ;;  %v2580_v56 = vadd.f32 0.0036580483, %v2579_v48 }
 0x2e8   : > { %v7226_v12 = vmul.f32 %v2226_v59, %v6893_v24  ;;  %v2423_v40 = vmul.f32 %v2422_v30, %v7115_v34  ;;  %v2462_v44 = vadd.f32 0.05243302, %v2461_v41  ;;  %v2673_v20 = vadd.f32 0.112945676, %v2672_v3 }
 0x2e9   : > { %v2345_v45 = vmul.f32 %v2344_v25, %v7072_v51  ;;  %v2500_v19 = vadd.f32 0.0036580483, %v2499_v42  ;;  %v2540_v4 = vadd.f32 0.0036580483, %v2539_v33  ;;  %v2708_v31 = vmul.f32 3.8918573e-05, %v7219_v8 }
 0x2ea   : > { %v2618_v17 = vadd.f32 0.00028619796, %v2617_v46  ;;  %v2636_v13 = vmul.f32 %v2635_v57, %v7091_v35  ;;  %v1675_v28 = vadd.f32 0.4994258, %v1674_v55  ;;  %v1832_v10 = vmul.f32 %v1831_v63, %v6709_v2 }
 0x2eb   : > { %v7233_v48 = vpop.eup %5183  ;;  %v7236_v24 = vmul.f32 %v2266_v39, %v6978_v47  ;;  %v2306_v59 = vadd.f32 1.1283791, %v2305_v29  ;;  %v2384_v30 = vadd.f32 0.18741608, %v2383_v11  ;;  %v2581_v41 = vmul.f32 %v2580_v56, %v7006_v60  ;;  %v1002_v29 = vpop.f32.mrf.mxu0 }
 0x2ec   : > { %v2424_v25 = vadd.f32 0.18741608, %v2423_v40  ;;  %v2463_v3 = vmul.f32 %v2462_v44, %v7137_v52  ;;  %v7241_v42 = vmul.f32 0.5, %v7124_v18  ;;  %v2674_v33 = vmul.f32 %v2673_v20, %v7139_v22 }
 0x2ed   : > { %9780 = vst [vmem:[#allocation74_spill] sm:$0xff] %v7236_v24  ;;  %v2346_v46 = vadd.f32 1.1283791, %v2345_v45  ;;  %v2501_v57 = vmul.f32 %v2500_v19, %v7176_v23  ;;  %v2541_v55 = vmul.f32 %v2540_v4, %v7178_v62  ;;  %v2709_v63 = vadd.f32 0.001143296, %v2708_v31 }
 0x2ee   : > { %9781 = vst [vmem:[#allocation75_spill] sm:$0xff] %v7241_v42  ;;  %v2619_v47 = vmul.f32 %v2618_v17, %v7091_v35  ;;  %v7247_v39 = vadd.f32 1.0, %v2636_v13  ;;  %v1676_v11 = vmul.f32 %v1675_v28, %v9767_v37  ;;  %v1833_v56 = vadd.f32 0.112945676, %v1832_v10 }
 0x2ef   : > { %v7251_v40 = vmul.f32 %v2306_v59, %v6988_v7  ;;  %v2385_v18 = vmul.f32 %v2384_v30, %v7111_v15  ;;  %v2582_v44 = vadd.f32 0.05243302, %v2581_v41  ;;  %v2599_v20 = vmul.f32 %v7233_v48, %v7203_v14  ;;  %v1051_v7 = vpop.f32.mrf.mxu1 }
 0x2f0   : > { %v2425_v45 = vmul.f32 %v2424_v25, %v7115_v34  ;;  %v2464_v19 = vadd.f32 0.18741608, %v2463_v3  ;;  %v2657_v4 = vmul.f32 2.1237322e-06, %v7139_v22  ;;  %v2675_v31 = vadd.f32 0.4994258, %v2674_v33 }
 0x2f1   : > { %9782 = vst [vmem:[#allocation76_spill] sm:$0xff] %v7251_v40  ;;  %v2502_v17 = vadd.f32 0.05243302, %v2501_v57  ;;  %v2542_v13 = vadd.f32 0.05243302, %v2541_v55  ;;  %v2710_v37 = vmul.f32 %v2709_v63, %v7219_v8  ;;  %v7260_v28 = vadd.f32 %v1002_v29, %v5994_v38 }
 0x2f2   : > { %v2620_v10 = vadd.f32 0.0036580483, %v2619_v47  ;;  %5185 = vrcp.f32 %v7247_v39  ;;  %v7263_v59 = vadd.f32 1.0, %v1676_v11  ;;  %v1834_v30 = vmul.f32 %v1833_v56, %v6709_v2 }
 0x2f3   : > { %v7267_v41 = vmul.f32 %v2346_v46, %v7020_v26  ;;  %v2386_v25 = vadd.f32 1.1283791, %v2385_v18  ;;  %v2583_v3 = vmul.f32 %v2582_v44, %v7006_v60  ;;  %v2600_v33 = vsub.f32 1.0, %v2599_v20 }
 0x2f4   : > { %v2426_v57 = vadd.f32 1.1283791, %v2425_v45  ;;  %v2658_v55 = vadd.f32 0.00028619796, %v2657_v4  ;;  %v2676_v63 = vmul.f32 %v2675_v31, %v7139_v22  ;;  %v7272_v29 = vadd.f32 %v1051_v7, %v6001_v9 }
 0x2f5   : > { %9783 = vst [vmem:[#allocation77_spill] sm:$0xff] %v7267_v41  ;;  %v2465_v47 = vmul.f32 %v2464_v19, %v7137_v52  ;;  %v2503_v11 = vmul.f32 %v2502_v17, %v7176_v23  ;;  %v2711_v42 = vadd.f32 0.014752088, %v2710_v37  ;;  %v7277_v56 = vmul.f32 0.70710677, %v7260_v28 }
 0x2f6   : > { %v2543_v26 = vmul.f32 %v2542_v13, %v7178_v62  ;;  %v2621_v46 = vmul.f32 %v2620_v10, %v7091_v35  ;;  %5187 = vrcp.f32 %v7263_v59  ;;  %v1835_v18 = vadd.f32 0.4994258, %v1834_v30 }
 0x2f7   : > { %v7283_v44 = vmul.f32 0.5, %v7127_v16  ;;  %v7286_v20 = vmul.f32 0.5, %v6923_v54  ;;  %v2584_v45 = vadd.f32 0.18741608, %v2583_v3  ;;  %v2601_v19 = vmul.f32 %v7233_v48, %v2600_v33 }
 0x2f8   : > { %v7289_v4 = vpop.eup %5185  ;;  %v7292_v31 = vmul.f32 %v2386_v25, %v7064_v27  ;;  %v2659_v17 = vmul.f32 %v2658_v55, %v7139_v22  ;;  %v7295_v13 = vadd.f32 1.0, %v2676_v63  ;;  %v7298_v37 = vmul.f32 0.70710677, %v7272_v29 }
 0x2f9   : > { %9784 = vst [vmem:[#allocation78_spill] sm:$0xff] %v7283_v44  ;;  %v7301_v16 = vmul.f32 %v2426_v57, %v7075_v43  ;;  %v2466_v54 = vadd.f32 1.1283791, %v2465_v47  ;;  %v2712_v7 = vmul.f32 %v2711_v42, %v7219_v8  ;;  %v2735_v10 = vmul.f32 %v7277_v56, %v7277_v56 }
 0x2fa   : > { %9785 = vst [vmem:[#allocation79_spill] sm:$0xff] %v7292_v31  ;;  %v2504_v30 = vadd.f32 0.18741608, %v2503_v11  ;;  %v2544_v3 = vadd.f32 0.18741608, %v2543_v26  ;;  %v1836_v25 = vmul.f32 %v1835_v18, %v6709_v2  ;;  %v2585_v33 = vmul.f32 %v2584_v45, %v7006_v60 }
 0x2fb   : > { %9786 = vst [vmem:[#allocation80_spill] sm:$0xff] %v7301_v16  ;;  %v2622_v27 = vadd.f32 0.05243302, %v2621_v46  ;;  %v2602_v55 = vadd.f32 %v7233_v48, %v2601_v19  ;;  %vm2604_vm9 = vweird.f32 %v7233_v48  ;;  %v2639_v43 = vmul.f32 %v7289_v4, %v7247_v39 }
 0x2fc   : > { %v7312_v57 = vpop.eup %5187  ;;  %v2660_v42 = vadd.f32 0.0036580483, %v2659_v17  ;;  %5189 = vrcp.f32 %v7295_v13  ;;  %v2697_v63 = vmul.f32 2.1237322e-06, %v7219_v8  ;;  %v2775_v47 = vmul.f32 %v7298_v37, %v7298_v37 }
 0x2fd   : > { %vm2603_vm10 = vweird.f32 %v7203_v14  ;;  %v2609_v2 = vand.u32 2147483648, %v7203_v14  ;;  %v2713_v60 = vadd.f32 0.112945676, %v2712_v7  ;;  %v7320_v11 = vmin.f32 %v2735_v10, 16.0 }
 0x2fe   : > { %v2505_v26 = vmul.f32 %v2504_v30, %v7176_v23  ;;  %vm7323_vm11 = vmor %vm2603_vm10, %vm2604_vm9  ;;  %v2607_v18 = vand.u32 2147483647, %v7203_v14  ;;  %v2623_v45 = vmul.f32 %v2622_v27, %v7091_v35  ;;  %v7329_v19 = vadd.f32 1.0, %v1836_v25 }
 0x2ff   : > { %v7332_v17 = vmul.f32 %v2466_v54, %v7099_v0  ;;  %v2586_v44 = vadd.f32 1.1283791, %v2585_v33  ;;  %v2606_v7 = vsel %vm7323_vm11, %v7233_v48, %v2602_v55  ;;  %v1679_v10 = vmul.f32 %v7312_v57, %v7263_v59 }
 0x300   : > { %v2640_v30 = vsub.f32 1.0, %v2639_v43  ;;  %v2661_v31 = vmul.f32 %v2660_v42, %v7139_v22  ;;  %v2698_v41 = vadd.f32 0.00028619796, %v2697_v63  ;;  %v7340_v14 = vmin.f32 %v2775_v47, 16.0 }
 0x301   : > { %9789 = vst [vmem:[#allocation81_spill] sm:$0xff] %v7332_v17  ;;  %v2545_v27 = vmul.f32 %v2544_v3, %v7178_v62  ;;  %v2610_v25 = vor.u32 1.1754944e-38, %v2609_v2  ;;  %v2714_v0 = vmul.f32 %v2713_v60, %v7219_v8  ;;  %v2748_v54 = vmul.f32 3.8918573e-05, %v7320_v11 }
 0x302   : > { %v7345_v33 = vpop.eup %5189  ;;  %v7347_v46 = vadd.f32 1.1283791, %v2505_v26  ;;  %vm2608_vm12 = vcmp.eq.f32.partialorder %v2607_v18, 8.507059e+37  ;;  %v2624_v48 = vadd.f32 0.18741608, %v2623_v45  ;;  %5191 = vrcp.f32 %v7329_v19 }
 0x303   : > { %v2587_v55 = vmul.f32 %v2586_v44, %v6951_v32  ;;  %v2611_v43 = vsel %vm2608_vm12, %v2610_v25, %v2606_v7  ;;  %v7352_v42 = vmul.f32 0.5, %v7010_v5  ;;  %v1680_v3 = vsub.f32 1.0, %v1679_v10 }
 0x304   : > { %v2641_v63 = vmul.f32 %v7289_v4, %v2640_v30  ;;  %v2662_v47 = vadd.f32 0.05243302, %v2661_v31  ;;  %v2699_v2 = vmul.f32 %v2698_v41, %v7219_v8  ;;  %v2788_v60 = vmul.f32 3.8918573e-05, %v7340_v14 }
 0x305   : > { %v7357_v26 = vadd.f32 1.1283791, %v2545_v27  ;;  %v2679_v18 = vmul.f32 %v7345_v33, %v7295_v13  ;;  %v2715_v45 = vadd.f32 0.4994258, %v2714_v0  ;;  %v2749_v21 = vadd.f32 0.001143296, %v2748_v54 }
 0x306   : > { %v7361_v32 = vmul.f32 %v2611_v43, %v2587_v55  ;;  %v2625_v5 = vmul.f32 %v2624_v48, %v7091_v35  ;;  %v2737_v44 = vmul.f32 2.1237322e-06, %v7320_v11  ;;  %vm1683_vm13 = vweird.f32 %v7263_v59 }
 0x307   : > { %vm2644_vm14 = vweird.f32 %v7289_v4  ;;  %v2649_v41 = vand.u32 2147483648, %v7247_v39  ;;  %v1681_v31 = vmul.f32 %v7312_v57, %v1680_v3  ;;  %v1687_v7 = vand.u32 2147483647, %v7263_v59 }
 0x308   : > { %v7370_v10 = vpop.eup %5191  ;;  %v2642_v30 = vadd.f32 %v7289_v4, %v2641_v63  ;;  %v2663_v27 = vmul.f32 %v2662_v47, %v7139_v22  ;;  %v2700_v25 = vadd.f32 0.0036580483, %v2699_v2  ;;  %v2789_v35 = vadd.f32 0.001143296, %v2788_v60 }
 0x309   : > { %v2680_v0 = vsub.f32 1.0, %v2679_v18  ;;  %v2716_v54 = vmul.f32 %v2715_v45, %v7219_v8  ;;  %v2750_v48 = vmul.f32 %v2749_v21, %v7320_v11  ;;  %v2777_v55 = vmul.f32 2.1237322e-06, %v7340_v14 }
 0x30a   : > { %vm2643_vm15 = vweird.f32 %v7247_v39  ;;  %v2647_v43 = vand.u32 2147483647, %v7247_v39  ;;  %v2738_v3 = vadd.f32 0.00028619796, %v2737_v44  ;;  %v1689_v17 = vand.u32 2147483648, %v7263_v59 }
 0x30b   : > { %vm7382_vm0 = vmor %vm2643_vm15, %vm2644_vm14  ;;  %v2650_v47 = vor.u32 1.1754944e-38, %v2649_v41  ;;  %v1682_v2 = vadd.f32 %v7312_v57, %v1681_v31  ;;  %vm1684_vm1 = vweird.f32 %v7312_v57  ;;  %v1839_v21 = vmul.f32 %v7370_v10, %v7329_v19 }
 0x30c   : > { %v2646_v39 = vsel %vm7382_vm0, %v7289_v4, %v2642_v30  ;;  %v2664_v60 = vadd.f32 0.18741608, %v2663_v27  ;;  %v2701_v18 = vmul.f32 %v2700_v25, %v7219_v8  ;;  %v2790_v45 = vmul.f32 %v2789_v35, %v7340_v14  ;;  %vm7402_vm3 = vmor %vm1683_vm13, %vm1684_vm1 }
 0x30d   : > { %v2681_v44 = vmul.f32 %v7345_v33, %v2680_v0  ;;  %v7396_v16 = vadd.f32 1.0, %v2716_v54  ;;  %v2751_v41 = vadd.f32 0.014752088, %v2750_v48  ;;  %v2778_v31 = vadd.f32 0.00028619796, %v2777_v55 }
 0x30e   : > { %v4802_v40 = vclamps-f32 %v7361_v32, 1.0  ;;  %v2626_v62 = vadd.f32 1.1283791, %v2625_v5  ;;  %vm2648_vm2 = vcmp.eq.f32.partialorder %v2647_v43, 8.507059e+37  ;;  %v2739_v24 = vmul.f32 %v2738_v3, %v7320_v11  ;;  %v1100_v43 = vpop.f32.mrf.mxu2 }
 0x30f   : > { %v2651_v30 = vsel %vm2648_vm2, %v2650_v47, %v2646_v39  ;;  %v1686_v27 = vsel %vm7402_vm3, %v7312_v57, %v1682_v2  ;;  %v1690_v25 = vor.u32 1.1754944e-38, %v1689_v17  ;;  %v1840_v35 = vsub.f32 1.0, %v1839_v21 }
 0x310   : > { %v2665_v0 = vmul.f32 %v2664_v60, %v7139_v22  ;;  %vm2684_vm4 = vweird.f32 %v7345_v33  ;;  %v2702_v32 = vadd.f32 0.05243302, %v2701_v18  ;;  %v2791_v5 = vadd.f32 0.014752088, %v2790_v45 }
 0x311   : > { %v2682_v54 = vadd.f32 %v7345_v33, %v2681_v44  ;;  %5193 = vrcp.f32 %v7396_v16  ;;  %v2752_v59 = vmul.f32 %v2751_v41, %v7320_v11  ;;  %v2779_v48 = vmul.f32 %v2778_v31, %v7340_v14 }
 0x312   : > { %v2627_v55 = vmul.f32 %v2626_v62, %v7042_v50  ;;  %v2689_v57 = vand.u32 2147483648, %v7295_v13  ;;  %v2740_v17 = vadd.f32 0.0036580483, %v2739_v24  ;;  %vm1688_vm5 = vcmp.eq.f32.partialorder %v1687_v7, 8.507059e+37 }
 0x313   : > { %vm2683_vm6 = vweird.f32 %v7295_v13  ;;  %v2687_v22 = vand.u32 2147483647, %v7295_v13  ;;  %v1691_v3 = vsel %vm1688_vm5, %v1690_v25, %v1686_v27  ;;  %v1841_v63 = vmul.f32 %v7370_v10, %v1840_v35 }
 0x314   : > { %v2652_v47 = vmul.f32 %v2651_v30, %v2627_v55  ;;  %v2666_v2 = vadd.f32 1.1283791, %v2665_v0  ;;  %vm7422_vm7 = vmor %vm2683_vm6, %vm2684_vm4  ;;  %v2703_v50 = vmul.f32 %v2702_v32, %v7219_v8  ;;  %v2792_v62 = vmul.f32 %v2791_v5, %v7340_v14 }
 0x315   : > { %v2686_v24 = vsel %vm7422_vm7, %v7345_v33, %v2682_v54  ;;  %v2753_v13 = vadd.f32 0.112945676, %v2752_v59  ;;  %v2780_v7 = vadd.f32 0.0036580483, %v2779_v48  ;;  %v7432_v39 = vadd.f32 %v1100_v43, %v9684_v36 }
 0x316   : > { %v2690_v60 = vor.u32 1.1754944e-38, %v2689_v57  ;;  %v2741_v18 = vmul.f32 %v2740_v17, %v7320_v11  ;;  %vm1843_vm8 = vweird.f32 %v7329_v19  ;;  %v1847_v45 = vand.u32 2147483647, %v7329_v19  ;;  %v9800_v17 = vld [vmem:[#allocation50_spill] sm:$0xff] }
 0x317   : > { %v7437_v44 = vpop.eup %5193  ;;  %vm2688_vm9 = vcmp.eq.f32.partialorder %v2687_v22, 8.507059e+37  ;;  %v1842_v41 = vadd.f32 %v7370_v10, %v1841_v63  ;;  %vm1844_vm10 = vweird.f32 %v7370_v10  ;;  %v1849_v33 = vand.u32 2147483648, %v7329_v19 }
 0x318   : > { %v4803_v31 = vclamps-f32 %v2652_v47, 1.0  ;;  %v2691_v4 = vsel %vm2688_vm9, %v2690_v60, %v2686_v24  ;;  %v2704_v30 = vadd.f32 0.18741608, %v2703_v50  ;;  %v2793_v27 = vadd.f32 0.112945676, %v2792_v62  ;;  %vm7460_vm11 = vmor %vm1843_vm8, %vm1844_vm10 }
 0x319   : > { %v2667_v25 = vmul.f32 %v2666_v2, %v7102_v1  ;;  %v2754_v35 = vmul.f32 %v2753_v13, %v7320_v11  ;;  %v2781_v0 = vmul.f32 %v2780_v7, %v7340_v14  ;;  %v7446_v32 = vmul.f32 0.70710677, %v7432_v39  ;;  %v1149_v13 = vpop.f32.mrf.mxu3 }
 0x31a   : > { %v7450_v5 = vmul.f32 %v7347_v46, %v7146_v49  ;;  %v7454_v54 = vmul.f32 %v7357_v26, %v7149_v58  ;;  %v2719_v59 = vmul.f32 %v7437_v44, %v7396_v16  ;;  %v2742_v48 = vadd.f32 0.05243302, %v2741_v18 }
 0x31b   : > { %v3887_v55 = vadd.f32 1.0, %v4802_v40  ;;  %v2692_v57 = vmul.f32 %v2691_v4, %v2667_v25  ;;  %v1692_v43 = vmul.f32 %v1691_v3, %v9800_v17  ;;  %v1846_v49 = vsel %vm7460_vm11, %v7370_v10, %v1842_v41  ;;  %v9801_v40 = vld [vmem:[#allocation22_spill] sm:$0xff] }
 0x31c   : > { %9796 = vst [vmem:[#allocation82_spill] sm:$0xff] %v7450_v5  ;;  %v3888_v58 = vadd.f32 1.0, %v4803_v31  ;;  %v2705_v46 = vmul.f32 %v2704_v30, %v7219_v8  ;;  %v2794_v26 = vmul.f32 %v2793_v27, %v7340_v14  ;;  %v1850_v22 = vor.u32 1.1754944e-38, %v1849_v33  ;;  %v9803_v8 = vld [vmem:[#allocation71_spill] sm:$0xff]  ;;  %v1005_v33 = vpop.f32.mrf.mxu0  ;;  %v1054_v31 = vpop.f32.mrf.mxu1  ;;  %v9805_v27 = vld [vmem:[#allocation60_spill] sm:$0xff] }
 0x31d   : > { %9797 = vst [vmem:[#allocation83_spill] sm:$0xff] %v7454_v54  ;;  %v2755_v63 = vadd.f32 0.4994258, %v2754_v35  ;;  %v2782_v19 = vadd.f32 0.05243302, %v2781_v0  ;;  %v2815_v47 = vmul.f32 %v7446_v32, %v7446_v32  ;;  %vm1848_vm12 = vcmp.eq.f32.partialorder %v1847_v45, 8.507059e+37 }
 0x31e   : > { %v1201_v2 = vmul.f32 0.5, %v9801_v40  ;;  %v2720_v21 = vsub.f32 1.0, %v2719_v59  ;;  %v2743_v3 = vmul.f32 %v2742_v48, %v7320_v11  ;;  %v1851_v50 = vsel %vm1848_vm12, %v1850_v22, %v1846_v49  ;;  %v9806_v59 = vld [vmem:[#allocation21_spill] sm:$0xff] }
 0x31f   : > { %v7475_v10 = vmul.f32 %v3887_v55, %v7286_v20  ;;  %v4804_v62 = vclamps-f32 %v2692_v57, 1.0  ;;  %v7478_v24 = vmul.f32 0.5, %v9803_v8  ;;  %v4779_v7 = vclamps-f32 %v1692_v43, 1.0 }
 0x320   : > { %v7481_v60 = vmul.f32 %v3888_v58, %v7352_v42  ;;  %v2706_v18 = vadd.f32 1.1283791, %v2705_v46  ;;  %v7484_v45 = vmul.f32 0.5, %v7260_v28  ;;  %v2795_v41 = vadd.f32 0.4994258, %v2794_v26 }
 0x321   : > { %9802 = vst [vmem:[#allocation50_spill] sm:$0xff] %v7475_v10  ;;  %v2756_v4 = vmul.f32 %v2755_v63, %v7320_v11  ;;  %v2783_v20 = vmul.f32 %v2782_v19, %v7340_v14  ;;  %v7488_v30 = vmin.f32 %v2815_v47, 16.0  ;;  %v1852_v25 = vmul.f32 %v1851_v50, %v9805_v27 }
 0x322   : > { %9804 = vst [vmem:[#allocation22_spill] sm:$0xff] %v7481_v60  ;;  %v2721_v35 = vmul.f32 %v7437_v44, %v2720_v21  ;;  %v2744_v0 = vadd.f32 0.18741608, %v2743_v3  ;;  %v7493_v42 = vmul.f32 0.5, %v7272_v29  ;;  %v1150_v28 = vadd.f32 %v1149_v13, %v9806_v59 }
 0x323   : > { %v3889_v48 = vadd.f32 1.0, %v4804_v62  ;;  %v2727_v1 = vand.u32 2147483647, %v7396_v16  ;;  %v1006_v55 = vadd.f32 %v1005_v33, %v5994_v38  ;;  %v7499_v57 = vadd.f32 %v1054_v31, %v6001_v9  ;;  %v1103_v31 = vpop.f32.mrf.mxu2 }
 0x324   : > { %v2707_v17 = vmul.f32 %v2706_v18, %v7196_v61  ;;  %v2729_v43 = vand.u32 2147483648, %v7396_v16  ;;  %v2796_v49 = vmul.f32 %v2795_v41, %v7340_v14  ;;  %v7505_v58 = vmul.f32 0.5, %v7432_v39  ;;  %v9818_v39 = vld [vmem:[#allocation42_spill] sm:$0xff] }
 0x325   : > { %v7507_v29 = vadd.f32 1.0, %v2756_v4  ;;  %v2784_v46 = vadd.f32 0.18741608, %v2783_v20  ;;  %v2817_v26 = vmul.f32 2.1237322e-06, %v7488_v30  ;;  %v4783_v22 = vclamps-f32 %v1852_v25, 1.0 }
 0x326   : > { %v2722_v63 = vadd.f32 %v7437_v44, %v2721_v35  ;;  %vm2724_vm13 = vweird.f32 %v7437_v44  ;;  %v2745_v19 = vmul.f32 %v2744_v0, %v7320_v11  ;;  %v2828_v61 = vmul.f32 3.8918573e-05, %v7488_v30  ;;  %v9812_v20 = vld [vmem:[#allocation38_spill] sm:$0xff]  ;;  %v9813_v25 = vld [vmem:[#allocation31_spill] sm:$0xff] }
 0x327   : > { %v7514_v47 = vmul.f32 %v3889_v48, %v1201_v2  ;;  %vm2723_vm14 = vweird.f32 %v7396_v16  ;;  %vm7517_vm15 = vcmp.eq.f32.partialorder %v2727_v1, 8.507059e+37  ;;  %v7521_v40 = vmul.f32 0.70710677, %v1150_v28 }
 0x328   : > { %v2730_v21 = vor.u32 1.1754944e-38, %v2729_v43  ;;  %v7523_v3 = vadd.f32 1.0, %v2796_v49  ;;  %v7525_v50 = vmul.f32 0.5, %v1150_v28  ;;  %v3864_v62 = vadd.f32 1.0, %v4779_v7  ;;  %vm7527_vm0 = vmor %vm2723_vm14, %vm2724_vm13  ;;  %v9815_v28 = vld [vmem:[#allocation40_spill] sm:$0xff] }
 0x329   : > { %9807 = vst [vmem:[#allocation71_spill] sm:$0xff] %v7514_v47  ;;  %5195 = vrcp.f32 %v7507_v29  ;;  %v2785_v16 = vmul.f32 %v2784_v46, %v7340_v14  ;;  %v2818_v2 = vadd.f32 0.00028619796, %v2817_v26  ;;  %v3868_v8 = vadd.f32 1.0, %v4783_v22 }
 0x32a   : > { %v2726_v13 = vsel %vm7527_vm0, %v7437_v44, %v2722_v63  ;;  %v2746_v18 = vadd.f32 1.1283791, %v2745_v19  ;;  %v2829_v41 = vadd.f32 0.001143296, %v2828_v61  ;;  %v7536_v33 = vmul.f32 0.5, %v1006_v55  ;;  %v9814_v44 = vld [vmem:[#allocation29_spill] sm:$0xff] }
 0x32b   : > { %v2769_v7 = vand.u32 2147483648, %v7507_v29  ;;  %v2855_v4 = vmul.f32 %v7521_v40, %v7521_v40  ;;  %v3932_v27 = vmul.f32 %v3868_v8, %v9812_v20  ;;  %v1708_v14 = vmul.f32 3.8918573e-05, %v9813_v25  ;;  %v9816_v8 = vld [vmem:[#allocation32_spill] sm:$0xff]  ;;  %v9817_v20 = vld [vmem:[#allocation41_spill] sm:$0xff] }
 0x32c   : > { %5197 = vrcp.f32 %v7523_v3  ;;  %v7545_v35 = vmul.f32 0.5, %v7499_v57  ;;  %v3928_v0 = vmul.f32 %v3864_v62, %v9814_v44  ;;  %v1868_v48 = vmul.f32 3.8918573e-05, %v9815_v28 }
 0x32d   : > { %v2731_v1 = vsel %vm7517_vm15, %v2730_v21, %v2726_v13  ;;  %v2786_v43 = vadd.f32 1.1283791, %v2785_v16  ;;  %v2819_v49 = vmul.f32 %v2818_v2, %v7488_v30  ;;  %v7553_v46 = vadd.f32 %v1103_v31, %v9684_v36 }
 0x32e   : > { %v7556_v26 = vmul.f32 %v2746_v18, %v7277_v56  ;;  %v2767_v22 = vand.u32 2147483647, %v7507_v29  ;;  %v2830_v63 = vmul.f32 %v2829_v41, %v7488_v30  ;;  %v3988_v19 = vpack.c.bf16 %v3932_v27, %v3928_v0 }
 0x32f   : > { %v7560_v61 = vpop.eup %5195  ;;  %v7562_v62 = vor.u32 1.1754944e-38, %v2769_v7  ;;  %v7565_v21 = vmin.f32 %v2855_v4, 16.0  ;;  %v1709_v11 = vadd.f32 0.001143296, %v1708_v14  ;;  %v2732_v16 = vmul.f32 %v2731_v1, %v2707_v17 }
 0x330   : > { %v2809_v2 = vand.u32 2147483648, %v7523_v3  ;;  %4337 = vmatmul.bf16.gmra.mxu1 %v3988_v19  ;;  %v1869_v56 = vadd.f32 0.001143296, %v1868_v48  ;;  %v1748_v13 = vmul.f32 3.8918573e-05, %v9816_v8  ;;  %v2759_v4 = vmul.f32 %v7560_v61, %v7507_v29 }
 0x331   : > { %v2820_v18 = vadd.f32 0.0036580483, %v2819_v49  ;;  %v7569_v31 = vmul.f32 0.70710677, %v1006_v55  ;;  %v1710_v41 = vmul.f32 %v1709_v11, %v9813_v25  ;;  %v1908_v7 = vmul.f32 3.8918573e-05, %v9817_v20 }
 0x332   : > { %v7573_v27 = vpop.eup %5197  ;;  %v2831_v14 = vadd.f32 0.014752088, %v2830_v63  ;;  %v1870_v17 = vmul.f32 %v1869_v56, %v9815_v28  ;;  %v1749_v44 = vadd.f32 0.001143296, %v1748_v13  ;;  %v7579_v0 = vmul.f32 %v2786_v43, %v7298_v37 }
 0x333   : > { %v2857_v48 = vmul.f32 2.1237322e-06, %v7565_v21  ;;  %v1711_v55 = vadd.f32 0.014752088, %v1710_v41  ;;  %v1909_v1 = vadd.f32 0.001143296, %v1908_v7  ;;  %v2799_v63 = vmul.f32 %v7573_v27, %v7523_v3 }
 0x334   : > { %v4805_v49 = vclamps-f32 %v2732_v16, 1.0  ;;  %v7582_v19 = vor.u32 1.1754944e-38, %v2809_v2  ;;  %v2868_v11 = vmul.f32 3.8918573e-05, %v7565_v21  ;;  %v1948_v47 = vmul.f32 3.8918573e-05, %v9818_v39 }
 0x335   : > { %v2821_v56 = vmul.f32 %v2820_v18, %v7488_v30  ;;  %v2895_v37 = vmul.f32 %v7569_v31, %v7569_v31  ;;  %v1712_v43 = vmul.f32 %v1711_v55, %v9813_v25  ;;  %v2760_v13 = vsub.f32 1.0, %v2759_v4 }
 0x336   : > { %vm2764_vm1 = vweird.f32 %v7560_v61  ;;  %v1871_v16 = vadd.f32 0.014752088, %v1870_v17  ;;  %v1750_v2 = vmul.f32 %v1749_v44, %v9816_v8  ;;  %v2832_v41 = vmul.f32 %v2831_v14, %v7488_v30 }
 0x337   : > { %v2858_v7 = vadd.f32 0.00028619796, %v2857_v48  ;;  %v1713_v54 = vadd.f32 0.112945676, %v1712_v43  ;;  %v1910_v5 = vmul.f32 %v1909_v1, %v9817_v20  ;;  %v3890_v60 = vadd.f32 1.0, %v4805_v49 }
 0x338   : > { %vm2763_vm2 = vweird.f32 %v7507_v29  ;;  %v1872_v18 = vmul.f32 %v1871_v16, %v9815_v28  ;;  %v1751_v10 = vadd.f32 0.014752088, %v1750_v2  ;;  %v1949_v15 = vadd.f32 0.001143296, %v1948_v47  ;;  %v9826_v29 = vld [vmem:[#allocation49_spill] sm:$0xff] }
 0x339   : > { %v2800_v55 = vsub.f32 1.0, %v2799_v63  ;;  %v2822_v4 = vadd.f32 0.05243302, %v2821_v56  ;;  %v1714_v23 = vmul.f32 %v1713_v54, %v9813_v25  ;;  %v1911_v17 = vadd.f32 0.014752088, %v1910_v5  ;;  %vm7634_vm7 = vmor %vm2763_vm2, %vm2764_vm1 }
 0x33a   : > { %v2761_v44 = vmul.f32 %v7560_v61, %v2760_v13  ;;  %v1873_v52 = vadd.f32 0.112945676, %v1872_v18  ;;  %v1752_v14 = vmul.f32 %v1751_v10, %v9816_v8  ;;  %v1950_v48 = vmul.f32 %v1949_v15, %v9818_v39 }
 0x33b   : > { %vm2803_vm3 = vweird.f32 %v7523_v3  ;;  %vm2804_vm4 = vweird.f32 %v7573_v27  ;;  %v2833_v1 = vadd.f32 0.112945676, %v2832_v41  ;;  %v2869_v49 = vadd.f32 0.001143296, %v2868_v11 }
 0x33c   : > { %v1715_v43 = vadd.f32 0.4994258, %v1714_v23  ;;  %vm7604_vm5 = vcmp.eq.f32.partialorder %v2767_v22, 8.507059e+37  ;;  %v2859_v5 = vmul.f32 %v2858_v7, %v7565_v21  ;;  %v7609_v54 = vmin.f32 %v2895_v37, 16.0  ;;  %vm7654_vm8 = vmor %vm2803_vm3, %vm2804_vm4 }
 0x33d   : > { %v1874_v63 = vmul.f32 %v1873_v52, %v9815_v28  ;;  %v1753_v10 = vadd.f32 0.112945676, %v1752_v14  ;;  %v2801_v15 = vmul.f32 %v7573_v27, %v2800_v55  ;;  %v2823_v56 = vmul.f32 %v2822_v4, %v7488_v30 }
 0x33e   : > { %v1716_v13 = vmul.f32 %v1715_v43, %v9813_v25  ;;  %v1912_v11 = vmul.f32 %v1911_v17, %v9817_v20  ;;  %v2762_v23 = vadd.f32 %v7560_v61, %v2761_v44  ;;  %v1951_v2 = vadd.f32 0.014752088, %v1950_v48 }
 0x33f   : > { %v1875_v22 = vadd.f32 0.4994258, %v1874_v63  ;;  %v1754_v16 = vmul.f32 %v1753_v10, %v9816_v8  ;;  %v9821_v37 = vand.u32 2147483647, %v7523_v3  ;;  %v2834_v52 = vmul.f32 %v2833_v1, %v7488_v30 }
 0x340   : > { %v2870_v7 = vmul.f32 %v2869_v49, %v7565_v21  ;;  %v7626_v18 = vadd.f32 1.0, %v1716_v13  ;;  %v1913_v25 = vadd.f32 0.112945676, %v1912_v11  ;;  %v2860_v55 = vadd.f32 0.0036580483, %v2859_v5 }
 0x341   : > { %vm7620_vm6 = vcmp.eq.f32.partialorder %v9821_v37, 8.507059e+37  ;;  %v1876_v4 = vmul.f32 %v1875_v22, %v9815_v28  ;;  %v1755_v17 = vadd.f32 0.4994258, %v1754_v16  ;;  %v1952_v44 = vmul.f32 %v1951_v2, %v9818_v39 }
 0x342   : > { %v2802_v48 = vadd.f32 %v7573_v27, %v2801_v15  ;;  %v2824_v1 = vadd.f32 0.18741608, %v2823_v56  ;;  %v2897_v49 = vmul.f32 2.1237322e-06, %v7609_v54  ;;  %5199 = vrcp.f32 %v7626_v18 }
 0x343   : > { %v2766_v28 = vsel %vm7634_vm7, %v7560_v61, %v2762_v23  ;;  %v7644_v43 = vadd.f32 1.0, %v1876_v4  ;;  %v1756_v5 = vmul.f32 %v1755_v17, %v9816_v8  ;;  %v2108_v63 = vmul.f32 3.8918573e-05, %v9826_v29 }
 0x344   : > { %v2871_v10 = vadd.f32 0.014752088, %v2870_v7  ;;  %v2908_v13 = vmul.f32 3.8918573e-05, %v7609_v54  ;;  %v1914_v15 = vmul.f32 %v1913_v25, %v9817_v20  ;;  %v1953_v56 = vadd.f32 0.112945676, %v1952_v44 }
 0x345   : > { %v2835_v61 = vadd.f32 0.4994258, %v2834_v52  ;;  %v7659_v23 = vmul.f32 0.70710677, %v7499_v57  ;;  %v7662_v8 = vmul.f32 0.5, %v7553_v46  ;;  %5201 = vrcp.f32 %v7644_v43 }
 0x346   : > { %v7666_v22 = vmul.f32 %v3890_v60, %v7478_v24  ;;  %v2771_v3 = vsel %vm7604_vm5, %v7562_v62, %v2766_v28  ;;  %v2806_v16 = vsel %vm7654_vm8, %v7573_v27, %v2802_v48  ;;  %v2861_v2 = vmul.f32 %v2860_v55, %v7565_v21 }
 0x347   : > { %v7675_v57 = vadd.f32 1.0, %v1756_v5  ;;  %v1915_v37 = vadd.f32 0.4994258, %v1914_v15  ;;  %v1954_v52 = vmul.f32 %v1953_v56, %v9818_v39  ;;  %v2109_v7 = vadd.f32 0.001143296, %v2108_v63  ;;  %v9833_v15 = vld [vmem:[#allocation63_spill] sm:$0xff] }
 0x348   : > { %9829 = vst [vmem:[#allocation60_spill] sm:$0xff] %v7666_v22  ;;  %v5200_v25 = vpop.eup %5199  ;;  %v2825_v24 = vmul.f32 %v2824_v1, %v7488_v30  ;;  %v2872_v60 = vmul.f32 %v2871_v10, %v7565_v21  ;;  %v7680_v4 = vadd.f32 0.00028619796, %v2897_v49  ;;  %v7682_v62 = vadd.f32 0.001143296, %v2908_v13 }
 0x349   : > { %v2811_v27 = vsel %vm7620_vm6, %v7582_v19, %v2806_v16  ;;  %v2836_v47 = vmul.f32 %v2835_v61, %v7488_v30  ;;  %v1719_v55 = vmul.f32 %v5200_v25, %v7626_v18  ;;  %5203 = vrcp.f32 %v7675_v57 }
 0x34a   : > { %v7691_v17 = vmul.f32 %v2771_v3, %v7556_v26  ;;  %v2862_v44 = vadd.f32 0.05243302, %v2861_v2  ;;  %v1727_v14 = vand.u32 2147483647, %v7626_v18  ;;  %v1916_v48 = vmul.f32 %v1915_v37, %v9817_v20 }
 0x34b   : > { %v5202_v1 = vpop.eup %5201  ;;  %v1720_v49 = vsub.f32 1.0, %v1719_v55  ;;  %v1729_v28 = vand.u32 2147483648, %v7626_v18  ;;  %v1955_v41 = vadd.f32 0.4994258, %v1954_v52  ;;  %v2110_v19 = vmul.f32 %v2109_v7, %v9826_v29 }
 0x34c   : > { %v7698_v30 = vmul.f32 %v2811_v27, %v7579_v0  ;;  %v7700_v5 = vadd.f32 1.1283791, %v2825_v24  ;;  %v7702_v63 = vadd.f32 0.112945676, %v2872_v60  ;;  %v1879_v26 = vmul.f32 %v5202_v1, %v7644_v43 }
 0x34d   : > { %v1721_v10 = vmul.f32 %v5200_v25, %v1720_v49  ;;  %vm1724_vm9 = vweird.f32 %v5200_v25  ;;  %v1889_v20 = vand.u32 2147483648, %v7644_v43  ;;  %v7706_v13 = vadd.f32 1.0, %v1916_v48 }
 0x34e   : > { %vm1723_vm10 = vweird.f32 %v7626_v18  ;;  %vm7709_vm11 = vcmp.eq.f32.partialorder %v1727_v14, 8.507059e+37  ;;  %v1880_v0 = vsub.f32 1.0, %v1879_v26  ;;  %v1956_v56 = vmul.f32 %v1955_v41, %v9818_v39  ;;  %v9832_v14 = vld [vmem:[#allocation54_spill] sm:$0xff] }
 0x34f   : > { %v5204_v11 = vpop.eup %5203  ;;  %v1722_v61 = vadd.f32 %v5200_v25, %v1721_v10  ;;  %v1730_v3 = vor.u32 1.1754944e-38, %v1729_v28  ;;  %5205 = vrcp.f32 %v7706_v13  ;;  %v2111_v16 = vadd.f32 0.014752088, %v2110_v19  ;;  %vm1725_vm12 = vmor %vm1723_vm10, %vm1724_vm9 }
 0x350   : > { %v1881_v2 = vmul.f32 %v5202_v1, %v1880_v0  ;;  %vm1884_vm13 = vweird.f32 %v5202_v1  ;;  %v1887_v37 = vand.u32 2147483647, %v7644_v43  ;;  %v1759_v18 = vmul.f32 %v5204_v11, %v7675_v57 }
 0x351   : > { %v1726_v52 = vsel %vm1725_vm12, %v5200_v25, %v1722_v61  ;;  %vm1883_vm14 = vweird.f32 %v7644_v43  ;;  %v1890_v7 = vor.u32 1.1754944e-38, %v1889_v20  ;;  %v7718_v24 = vadd.f32 1.0, %v1956_v56 }
 0x352   : > { %v1731_v39 = vsel %vm7709_vm11, %v1730_v3, %v1726_v52  ;;  %v1882_v60 = vadd.f32 %v5202_v1, %v1881_v2  ;;  %v1760_v27 = vsub.f32 1.0, %v1759_v18  ;;  %v1767_v55 = vand.u32 2147483647, %v7675_v57  ;;  %vm1885_vm15 = vmor %vm1883_vm14, %vm1884_vm13 }
 0x353   : > { %v1732_v48 = vmul.f32 %v1731_v39, %v9832_v14  ;;  %v1769_v49 = vand.u32 2147483648, %v7675_v57  ;;  %5207 = vrcp.f32 %v7718_v24  ;;  %v2112_v25 = vmul.f32 %v2111_v16, %v9826_v29  ;;  %v9834_v16 = vld [vmem:[#allocation44_spill] sm:$0xff] }
 0x354   : > { %v1886_v43 = vsel %vm1885_vm15, %v5202_v1, %v1882_v60  ;;  %vm1888_vm0 = vcmp.eq.f32.partialorder %v1887_v37, 8.507059e+37  ;;  %v1761_v28 = vmul.f32 %v5204_v11, %v1760_v27  ;;  %vm1764_vm1 = vweird.f32 %v5204_v11  ;;  %v9835_v27 = vld [vmem:[#allocation56_spill] sm:$0xff] }
 0x355   : > { %v5206_v41 = vpop.eup %5205  ;;  %v7727_v19 = vadd.f32 1.0, %v2836_v47  ;;  %v2863_v26 = vmul.f32 %v2862_v44, %v7565_v21  ;;  %v4780_v10 = vclamps-f32 %v1732_v48, 1.0  ;;  %v1891_v20 = vsel %vm1888_vm0, %v1890_v7, %v1886_v43  ;;  %v9836_v43 = vld [vmem:[#allocation30_spill] sm:$0xff] }
 0x356   : > { %v1892_v0 = vmul.f32 %v1891_v20, %v9833_v15  ;;  %v1762_v56 = vadd.f32 %v5204_v11, %v1761_v28  ;;  %vm1763_vm2 = vweird.f32 %v7675_v57  ;;  %v1919_v61 = vmul.f32 %v5206_v41, %v7706_v13 }
 0x357   : > { %vm1765_vm3 = vmor %vm1763_vm2, %vm1764_vm1  ;;  %vm1768_vm4 = vcmp.eq.f32.partialorder %v1767_v55, 8.507059e+37  ;;  %v1770_v1 = vor.u32 1.1754944e-38, %v1769_v49  ;;  %v2113_v3 = vadd.f32 0.112945676, %v2112_v25  ;;  %v1988_v2 = vmul.f32 3.8918573e-05, %v9834_v16 }
 0x358   : > { %v4784_v37 = vclamps-f32 %v1892_v0, 1.0  ;;  %v3865_v47 = vadd.f32 1.0, %v4780_v10  ;;  %v1766_v18 = vsel %vm1765_vm3, %v5204_v11, %v1762_v56  ;;  %v1920_v52 = vsub.f32 1.0, %v1919_v61  ;;  %v9837_v10 = vld [vmem:[#allocation51_spill] sm:$0xff] }
 0x359   : > { %v7734_v44 = vpop.eup %5207  ;;  %v1771_v7 = vsel %vm1768_vm4, %v1770_v1, %v1766_v18  ;;  %vm1924_vm5 = vweird.f32 %v5206_v41  ;;  %v1927_v39 = vand.u32 2147483647, %v7706_v13  ;;  %v1929_v57 = vand.u32 2147483648, %v7706_v13 }
 0x35a   : > { %v3869_v60 = vadd.f32 1.0, %v4784_v37  ;;  %v1772_v14 = vmul.f32 %v1771_v7, %v9835_v27  ;;  %v1921_v55 = vmul.f32 %v5206_v41, %v1920_v52  ;;  %v1959_v48 = vmul.f32 %v7734_v44, %v7718_v24 }
 0x35b   : > { %v4806_v49 = vclamps-f32 %v7691_v17, 1.0  ;;  %v2899_v11 = vmul.f32 %v7680_v4, %v7609_v54  ;;  %vm1923_vm6 = vweird.f32 %v7706_v13  ;;  %v2114_v25 = vmul.f32 %v2113_v3, %v9826_v29 }
 0x35c   : > { %v3929_v28 = vmul.f32 %v3865_v47, %v9836_v43  ;;  %v3933_v20 = vmul.f32 %v3869_v60, %v9837_v10  ;;  %v1922_v15 = vadd.f32 %v5206_v41, %v1921_v55  ;;  %v1960_v0 = vsub.f32 1.0, %v1959_v48  ;;  %vm1925_vm7 = vmor %vm1923_vm6, %vm1924_vm5 }
 0x35d   : > { %v2874_v56 = vmul.f32 %v7702_v63, %v7565_v21  ;;  %v1930_v61 = vor.u32 1.1754944e-38, %v1929_v57  ;;  %v2115_v17 = vadd.f32 0.4994258, %v2114_v25  ;;  %v1989_v1 = vadd.f32 0.001143296, %v1988_v2  ;;  %v9838_v63 = vld [vmem:[#allocation66_spill] sm:$0xff] }
 0x35e   : > { %v3989_v37 = vpack.c.bf16 %v3933_v20, %v3929_v28  ;;  %v4781_v4 = vclamps-f32 %v1772_v14, 1.0  ;;  %v1926_v18 = vsel %vm1925_vm7, %v5206_v41, %v1922_v15  ;;  %vm1928_vm8 = vcmp.eq.f32.partialorder %v1927_v39, 8.507059e+37 }
 0x35f   : > { %v4807_v13 = vclamps-f32 %v7698_v30, 1.0  ;;  %v2910_v3 = vmul.f32 %v7682_v62, %v7609_v54  ;;  %v1931_v47 = vsel %vm1928_vm8, %v1930_v61, %v1926_v18  ;;  %v2116_v52 = vmul.f32 %v2115_v17, %v9826_v29 }
 0x360   : > { %5209 = vrcp.f32 %v7727_v19  ;;  %4386 = vmatmul.bf16.gmra.mxu2 %v3989_v37  ;;  %v1932_v7 = vmul.f32 %v1931_v47, %v9838_v63  ;;  %v1961_v57 = vmul.f32 %v7734_v44, %v1960_v0  ;;  %v1990_v2 = vmul.f32 %v1989_v1, %v9834_v16 }
 0x361   : > { %v3891_v60 = vadd.f32 1.0, %v4806_v49  ;;  %v2864_v41 = vadd.f32 0.18741608, %v2863_v26  ;;  %v2935_v30 = vmul.f32 %v7659_v23, %v7659_v23  ;;  %v7761_v39 = vadd.f32 1.0, %v2116_v52 }
 0x362   : > { %v2849_v62 = vand.u32 2147483648, %v7727_v19  ;;  %v2875_v27 = vadd.f32 0.4994258, %v2874_v56  ;;  %v4785_v29 = vclamps-f32 %v1932_v7, 1.0  ;;  %v3866_v14 = vadd.f32 1.0, %v4781_v4  ;;  %v9844_v7 = vld [vmem:[#allocation52_spill] sm:$0xff] }
 0x363   : > { %v7766_v55 = vmul.f32 %v7700_v5, %v7446_v32  ;;  %v2900_v48 = vadd.f32 0.0036580483, %v2899_v11  ;;  %v2911_v25 = vadd.f32 0.014752088, %v2910_v3  ;;  %v1991_v43 = vadd.f32 0.014752088, %v1990_v2 }
 0x364   : > { %v3870_v28 = vadd.f32 1.0, %v4785_v29  ;;  %v1962_v26 = vadd.f32 %v7734_v44, %v1961_v57  ;;  %vm1964_vm9 = vweird.f32 %v7734_v44  ;;  %5211 = vrcp.f32 %v7761_v39  ;;  %v9839_v32 = vld [vmem:[#allocation33_spill] sm:$0xff] }
 0x365   : > { %v3892_v49 = vadd.f32 1.0, %v4807_v13  ;;  %v2865_v10 = vmul.f32 %v2864_v41, %v7565_v21  ;;  %v7772_v20 = vmin.f32 %v2935_v30, 16.0  ;;  %v1969_v15 = vand.u32 2147483648, %v7718_v24  ;;  %v9840_v11 = vld [vmem:[#allocation53_spill] sm:$0xff] }
 0x366   : > { %v7775_v0 = vpop.eup %5209  ;;  %v3930_v5 = vmul.f32 %v3866_v14, %v9839_v32  ;;  %v3934_v56 = vmul.f32 %v3870_v28, %v9840_v11  ;;  %vm1963_vm10 = vweird.f32 %v7718_v24  ;;  %v1967_v61 = vand.u32 2147483647, %v7718_v24 }
 0x367   : > { %v7782_v17 = vmul.f32 %v3891_v60, %v7484_v45  ;;  %v2847_v1 = vand.u32 2147483647, %v7727_v19  ;;  %v2876_v37 = vmul.f32 %v2875_v27, %v7565_v21  ;;  %vm7786_vm11 = vmor %vm1963_vm10, %vm1964_vm9  ;;  %v1992_v18 = vmul.f32 %v1991_v43, %v9834_v16  ;;  %v1152_v21 = vpop.f32.mrf.mxu3 }
 0x368   : > { %v2901_v13 = vmul.f32 %v2900_v48, %v7609_v54  ;;  %v2912_v3 = vmul.f32 %v2911_v25, %v7609_v54  ;;  %v3990_v47 = vpack.c.bf16 %v3934_v56, %v3930_v5  ;;  %v1966_v45 = vsel %vm7786_vm11, %v7734_v44, %v1962_v26 }
 0x369   : > { %9841 = vst [vmem:[#allocation38_spill] sm:$0xff] %v7782_v17  ;;  %v2839_v24 = vmul.f32 %v7775_v0, %v7727_v19  ;;  %v7798_v52 = vor.u32 1.1754944e-38, %v2849_v62  ;;  %v1970_v63 = vor.u32 1.1754944e-38, %v1969_v15  ;;  %v2148_v57 = vmul.f32 3.8918573e-05, %v9844_v7  ;;  %v9846_v15 = vld [vmem:[#allocation35_spill] sm:$0xff] }
 0x36a   : > { %v5212_v2 = vpop.eup %5211  ;;  %v7802_v60 = vmul.f32 %v3892_v49, %v7493_v42  ;;  %v2866_v41 = vadd.f32 1.1283791, %v2865_v10  ;;  %v2948_v30 = vmul.f32 3.8918573e-05, %v7772_v20  ;;  %4435 = vmatmul.bf16.gmra.mxu3 %v3990_v47  ;;  %vm1968_vm12 = vcmp.eq.f32.partialorder %v1967_v61, 8.507059e+37 }
 0x36b   : > { %v7805_v27 = vadd.f32 1.0, %v2876_v37  ;;  %v1971_v44 = vsel %vm1968_vm12, %v1970_v63, %v1966_v45  ;;  %v2119_v29 = vmul.f32 %v5212_v2, %v7761_v39  ;;  %v1993_v62 = vadd.f32 0.112945676, %v1992_v18 }
 0x36c   : > { %9845 = vst [vmem:[#allocation31_spill] sm:$0xff] %v7802_v60  ;;  %v2902_v14 = vadd.f32 0.05243302, %v2901_v13  ;;  %v2913_v48 = vadd.f32 0.112945676, %v2912_v3  ;;  %v7812_v43 = vadd.f32 %v1152_v21, %v9806_v59  ;;  %v2840_v42 = vsub.f32 1.0, %v2839_v24  ;;  %v1007_v13 = vpop.f32.mrf.mxu0 }
 0x36d   : > { %v7809_v25 = vmul.f32 0.70710677, %v7553_v46  ;;  %v2120_v28 = vsub.f32 1.0, %v2119_v29  ;;  %v1994_v26 = vmul.f32 %v1993_v62, %v9834_v16  ;;  %v2149_v49 = vadd.f32 0.001143296, %v2148_v57 }
 0x36e   : > { %v2949_v10 = vadd.f32 0.001143296, %v2948_v30  ;;  %v1972_v32 = vmul.f32 %v1971_v44, %v9846_v15  ;;  %v2127_v5 = vand.u32 2147483647, %v7761_v39  ;;  %v2129_v11 = vand.u32 2147483648, %v7761_v39 }
 0x36f   : > { %v2121_v56 = vmul.f32 %v5212_v2, %v2120_v28  ;;  %vm2124_vm13 = vweird.f32 %v5212_v2  ;;  %v1995_v61 = vadd.f32 0.4994258, %v1994_v26  ;;  %v2150_v46 = vmul.f32 %v2149_v49, %v9844_v7  ;;  %v9849_v28 = vld [vmem:[#allocation27_spill] sm:$0xff] }
 0x370   : > { %5213 = vrcp.f32 %v7805_v27  ;;  %v2903_v37 = vmul.f32 %v2902_v14, %v7609_v54  ;;  %v2914_v4 = vmul.f32 %v2913_v48, %v7609_v54  ;;  %v2975_v18 = vmul.f32 %v7809_v25, %v7809_v25 }
 0x371   : > { %vm2843_vm14 = vweird.f32 %v7727_v19  ;;  %v2122_v3 = vadd.f32 %v5212_v2, %v2121_v56  ;;  %vm2123_vm15 = vweird.f32 %v7761_v39  ;;  %v1996_v47 = vmul.f32 %v1995_v61, %v9834_v16 }
 0x372   : > { %v2151_v45 = vadd.f32 0.014752088, %v2150_v46  ;;  %v2841_v24 = vmul.f32 %v7775_v0, %v2840_v42  ;;  %v2950_v21 = vmul.f32 %v2949_v10, %v7772_v20  ;;  %v4786_v63 = vclamps-f32 %v1972_v32, 1.0  ;;  %vm2125_vm0 = vmor %vm2123_vm15, %vm2124_vm13 }
 0x373   : > { %v2130_v57 = vor.u32 1.1754944e-38, %v2129_v11  ;;  %v2126_v30 = vsel %vm2125_vm0, %v5212_v2, %v2122_v3  ;;  %vm2128_vm1 = vcmp.eq.f32.partialorder %v2127_v5, 8.507059e+37  ;;  %v7830_v44 = vadd.f32 1.0, %v1996_v47  ;;  %v9851_v47 = vld [vmem:[#allocation62_spill] sm:$0xff] }
 0x374   : > { %v2152_v29 = vmul.f32 %v2151_v45, %v9844_v7  ;;  %v2915_v62 = vadd.f32 0.4994258, %v2914_v4  ;;  %v2937_v39 = vmul.f32 2.1237322e-06, %v7772_v20  ;;  %v7835_v16 = vadd.f32 %v1007_v13, %v5994_v38  ;;  %v9850_v4 = vld [vmem:[#allocation45_spill] sm:$0xff] }
 0x375   : > { %v2131_v14 = vsel %vm2128_vm1, %v2130_v57, %v2126_v30  ;;  %vm7839_vm2 = vcmp.eq.f32.partialorder %v2847_v1, 8.507059e+37  ;;  %v2889_v2 = vand.u32 2147483648, %v7805_v27  ;;  %v2904_v42 = vadd.f32 0.18741608, %v2903_v37  ;;  %v1056_v57 = vpop.f32.mrf.mxu1 }
 0x376   : > { %v2132_v26 = vmul.f32 %v2131_v14, %v9849_v28  ;;  %5215 = vrcp.f32 %v7830_v44  ;;  %v7846_v49 = vpop.eup %5213  ;;  %vm2844_vm3 = vweird.f32 %v7775_v0  ;;  %v7850_v10 = vmul.f32 %v2866_v41, %v7521_v40  ;;  %v9856_v14 = vld [vmem:[#allocation61_spill] sm:$0xff] }
 0x377   : > { %v2951_v15 = vadd.f32 0.014752088, %v2950_v21  ;;  %v7852_v32 = vmin.f32 %v2975_v18, 16.0  ;;  %v2842_v1 = vadd.f32 %v7775_v0, %v2841_v24  ;;  %v3871_v11 = vadd.f32 1.0, %v4786_v63  ;;  %vm7866_vm4 = vmor %vm2843_vm14, %vm2844_vm3 }
 0x378   : > { %v4790_v5 = vclamps-f32 %v2132_v26, 1.0  ;;  %v2153_v56 = vadd.f32 0.112945676, %v2152_v29  ;;  %v2887_v61 = vand.u32 2147483647, %v7805_v27  ;;  %v2916_v46 = vmul.f32 %v2915_v62, %v7609_v54  ;;  %v9855_v62 = vld [vmem:[#allocation55_spill] sm:$0xff] }
 0x379   : > { %v2938_v37 = vadd.f32 0.00028619796, %v2937_v39  ;;  %v2028_v13 = vmul.f32 3.8918573e-05, %v9850_v4  ;;  %v7858_v3 = vor.u32 1.1754944e-38, %v2889_v2  ;;  %v2905_v40 = vmul.f32 %v2904_v42, %v7609_v54 }
 0x37a   : > { %v3875_v41 = vadd.f32 1.0, %v4790_v5  ;;  %v2188_v18 = vmul.f32 3.8918573e-05, %v9851_v47  ;;  %v2952_v24 = vmul.f32 %v2951_v15, %v7772_v20  ;;  %v2988_v21 = vmul.f32 3.8918573e-05, %v7852_v32 }
 0x37b   : > { %v7873_v63 = vmul.f32 0.5, %v7812_v43  ;;  %v2154_v54 = vmul.f32 %v2153_v56, %v9844_v7  ;;  %v2846_v19 = vsel %vm7866_vm4, %v7775_v0, %v2842_v1  ;;  %v2879_v29 = vmul.f32 %v7846_v49, %v7805_v27 }
 0x37c   : > { %v7876_v30 = vpop.eup %5215  ;;  %v3935_v39 = vmul.f32 %v3871_v11, %v9855_v62  ;;  %v3939_v2 = vmul.f32 %v3875_v41, %v9856_v14  ;;  %v7885_v42 = vadd.f32 1.0, %v2916_v46  ;;  %v2939_v28 = vmul.f32 %v2938_v37, %v7772_v20 }
 0x37d   : > { %9854 = vst [vmem:[#allocation29_spill] sm:$0xff] %v7873_v63  ;;  %v1999_v26 = vmul.f32 %v7876_v30, %v7830_v44  ;;  %v2029_v15 = vadd.f32 0.001143296, %v2028_v13  ;;  %v7891_v5 = vadd.f32 %v1056_v57, %v6001_v9  ;;  %v2155_v0 = vadd.f32 0.4994258, %v2154_v54 }
 0x37e   : > { %v3991_v56 = vpack.c.bf16 %v3939_v2, %v3935_v39  ;;  %v2189_v1 = vadd.f32 0.001143296, %v2188_v18  ;;  %v2851_v11 = vsel %vm7839_vm2, %v7798_v52, %v2846_v19  ;;  %v2953_v45 = vadd.f32 0.112945676, %v2952_v24 }
 0x37f   : > { %v2989_v41 = vadd.f32 0.001143296, %v2988_v21  ;;  %v7897_v46 = vmul.f32 0.70710677, %v7812_v43  ;;  %v2880_v37 = vsub.f32 1.0, %v2879_v29  ;;  %v2000_v13 = vsub.f32 1.0, %v1999_v26 }
 0x380   : > { %v2906_v62 = vadd.f32 1.1283791, %v2905_v40  ;;  %v2977_v14 = vmul.f32 2.1237322e-06, %v7852_v32  ;;  %4293 = vmatmul.bf16.gmra.mxu0 %v3991_v56  ;;  %vm2884_vm5 = vweird.f32 %v7846_v49  ;;  %v2940_v57 = vadd.f32 0.0036580483, %v2939_v28 }
 0x381   : > { %v7902_v18 = vmul.f32 0.70710677, %v7835_v16  ;;  %v2156_v48 = vmul.f32 %v2155_v0, %v9844_v7  ;;  %v2030_v52 = vmul.f32 %v2029_v15, %v9850_v4  ;;  %v7907_v24 = vmul.f32 %v2851_v11, %v7766_v55 }
 0x382   : > { %5217 = vrcp.f32 %v7885_v42  ;;  %v7911_v43 = vmul.f32 0.70710677, %v7891_v5  ;;  %v2190_v40 = vmul.f32 %v2189_v1, %v9851_v47  ;;  %vm2883_vm6 = vweird.f32 %v7805_v27 }
 0x383   : > { %v2954_v21 = vmul.f32 %v2953_v45, %v7772_v20  ;;  %v2990_v54 = vmul.f32 %v2989_v41, %v7852_v32  ;;  %v2001_v7 = vmul.f32 %v7876_v30, %v2000_v13  ;;  %v7918_v19 = vadd.f32 1.0, %v2156_v48  ;;  %vm7973_vm11 = vmor %vm2883_vm6, %vm2884_vm5 }
 0x384   : > { %v2881_v55 = vmul.f32 %v7846_v49, %v2880_v37  ;;  %v7922_v29 = vmul.f32 %v2906_v62, %v7569_v31  ;;  %v2978_v2 = vadd.f32 0.00028619796, %v2977_v14  ;;  %v2929_v28 = vand.u32 2147483648, %v7885_v42 }
 0x385   : > { %v3055_v26 = vmul.f32 %v7902_v18, %v7902_v18  ;;  %5219 = vrcp.f32 %v7918_v19  ;;  %v2031_v15 = vadd.f32 0.014752088, %v2030_v52  ;;  %v2941_v0 = vmul.f32 %v2940_v57, %v7772_v20 }
 0x386   : > { %v3095_v1 = vmul.f32 %v7911_v43, %v7911_v43  ;;  %v2191_v31 = vadd.f32 0.014752088, %v2190_v40  ;;  %v2955_v11 = vadd.f32 0.4994258, %v2954_v21  ;;  %v2991_v45 = vadd.f32 0.014752088, %v2990_v54 }
 0x387   : > { %v2002_v41 = vadd.f32 %v7876_v30, %v2001_v7  ;;  %vm2004_vm7 = vweird.f32 %v7876_v30  ;;  %v2882_v62 = vadd.f32 %v7846_v49, %v2881_v55  ;;  %v2979_v14 = vmul.f32 %v2978_v2, %v7852_v32 }
 0x388   : > { %v7935_v37 = vpop.eup %5217  ;;  %v3015_v13 = vmul.f32 %v7897_v46, %v7897_v46  ;;  %v2009_v57 = vand.u32 2147483648, %v7830_v44  ;;  %v7942_v48 = vmin.f32 %v3055_v26, 16.0  ;;  %vm2003_vm8 = vweird.f32 %v7830_v44 }
 0x389   : > { %v2007_v52 = vand.u32 2147483647, %v7830_v44  ;;  %v2032_v40 = vmul.f32 %v2031_v15, %v9850_v4  ;;  %vm7949_vm9 = vcmp.eq.f32.partialorder %v2887_v61, 8.507059e+37  ;;  %v7953_v54 = vor.u32 1.1754944e-38, %v2929_v28  ;;  %vm7957_vm10 = vmor %vm2003_vm8, %vm2004_vm7 }
 0x38a   : > { %v2942_v7 = vadd.f32 0.05243302, %v2941_v0  ;;  %v7955_v55 = vmin.f32 %v3095_v1, 16.0  ;;  %v2192_v26 = vmul.f32 %v2191_v31, %v9851_v47  ;;  %v2919_v15 = vmul.f32 %v7935_v37, %v7885_v42 }
 0x38b   : > { %v5220_v44 = vpop.eup %5219  ;;  %v2956_v61 = vmul.f32 %v2955_v11, %v7772_v20  ;;  %v2992_v56 = vmul.f32 %v2991_v45, %v7852_v32  ;;  %v2006_v28 = vsel %vm7957_vm10, %v7876_v30, %v2002_v41  ;;  %v2980_v1 = vadd.f32 0.0036580483, %v2979_v14 }
 0x38c   : > { %v7977_v31 = vmin.f32 %v3015_v13, 16.0  ;;  %v2010_v39 = vor.u32 1.1754944e-38, %v2009_v57  ;;  %v2159_v11 = vmul.f32 %v5220_v44, %v7918_v19  ;;  %v2886_v45 = vsel %vm7973_vm11, %v7846_v49, %v2882_v62 }
 0x38d   : > { %v3068_v30 = vmul.f32 3.8918573e-05, %v7942_v48  ;;  %vm2008_vm12 = vcmp.eq.f32.partialorder %v2007_v52, 8.507059e+37  ;;  %v2033_v41 = vadd.f32 0.112945676, %v2032_v40  ;;  %v2920_v60 = vsub.f32 1.0, %v2919_v15 }
 0x38e   : > { %v3108_v27 = vmul.f32 3.8918573e-05, %v7955_v55  ;;  %v2011_v2 = vsel %vm2008_vm12, %v2010_v39, %v2006_v28  ;;  %v2160_v63 = vsub.f32 1.0, %v2159_v11  ;;  %v2193_v22 = vadd.f32 0.112945676, %v2192_v26  ;;  %v9863_v52 = vld [vmem:[#allocation37_spill] sm:$0xff] }
 0x38f   : > { %v2943_v14 = vmul.f32 %v2942_v7, %v7772_v20  ;;  %v7986_v13 = vadd.f32 1.0, %v2956_v61  ;;  %v2993_v57 = vadd.f32 0.112945676, %v2992_v56  ;;  %v3028_v17 = vmul.f32 3.8918573e-05, %v7977_v31 }
 0x390   : > { %v2161_v34 = vmul.f32 %v5220_v44, %v2160_v63  ;;  %vm2164_vm13 = vweird.f32 %v5220_v44  ;;  %v2169_v49 = vand.u32 2147483648, %v7918_v19  ;;  %vm2923_vm14 = vweird.f32 %v7885_v42 }
 0x391   : > { %v3069_v62 = vadd.f32 0.001143296, %v3068_v30  ;;  %v2012_v40 = vmul.f32 %v2011_v2, %v9863_v52  ;;  %v2167_v39 = vand.u32 2147483647, %v7918_v19  ;;  %v2034_v26 = vmul.f32 %v2033_v41, %v9850_v4 }
 0x392   : > { %v3109_v15 = vadd.f32 0.001143296, %v3108_v27  ;;  %v2162_v7 = vadd.f32 %v5220_v44, %v2161_v34  ;;  %vm2163_vm15 = vweird.f32 %v7918_v19  ;;  %v2194_v56 = vmul.f32 %v2193_v22, %v9851_v47  ;;  %v1105_v22 = vpop.f32.mrf.mxu2 }
 0x393   : > { %v2891_v63 = vsel %vm7949_vm9, %v7858_v3, %v2886_v45  ;;  %v2921_v61 = vmul.f32 %v7935_v37, %v2920_v60  ;;  %5221 = vrcp.f32 %v7986_v13  ;;  %v3017_v28 = vmul.f32 2.1237322e-06, %v7977_v31  ;;  %vm2165_vm0 = vmor %vm2163_vm15, %vm2164_vm13 }
 0x394   : > { %v2994_v0 = vmul.f32 %v2993_v57, %v7852_v32  ;;  %v3029_v11 = vadd.f32 0.001143296, %v3028_v17  ;;  %v2166_v34 = vsel %vm2165_vm0, %v5220_v44, %v2162_v7  ;;  %v2170_v30 = vor.u32 1.1754944e-38, %v2169_v49  ;;  %v9867_v49 = vld [vmem:[#allocation43_spill] sm:$0xff] }
 0x395   : > { %v3070_v19 = vmul.f32 %v3069_v62, %v7942_v48  ;;  %v4787_v41 = vclamps-f32 %v2012_v40, 1.0  ;;  %vm2168_vm1 = vcmp.eq.f32.partialorder %v2167_v39, 8.507059e+37  ;;  %v2035_v21 = vadd.f32 0.4994258, %v2034_v26 }
 0x396   : > { %v9864_v3 = vand.u32 2147483647, %v7885_v42  ;;  %v2981_v45 = vmul.f32 %v2980_v1, %v7852_v32  ;;  %v3110_v27 = vmul.f32 %v3109_v15, %v7955_v55  ;;  %v2171_v2 = vsel %vm2168_vm1, %v2170_v30, %v2166_v34 }
 0x397   : > { %v2195_v17 = vadd.f32 0.4994258, %v2194_v56  ;;  %v2922_v44 = vadd.f32 %v7935_v37, %v2921_v61  ;;  %vm2924_vm3 = vweird.f32 %v7935_v37  ;;  %v3018_v57 = vadd.f32 0.00028619796, %v3017_v28 }
 0x398   : > { %vm8007_vm2 = vcmp.eq.f32.partialorder %v9864_v3, 8.507059e+37  ;;  %v2172_v62 = vmul.f32 %v2171_v2, %v9867_v49  ;;  %v9868_v52 = vclamps-f32 %v7907_v24, 1.0  ;;  %v2995_v39 = vadd.f32 0.4994258, %v2994_v0  ;;  %vm8028_vm4 = vmor %vm2923_vm14, %vm2924_vm3 }
 0x399   : > { %v3030_v26 = vmul.f32 %v3029_v11, %v7977_v31  ;;  %v8020_v7 = vadd.f32 %v1105_v22, %v9684_v36  ;;  %v8022_v1 = vpop.eup %5221  ;;  %v3071_v15 = vadd.f32 0.014752088, %v3070_v19  ;;  %v3872_v34 = vadd.f32 1.0, %v4787_v41 }
 0x39a   : > { %v3893_v40 = vadd.f32 1.0, %v9868_v52  ;;  %v4791_v56 = vclamps-f32 %v2172_v62, 1.0  ;;  %v2036_v61 = vmul.f32 %v2035_v21, %v9850_v4  ;;  %v2892_v28 = vmul.f32 %v2891_v63, %v7850_v10 }
 0x39b   : > { %9869 = vst [vmem:[#allocation40_spill] sm:$0xff] %v8020_v7  ;;  %v2982_v0 = vadd.f32 0.05243302, %v2981_v45  ;;  %v3111_v11 = vadd.f32 0.014752088, %v3110_v27  ;;  %v2196_v30 = vmul.f32 %v2195_v17, %v9851_v47  ;;  %v2926_v19 = vsel %vm8028_vm4, %v7935_v37, %v2922_v44  ;;  %v9872_v47 = vld [vmem:[#allocation57_spill] sm:$0xff] }
 0x39c   : > { %v2944_v22 = vadd.f32 0.18741608, %v2943_v14  ;;  %v3019_v41 = vmul.f32 %v3018_v57, %v7977_v31  ;;  %v3876_v4 = vadd.f32 1.0, %v4791_v56  ;;  %v2959_v10 = vmul.f32 %v8022_v1, %v7986_v13  ;;  %v9873_v27 = vld [vmem:[#allocation64_spill] sm:$0xff] }
 0x39d   : > { %v2996_v42 = vmul.f32 %v2995_v39, %v7852_v32  ;;  %v3031_v63 = vadd.f32 0.014752088, %v3030_v26  ;;  %v8041_v21 = vmul.f32 0.70710677, %v8020_v7  ;;  %v3072_v3 = vmul.f32 %v3071_v15, %v7942_v48 }
 0x39e   : > { %v3936_v45 = vmul.f32 %v3872_v34, %v9872_v47  ;;  %v3940_v2 = vmul.f32 %v3876_v4, %v9873_v27  ;;  %v8046_v37 = vadd.f32 1.0, %v2036_v61  ;;  %v4809_v14 = vclamps-f32 %v2892_v28, 1.0 }
 0x39f   : > { %v2983_v17 = vmul.f32 %v2982_v0, %v7852_v32  ;;  %v3112_v44 = vmul.f32 %v3111_v11, %v7955_v55  ;;  %v8050_v57 = vadd.f32 1.0, %v2196_v30  ;;  %v2931_v49 = vsel %vm8007_vm2, %v7953_v54, %v2926_v19 }
 0x3a0   : > { %v2945_v62 = vmul.f32 %v2944_v22, %v7772_v20  ;;  %v3020_v52 = vadd.f32 0.0036580483, %v3019_v41  ;;  %v3992_v39 = vpack.c.bf16 %v3940_v2, %v3936_v45  ;;  %v2960_v26 = vsub.f32 1.0, %v2959_v10 }
 0x3a1   : > { %v8056_v15 = vadd.f32 1.0, %v2996_v42  ;;  %v3057_v56 = vmul.f32 2.1237322e-06, %v7942_v48  ;;  %v3135_v34 = vmul.f32 %v8041_v21, %v8041_v21  ;;  %v3032_v61 = vmul.f32 %v3031_v63, %v7977_v31 }
 0x3a2   : > { %v8063_v28 = vmul.f32 0.5, %v7835_v16  ;;  %v3073_v24 = vadd.f32 0.112945676, %v3072_v3  ;;  %4342 = vmatmul.bf16.gmra.mxu1 %v3992_v39  ;;  %5223 = vrcp.f32 %v8046_v37  ;;  %v3894_v20 = vadd.f32 1.0, %v4809_v14 }
 0x3a3   : > { %v2984_v54 = vadd.f32 0.18741608, %v2983_v17  ;;  %v3113_v60 = vadd.f32 0.112945676, %v3112_v44  ;;  %5225 = vrcp.f32 %v8050_v57  ;;  %v2932_v0 = vmul.f32 %v2931_v49, %v7922_v29  ;;  %v1010_v49 = vpop.f32.mrf.mxu0 }
 0x3a4   : > { %v2946_v11 = vadd.f32 1.1283791, %v2945_v62  ;;  %v2967_v30 = vand.u32 2147483647, %v7986_v13  ;;  %v3021_v19 = vmul.f32 %v3020_v52, %v7977_v31  ;;  %v2961_v22 = vmul.f32 %v8022_v1, %v2960_v26 }
 0x3a5   : > { %5227 = vrcp.f32 %v8056_v15  ;;  %v3058_v16 = vadd.f32 0.00028619796, %v3057_v56  ;;  %v8072_v41 = vmin.f32 %v3135_v34, 16.0  ;;  %v2969_v4 = vand.u32 2147483648, %v7986_v13 }
 0x3a6   : > { %v3033_v10 = vadd.f32 0.112945676, %v3032_v61  ;;  %v3074_v42 = vmul.f32 %v3073_v24, %v7942_v48  ;;  %v3097_v63 = vmul.f32 2.1237322e-06, %v7955_v55  ;;  %v8078_v29 = vmul.f32 %v3893_v40, %v7505_v58  ;;  %v9878_v61 = vld [vmem:[#allocation46_spill] sm:$0xff] }
 0x3a7   : > { %v8081_v3 = vmul.f32 %v3894_v20, %v7525_v50  ;;  %v2985_v47 = vmul.f32 %v2984_v54, %v7852_v32  ;;  %v3114_v45 = vmul.f32 %v3113_v60, %v7955_v55  ;;  %v4810_v2 = vclamps-f32 %v2932_v0, 1.0 }
 0x3a8   : > { %9874 = vst [vmem:[#allocation32_spill] sm:$0xff] %v8078_v29  ;;  %v8085_v27 = vpop.eup %5223  ;;  %v2947_v14 = vmul.f32 %v2946_v11, %v7659_v23  ;;  %vm2964_vm5 = vweird.f32 %v8022_v1  ;;  %vm8089_vm6 = vcmp.eq.f32.partialorder %v2967_v30, 8.507059e+37  ;;  %v2962_v50 = vadd.f32 %v8022_v1, %v2961_v22 }
 0x3a9   : > { %9875 = vst [vmem:[#allocation41_spill] sm:$0xff] %v8081_v3  ;;  %v8093_v58 = vpop.eup %5225  ;;  %v3022_v40 = vadd.f32 0.05243302, %v3021_v19  ;;  %v3059_v32 = vmul.f32 %v3058_v16, %v7942_v48  ;;  %v3148_v44 = vmul.f32 3.8918573e-05, %v8072_v41  ;;  %v2970_v62 = vor.u32 1.1754944e-38, %v2969_v4 }
 0x3aa   : > { %v3034_v52 = vmul.f32 %v3033_v10, %v7977_v31  ;;  %v3075_v23 = vadd.f32 0.4994258, %v3074_v42  ;;  %v3098_v39 = vadd.f32 0.00028619796, %v3097_v63  ;;  %vm2963_vm7 = vweird.f32 %v7986_v13 }
 0x3ab   : > { %v8099_v26 = vpop.eup %5227  ;;  %v2986_v56 = vadd.f32 1.1283791, %v2985_v47  ;;  %v3115_v34 = vadd.f32 0.4994258, %v3114_v45  ;;  %v2068_v24 = vmul.f32 3.8918573e-05, %v9878_v61  ;;  %vm8105_vm8 = vmor %vm2963_vm7, %vm2964_vm5  ;;  %v8110_v60 = vadd.f32 %v1010_v49, %v5994_v38 }
 0x3ac   : > { %v3895_v20 = vadd.f32 1.0, %v4810_v2  ;;  %v2039_v0 = vmul.f32 %v8085_v27, %v8046_v37  ;;  %v2199_v13 = vmul.f32 %v8093_v58, %v8050_v57  ;;  %v2966_v11 = vsel %vm8105_vm8, %v8022_v1, %v2962_v50  ;;  %v1154_v50 = vpop.f32.mrf.mxu3 }
 0x3ad   : > { %9881 = vst [vmem:[#allocation42_spill] sm:$0xff] %v8110_v60  ;;  %v3023_v30 = vmul.f32 %v3022_v40, %v7977_v31  ;;  %v3060_v19 = vadd.f32 0.0036580483, %v3059_v32  ;;  %v3149_v22 = vadd.f32 0.001143296, %v3148_v44  ;;  %v2999_v16 = vmul.f32 %v8099_v26, %v8056_v15 }
 0x3ae   : > { %v3035_v4 = vadd.f32 0.4994258, %v3034_v52  ;;  %v3076_v10 = vmul.f32 %v3075_v23, %v7942_v48  ;;  %v3099_v42 = vmul.f32 %v3098_v39, %v7955_v55  ;;  %v8125_v63 = vmul.f32 %v2986_v56, %v7809_v25 }
 0x3af   : > { %v8128_v47 = vmul.f32 0.5, %v7891_v5  ;;  %v3116_v1 = vmul.f32 %v3115_v34, %v7955_v55  ;;  %v2069_v45 = vadd.f32 0.001143296, %v2068_v24  ;;  %v8132_v2 = vmul.f32 %v3895_v20, %v7536_v33 }
 0x3b0   : > { %v8135_v40 = vmul.f32 0.70710677, %v8110_v60  ;;  %v2040_v32 = vsub.f32 1.0, %v2039_v0  ;;  %v2200_v44 = vsub.f32 1.0, %v2199_v13  ;;  %v2971_v49 = vsel %vm8089_vm6, %v2970_v62, %v2966_v11 }
 0x3b1   : > { %v3024_v25 = vadd.f32 0.18741608, %v3023_v30  ;;  %v3061_v52 = vmul.f32 %v3060_v19, %v7942_v48  ;;  %v3150_v5 = vmul.f32 %v3149_v22, %v8072_v41  ;;  %v3000_v23 = vsub.f32 1.0, %v2999_v16 }
 0x3b2   : > { %v3036_v39 = vmul.f32 %v3035_v4, %v7977_v31  ;;  %v8142_v56 = vadd.f32 1.0, %v3076_v10  ;;  %v3100_v33 = vadd.f32 0.0036580483, %v3099_v42  ;;  %v3007_v34 = vand.u32 2147483647, %v8056_v15 }
 0x3b3   : > { %v8145_v24 = vadd.f32 1.0, %v3116_v1  ;;  %v8148_v20 = vadd.f32 %v1154_v50, %v9806_v59  ;;  %v2070_v17 = vmul.f32 %v2069_v45, %v9878_v61  ;;  %v3009_v62 = vand.u32 2147483648, %v8056_v15 }
 0x3b4   : > { %v3215_v54 = vmul.f32 %v8135_v40, %v8135_v40  ;;  %v2041_v0 = vmul.f32 %v8085_v27, %v2040_v32  ;;  %v2201_v13 = vmul.f32 %v8093_v58, %v2200_v44  ;;  %v2972_v11 = vmul.f32 %v2971_v49, %v2947_v14 }
 0x3b5   : > { %9882 = vst [vmem:[#allocation49_spill] sm:$0xff] %v8148_v20  ;;  %v3025_v30 = vmul.f32 %v3024_v25, %v7977_v31  ;;  %v3062_v19 = vadd.f32 0.05243302, %v3061_v52  ;;  %v3151_v22 = vadd.f32 0.014752088, %v3150_v5  ;;  %v3001_v16 = vmul.f32 %v8099_v26, %v3000_v23 }
 0x3b6   : > { %v8158_v4 = vadd.f32 1.0, %v3036_v39  ;;  %5229 = vrcp.f32 %v8142_v56  ;;  %v3101_v10 = vmul.f32 %v3100_v33, %v7955_v55  ;;  %vm3004_vm9 = vweird.f32 %v8099_v26 }
 0x3b7   : > { %5231 = vrcp.f32 %v8145_v24  ;;  %v8165_v42 = vmul.f32 0.70710677, %v8148_v20  ;;  %vm2044_vm10 = vweird.f32 %v8085_v27  ;;  %v2071_v31 = vadd.f32 0.014752088, %v2070_v17 }
 0x3b8   : > { %v8168_v14 = vmin.f32 %v3215_v54, 16.0  ;;  %v2042_v1 = vadd.f32 %v8085_v27, %v2041_v0  ;;  %v2202_v45 = vadd.f32 %v8093_v58, %v2201_v13  ;;  %vm2204_vm11 = vweird.f32 %v8093_v58 }
 0x3b9   : > { %9883 = vst [vmem:[#allocation54_spill] sm:$0xff] %v8165_v42  ;;  %vm3003_vm12 = vweird.f32 %v8056_v15  ;;  %v3152_v50 = vmul.f32 %v3151_v22, %v8072_v41  ;;  %vm2043_vm13 = vweird.f32 %v8046_v37  ;;  %v2049_v32 = vand.u32 2147483648, %v8046_v37 }
 0x3ba   : > { %v2209_v44 = vand.u32 2147483648, %v8050_v57  ;;  %v3137_v49 = vmul.f32 2.1237322e-06, %v8072_v41  ;;  %vm8179_vm14 = vmor %vm2043_vm13, %vm2044_vm10  ;;  %v2047_v52 = vand.u32 2147483647, %v8046_v37  ;;  %vm2203_vm15 = vweird.f32 %v8050_v57 }
 0x3bb   : > { %v2207_v5 = vand.u32 2147483647, %v8050_v57  ;;  %v4811_v23 = vclamps-f32 %v2972_v11, 1.0  ;;  %v3063_v39 = vmul.f32 %v3062_v19, %v7942_v48  ;;  %v3175_v33 = vmul.f32 %v8165_v42, %v8165_v42  ;;  %vm8189_vm0 = vmor %vm2203_vm15, %vm2204_vm11 }
 0x3bc   : > { %v2072_v54 = vmul.f32 %v2071_v31, %v9878_v61  ;;  %v8194_v0 = vpop.eup %5229  ;;  %5233 = vrcp.f32 %v8158_v4  ;;  %v3228_v37 = vmul.f32 3.8918573e-05, %v8168_v14  ;;  %v2046_v57 = vsel %vm8179_vm14, %v8085_v27, %v2042_v1  ;;  %vm8227_vm4 = vmor %vm3003_vm12, %vm3004_vm9 }
 0x3bd   : > { %v2206_v13 = vsel %vm8189_vm0, %v8093_v58, %v2202_v45  ;;  %v8204_v11 = vpop.eup %5231  ;;  %v3102_v19 = vadd.f32 0.05243302, %v3101_v10  ;;  %v3153_v22 = vadd.f32 0.112945676, %v3152_v50  ;;  %v2050_v20 = vor.u32 1.1754944e-38, %v2049_v32 }
 0x3be   : > { %v2210_v31 = vor.u32 1.1754944e-38, %v2209_v44  ;;  %v3002_v3 = vadd.f32 %v8099_v26, %v3001_v16  ;;  %v3138_v7 = vadd.f32 0.00028619796, %v3137_v49  ;;  %vm2048_vm1 = vcmp.eq.f32.partialorder %v2047_v52, 8.507059e+37  ;;  %v9892_v52 = vld [vmem:[#allocation39_spill] sm:$0xff] }
 0x3bf   : > { %vm2208_vm2 = vcmp.eq.f32.partialorder %v2207_v5, 8.507059e+37  ;;  %v8207_v29 = vmin.f32 %v3175_v33, 16.0  ;;  %v2051_v60 = vsel %vm2048_vm1, %v2050_v20, %v2046_v57  ;;  %v2073_v27 = vadd.f32 0.112945676, %v2072_v54 }
 0x3c0   : > { %v2211_v25 = vsel %vm2208_vm2, %v2210_v31, %v2206_v13  ;;  %vm8209_vm3 = vcmp.eq.f32.partialorder %v3007_v34, 8.507059e+37  ;;  %v3064_v58 = vadd.f32 0.18741608, %v3063_v39  ;;  %v3079_v10 = vmul.f32 %v8194_v0, %v8142_v56  ;;  %v9893_v39 = vld [vmem:[#allocation72_spill] sm:$0xff] }
 0x3c1   : > { %v3229_v45 = vadd.f32 0.001143296, %v3228_v37  ;;  %v3010_v50 = vor.u32 1.1754944e-38, %v3009_v62  ;;  %v3103_v16 = vmul.f32 %v3102_v19, %v7955_v55  ;;  %v3119_v32 = vmul.f32 %v8204_v11, %v8145_v24 }
 0x3c2   : > { %v3154_v44 = vmul.f32 %v3153_v22, %v8072_v41  ;;  %v8219_v20 = vpop.eup %5233  ;;  %v8221_v49 = vadd.f32 1.0, %v4811_v23  ;;  %v8231_v62 = vadd.f32 1.1283791, %v3025_v30  ;;  %v2052_v5 = vmul.f32 %v2051_v60, %v9892_v52 }
 0x3c3   : > { %v2212_v33 = vmul.f32 %v2211_v25, %v9893_v39  ;;  %v3006_v17 = vsel %vm8227_vm4, %v8099_v26, %v3002_v3  ;;  %v3139_v23 = vmul.f32 %v3138_v7, %v8072_v41  ;;  %v3188_v54 = vmul.f32 3.8918573e-05, %v8207_v29  ;;  %v1059_v3 = vpop.f32.mrf.mxu1 }
 0x3c4   : > { %v2074_v15 = vmul.f32 %v2073_v27, %v9878_v61  ;;  %v3049_v37 = vand.u32 2147483648, %v8158_v4  ;;  %v3065_v57 = vmul.f32 %v3064_v58, %v7942_v48  ;;  %v3080_v30 = vsub.f32 1.0, %v3079_v10 }
 0x3c5   : > { %v3230_v13 = vmul.f32 %v3229_v45, %v8168_v14  ;;  %v3039_v60 = vmul.f32 %v8219_v20, %v8158_v4  ;;  %v3104_v19 = vadd.f32 0.18741608, %v3103_v16  ;;  %v3120_v22 = vsub.f32 1.0, %v3119_v32 }
 0x3c6   : > { %v3155_v31 = vadd.f32 0.4994258, %v3154_v44  ;;  %v3087_v7 = vand.u32 2147483647, %v8142_v56  ;;  %v3089_v26 = vand.u32 2147483648, %v8142_v56  ;;  %v4788_v25 = vclamps-f32 %v2052_v5, 1.0 }
 0x3c7   : > { %v4792_v27 = vclamps-f32 %v2212_v33, 1.0  ;;  %v3011_v34 = vsel %vm8209_vm3, %v3010_v50, %v3006_v17  ;;  %v3140_v48 = vadd.f32 0.0036580483, %v3139_v23  ;;  %v3189_v58 = vadd.f32 0.001143296, %v3188_v54 }
 0x3c8   : > { %v2075_v10 = vadd.f32 0.4994258, %v2074_v15  ;;  %v3066_v45 = vadd.f32 1.1283791, %v3065_v57  ;;  %v3081_v52 = vmul.f32 %v8194_v0, %v3080_v30  ;;  %v3231_v39 = vadd.f32 0.014752088, %v3230_v13 }
 0x3c9   : > { %v8252_v16 = vadd.f32 %v1059_v3, %v6001_v9  ;;  %v3040_v32 = vsub.f32 1.0, %v3039_v60  ;;  %vm3083_vm5 = vweird.f32 %v8142_v56  ;;  %v3121_v44 = vmul.f32 %v8204_v11, %v3120_v22  ;;  %v9897_v3 = vld [vmem:[#allocation58_spill] sm:$0xff] }
 0x3ca   : > { %v3156_v5 = vmul.f32 %v3155_v31, %v8072_v41  ;;  %vm3044_vm6 = vweird.f32 %v8219_v20  ;;  %vm8258_vm7 = vcmp.eq.f32.partialorder %v3087_v7, 8.507059e+37  ;;  %v3105_v50 = vmul.f32 %v3104_v19, %v7955_v55 }
 0x3cb   : > { %9894 = vst [vmem:[#allocation63_spill] sm:$0xff] %v8252_v16  ;;  %v3873_v33 = vadd.f32 1.0, %v4788_v25  ;;  %v3877_v17 = vadd.f32 1.0, %v4792_v27  ;;  %v3090_v23 = vor.u32 1.1754944e-38, %v3089_v26  ;;  %v3141_v54 = vmul.f32 %v3140_v48, %v8072_v41  ;;  %v9898_v26 = vld [vmem:[#allocation67_spill] sm:$0xff] }
 0x3cc   : > { %v3190_v15 = vmul.f32 %v3189_v58, %v8207_v29  ;;  %v2076_v57 = vmul.f32 %v2075_v10, %v9878_v61  ;;  %vm3043_vm8 = vweird.f32 %v8158_v4  ;;  %v3082_v30 = vadd.f32 %v8194_v0, %v3081_v52 }
 0x3cd   : > { %vm3084_vm9 = vweird.f32 %v8194_v0  ;;  %v3232_v13 = vmul.f32 %v3231_v39, %v8168_v14  ;;  %v8271_v60 = vmul.f32 0.70710677, %v8252_v16  ;;  %v3041_v55 = vmul.f32 %v8219_v20, %v3040_v32  ;;  %vm8321_vm15 = vmor %vm3043_vm8, %vm3044_vm6 }
 0x3ce   : > { %v3122_v19 = vadd.f32 %v8204_v11, %v3121_v44  ;;  %vm3124_vm10 = vweird.f32 %v8204_v11  ;;  %v8276_v22 = vadd.f32 1.0, %v3156_v5  ;;  %v3127_v61 = vand.u32 2147483647, %v8145_v24  ;;  %vm8284_vm11 = vmor %vm3083_vm5, %vm3084_vm9 }
 0x3cf   : > { %v3129_v31 = vand.u32 2147483648, %v8145_v24  ;;  %v3937_v7 = vmul.f32 %v3873_v33, %v9897_v3  ;;  %v3941_v25 = vmul.f32 %v3877_v17, %v9898_v26  ;;  %vm3123_vm12 = vweird.f32 %v8145_v24  ;;  %v9903_v33 = vld [vmem:[#allocation65_spill] sm:$0xff] }
 0x3d0   : > { %v3142_v48 = vadd.f32 0.05243302, %v3141_v54  ;;  %v3191_v58 = vadd.f32 0.014752088, %v3190_v15  ;;  %v8289_v10 = vadd.f32 1.0, %v2076_v57  ;;  %v3086_v52 = vsel %vm8284_vm11, %v8194_v0, %v3082_v30  ;;  %vm8294_vm13 = vmor %vm3123_vm12, %vm3124_vm10 }
 0x3d1   : > { %v3233_v32 = vadd.f32 0.112945676, %v3232_v13  ;;  %v3255_v56 = vmul.f32 %v8271_v60, %v8271_v60  ;;  %v3993_v44 = vpack.c.bf16 %v3941_v25, %v3937_v7  ;;  %v3106_v5 = vadd.f32 1.1283791, %v3105_v50 }
 0x3d2   : > { %v3126_v24 = vsel %vm8294_vm13, %v8204_v11, %v3122_v19  ;;  %5235 = vrcp.f32 %v8276_v22  ;;  %v2228_v17 = vmul.f32 3.8918573e-05, %v9903_v33  ;;  %v3042_v0 = vadd.f32 %v8219_v20, %v3041_v55 }
 0x3d3   : > { %vm3128_vm14 = vcmp.eq.f32.partialorder %v3127_v61, 8.507059e+37  ;;  %v3130_v54 = vor.u32 1.1754944e-38, %v3129_v31  ;;  %v3177_v15 = vmul.f32 2.1237322e-06, %v8207_v29  ;;  %4391 = vmatmul.bf16.gmra.mxu2 %v3993_v44  ;;  %v3091_v57 = vsel %vm8258_vm7, %v3090_v23, %v3086_v52 }
 0x3d4   : > { %v3143_v50 = vmul.f32 %v3142_v48, %v8072_v41  ;;  %v3192_v30 = vmul.f32 %v3191_v58, %v8207_v29  ;;  %5237 = vrcp.f32 %v8289_v10  ;;  %v3067_v11 = vmul.f32 %v3066_v45, %v7902_v18 }
 0x3d5   : > { %v3131_v13 = vsel %vm3128_vm14, %v3130_v54, %v3126_v24  ;;  %v3234_v19 = vmul.f32 %v3233_v32, %v8168_v14  ;;  %v8314_v55 = vmin.f32 %v3255_v56, 16.0  ;;  %v3012_v61 = vmul.f32 %v3011_v34, %v8125_v63 }
 0x3d6   : > { %v3047_v23 = vand.u32 2147483647, %v8158_v4  ;;  %v3107_v31 = vmul.f32 %v3106_v5, %v7911_v43  ;;  %v2229_v18 = vadd.f32 0.001143296, %v2228_v17  ;;  %v3046_v45 = vsel %vm8321_vm15, %v8219_v20, %v3042_v0 }
 0x3d7   : > { %v3050_v63 = vor.u32 1.1754944e-38, %v3049_v37  ;;  %v3092_v34 = vmul.f32 %v3091_v57, %v3067_v11  ;;  %v3178_v3 = vadd.f32 0.00028619796, %v3177_v15  ;;  %v3144_v25 = vadd.f32 0.18741608, %v3143_v50 }
 0x3d8   : > { %v8332_v7 = vpop.eup %5235  ;;  %v3132_v26 = vmul.f32 %v3131_v13, %v3107_v31  ;;  %v3193_v27 = vadd.f32 0.112945676, %v3192_v30  ;;  %v2230_v48 = vmul.f32 %v2229_v18, %v9903_v33  ;;  %v3027_v43 = vmul.f32 %v8231_v62, %v7897_v46  ;;  %v1012_v62 = vpop.f32.mrf.mxu0 }
 0x3d9   : > { %v3217_v58 = vmul.f32 2.1237322e-06, %v8168_v14  ;;  %v3235_v52 = vadd.f32 0.4994258, %v3234_v19  ;;  %v3268_v20 = vmul.f32 3.8918573e-05, %v8314_v55  ;;  %v8343_v4 = vmul.f32 %v8221_v49, %v7545_v35 }
 0x3da   : > { %v8339_v39 = vpop.eup %5237  ;;  %v4812_v37 = vclamps-f32 %v3012_v61, 1.0  ;;  %vm3048_vm0 = vcmp.eq.f32.partialorder %v3047_v23, 8.507059e+37  ;;  %v2231_v32 = vadd.f32 0.014752088, %v2230_v48  ;;  %v4814_v44 = vclamps-f32 %v3092_v34, 1.0 }
 0x3db   : > { %v3051_v56 = vsel %vm3048_vm0, %v3050_v63, %v3046_v45  ;;  %v3159_v5 = vmul.f32 %v8332_v7, %v8276_v22  ;;  %v3179_v46 = vmul.f32 %v3178_v3, %v8207_v29  ;;  %v4815_v24 = vclamps-f32 %v3132_v26, 1.0  ;;  %v1108_v26 = vpop.f32.mrf.mxu2 }
 0x3dc   : > { %v3145_v17 = vmul.f32 %v3144_v25, %v8072_v41  ;;  %v3194_v0 = vmul.f32 %v3193_v27, %v8207_v29  ;;  %v2232_v54 = vmul.f32 %v2231_v32, %v9903_v33  ;;  %v3218_v35 = vadd.f32 0.00028619796, %v3217_v58 }
 0x3dd   : > { %v3236_v49 = vmul.f32 %v3235_v52, %v8168_v14  ;;  %v3269_v15 = vadd.f32 0.001143296, %v3268_v20  ;;  %v2079_v57 = vmul.f32 %v8339_v39, %v8289_v10  ;;  %v3897_v50 = vadd.f32 1.0, %v4812_v37 }
 0x3de   : > { %v3257_v30 = vmul.f32 2.1237322e-06, %v8314_v55  ;;  %v8356_v11 = vadd.f32 %v1012_v62, %v5994_v38  ;;  %v2233_v13 = vadd.f32 0.112945676, %v2232_v54  ;;  %v8358_v19 = vmul.f32 %v3051_v56, %v3027_v43 }
 0x3df   : > { %v3899_v41 = vadd.f32 1.0, %v4814_v44  ;;  %v3160_v61 = vsub.f32 1.0, %v3159_v5  ;;  %v3180_v1 = vadd.f32 0.0036580483, %v3179_v46  ;;  %v3900_v23 = vadd.f32 1.0, %v4815_v24 }
 0x3e0   : > { %9906 = vst [vmem:[#allocation44_spill] sm:$0xff] %v8356_v11  ;;  %v3146_v31 = vadd.f32 1.1283791, %v3145_v17  ;;  %v3195_v18 = vadd.f32 0.4994258, %v3194_v0  ;;  %v2234_v45 = vmul.f32 %v2233_v13, %v9903_v33  ;;  %v3219_v63 = vmul.f32 %v3218_v35, %v8168_v14 }
 0x3e1   : > { %9907 = vst [vmem:[#allocation56_spill] sm:$0xff] %v8358_v19  ;;  %v8362_v34 = vadd.f32 1.0, %v3236_v49  ;;  %v3270_v3 = vmul.f32 %v3269_v15, %v8314_v55  ;;  %v2080_v25 = vsub.f32 1.0, %v2079_v57  ;;  %v8366_v27 = vmul.f32 %v3897_v50, %v7662_v8 }
 0x3e2   : > { %v3258_v48 = vadd.f32 0.00028619796, %v3257_v30  ;;  %v8369_v43 = vmul.f32 0.70710677, %v8356_v11  ;;  %v2235_v58 = vadd.f32 0.4994258, %v2234_v45  ;;  %v8373_v20 = vmul.f32 %v3899_v41, %v8063_v28  ;;  %v1061_v28 = vpop.f32.mrf.mxu1 }
 0x3e3   : > { %9908 = vst [vmem:[#allocation30_spill] sm:$0xff] %v8366_v27  ;;  %v3161_v37 = vmul.f32 %v8332_v7, %v3160_v61  ;;  %v3181_v32 = vmul.f32 %v3180_v1, %v8207_v29  ;;  %v8378_v56 = vmul.f32 %v3900_v23, %v8128_v47  ;;  %v3196_v8 = vmul.f32 %v3195_v18, %v8207_v29 }
 0x3e4   : > { %v8382_v44 = vadd.f32 %v1108_v26, %v9684_v36  ;;  %v2236_v5 = vmul.f32 %v2235_v58, %v9903_v33  ;;  %v3220_v46 = vadd.f32 0.0036580483, %v3219_v63  ;;  %5239 = vrcp.f32 %v8362_v34  ;;  %v1157_v58 = vpop.f32.mrf.mxu3 }
 0x3e5   : > { %v3271_v62 = vadd.f32 0.014752088, %v3270_v3  ;;  %v2081_v24 = vmul.f32 %v8339_v39, %v2080_v25  ;;  %v8388_v17 = vmul.f32 %v3146_v31, %v8041_v21  ;;  %v3259_v47 = vmul.f32 %v3258_v48, %v8314_v55 }
 0x3e6   : > { %9909 = vst [vmem:[#allocation51_spill] sm:$0xff] %v8382_v44  ;;  %v3375_v0 = vmul.f32 %v8369_v43, %v8369_v43  ;;  %v8393_v54 = vadd.f32 1.0, %v2236_v5  ;;  %v3162_v35 = vadd.f32 %v8332_v7, %v3161_v37  ;;  %vm3164_vm1 = vweird.f32 %v8332_v7 }
 0x3e7   : > { %v3167_v33 = vand.u32 2147483647, %v8276_v22  ;;  %v3182_v49 = vadd.f32 0.05243302, %v3181_v32  ;;  %v8398_v15 = vadd.f32 1.0, %v3196_v8  ;;  %v8404_v21 = vadd.f32 %v1061_v28, %v6001_v9 }
 0x3e8   : > { %v8401_v57 = vmul.f32 0.70710677, %v8382_v44  ;;  %5241 = vrcp.f32 %v8393_v54  ;;  %v3221_v50 = vmul.f32 %v3220_v46, %v8168_v14  ;;  %v3272_v30 = vmul.f32 %v3271_v62, %v8314_v55 }
 0x3e9   : > { %9911 = vst [vmem:[#allocation33_spill] sm:$0xff] %v8404_v21  ;;  %v2082_v13 = vadd.f32 %v8339_v39, %v2081_v24  ;;  %vm2084_vm2 = vweird.f32 %v8339_v39  ;;  %vm3163_vm3 = vweird.f32 %v8276_v22  ;;  %v3260_v41 = vadd.f32 0.0036580483, %v3259_v47 }
 0x3ea   : > { %9910 = vst [vmem:[#allocation66_spill] sm:$0xff] %v8401_v57  ;;  %v8412_v61 = vmin.f32 %v3375_v0, 16.0  ;;  %v2089_v1 = vand.u32 2147483648, %v8289_v10  ;;  %v8415_v23 = vpop.eup %5239  ;;  %vm8419_vm4 = vmor %vm3163_vm3, %vm3164_vm1  ;;  %v3169_v18 = vand.u32 2147483648, %v8276_v22  ;;  %v3183_v45 = vmul.f32 %v3182_v49, %v8207_v29 }
 0x3eb   : > { %vm2083_vm5 = vweird.f32 %v8289_v10  ;;  %v2087_v63 = vand.u32 2147483647, %v8289_v10  ;;  %v3166_v3 = vsel %vm8419_vm4, %v8332_v7, %v3162_v35  ;;  %vm8430_vm6 = vcmp.eq.f32.partialorder %v3167_v33, 8.507059e+37 }
 0x3ec   : > { %v3295_v25 = vmul.f32 %v8401_v57, %v8401_v57  ;;  %v8437_v48 = vmul.f32 0.70710677, %v8404_v21  ;;  %vm8441_vm7 = vmor %vm2083_vm5, %vm2084_vm2  ;;  %5243 = vrcp.f32 %v8398_v15  ;;  %v3222_v10 = vadd.f32 0.05243302, %v3221_v50 }
 0x3ed   : > { %v3273_v7 = vadd.f32 0.112945676, %v3272_v30  ;;  %v2086_v37 = vsel %vm8441_vm7, %v8339_v39, %v2082_v13  ;;  %v3239_v8 = vmul.f32 %v8415_v23, %v8362_v34  ;;  %v3261_v5 = vmul.f32 %v3260_v41, %v8314_v55 }
 0x3ee   : > { %v5242_v32 = vpop.eup %5241  ;;  %v3388_v46 = vmul.f32 3.8918573e-05, %v8412_v61  ;;  %v2090_v62 = vor.u32 1.1754944e-38, %v2089_v1  ;;  %v3170_v28 = vor.u32 1.1754944e-38, %v3169_v18  ;;  %v3184_v24 = vadd.f32 0.18741608, %v3183_v45 }
 0x3ef   : > { %vm2088_vm8 = vcmp.eq.f32.partialorder %v2087_v63, 8.507059e+37  ;;  %v2239_v47 = vmul.f32 %v5242_v32, %v8393_v54  ;;  %v8454_v0 = vmin.f32 %v3295_v25, 16.0  ;;  %v8457_v35 = vadd.f32 %v1157_v58, %v9806_v59  ;;  %v9920_v63 = vld [vmem:[#allocation23_spill] sm:$0xff] }
 0x3f0   : > { %v3415_v39 = vmul.f32 %v8437_v48, %v8437_v48  ;;  %v2091_v33 = vsel %vm2088_vm8, %v2090_v62, %v2086_v37  ;;  %v8463_v49 = vsel %vm8430_vm6, %v3170_v28, %v3166_v3  ;;  %v3223_v50 = vmul.f32 %v3222_v10, %v8168_v14 }
 0x3f1   : > { %9918 = vst [vmem:[#allocation53_spill] sm:$0xff] %v8457_v35  ;;  %v3274_v30 = vmul.f32 %v3273_v7, %v8314_v55  ;;  %v2240_v13 = vsub.f32 1.0, %v2239_v47  ;;  %v3240_v41 = vsub.f32 1.0, %v3239_v8  ;;  %v3262_v1 = vadd.f32 0.05243302, %v3261_v5 }
 0x3f2   : > { %9919 = vst [vmem:[#allocation52_spill] sm:$0xff] %v8463_v49  ;;  %v3389_v31 = vadd.f32 0.001143296, %v3388_v46  ;;  %v2249_v18 = vand.u32 2147483648, %v8393_v54  ;;  %v8468_v45 = vpop.eup %5243  ;;  %v2092_v25 = vmul.f32 %v2091_v33, %v9920_v63  ;;  %vm2244_vm9 = vweird.f32 %v5242_v32 }
 0x3f3   : > { %v2241_v22 = vmul.f32 %v5242_v32, %v2240_v13  ;;  %v2247_v26 = vand.u32 2147483647, %v8393_v54  ;;  %v3185_v3 = vmul.f32 %v3184_v24, %v8207_v29  ;;  %v3308_v10 = vmul.f32 3.8918573e-05, %v8454_v0 }
 0x3f4   : > { %v8475_v7 = vmul.f32 0.70710677, %v8457_v35  ;;  %v8477_v58 = vmin.f32 %v3415_v39, 16.0  ;;  %v3224_v37 = vadd.f32 0.18741608, %v3223_v50  ;;  %vm2243_vm10 = vweird.f32 %v8393_v54 }
 0x3f5   : > { %v3275_v8 = vadd.f32 0.4994258, %v3274_v30  ;;  %v2242_v5 = vadd.f32 %v5242_v32, %v2241_v22  ;;  %v3199_v46 = vmul.f32 %v8468_v45, %v8398_v15  ;;  %v3263_v62 = vmul.f32 %v3262_v1, %v8314_v55  ;;  %vm2245_vm11 = vmor %vm2243_vm10, %vm2244_vm9 }
 0x3f6   : > { %9921 = vst [vmem:[#allocation35_spill] sm:$0xff] %v8475_v7  ;;  %v3390_v28 = vmul.f32 %v3389_v31, %v8412_v61  ;;  %v2250_v29 = vor.u32 1.1754944e-38, %v2249_v18  ;;  %v3241_v24 = vmul.f32 %v8415_v23, %v3240_v41  ;;  %v4789_v47 = vclamps-f32 %v2092_v25, 1.0 }
 0x3f7   : > { %v2246_v33 = vsel %vm2245_vm11, %v5242_v32, %v2242_v5  ;;  %vm2248_vm12 = vcmp.eq.f32.partialorder %v2247_v26, 8.507059e+37  ;;  %v3309_v39 = vadd.f32 0.001143296, %v3308_v10  ;;  %v3335_v50 = vmul.f32 %v8475_v7, %v8475_v7 }
 0x3f8   : > { %v3428_v54 = vmul.f32 3.8918573e-05, %v8477_v58  ;;  %v2251_v30 = vsel %vm2248_vm12, %v2250_v29, %v2246_v33  ;;  %v8488_v13 = vadd.f32 1.1283791, %v3185_v3  ;;  %v3225_v1 = vmul.f32 %v3224_v37, %v8168_v14 }
 0x3f9   : > { %v3276_v31 = vmul.f32 %v3275_v8, %v8314_v55  ;;  %v2252_v18 = vmul.f32 %v2251_v30, %v7226_v12  ;;  %vm3244_vm13 = vweird.f32 %v8415_v23  ;;  %v3249_v32 = vand.u32 2147483648, %v8362_v34 }
 0x3fa   : > { %9922 = vst [vmem:[#allocation27_spill] sm:$0xff] %v8488_v13  ;;  %v3264_v41 = vadd.f32 0.18741608, %v3263_v62  ;;  %v3391_v63 = vadd.f32 0.014752088, %v3390_v28  ;;  %v3242_v25 = vadd.f32 %v8415_v23, %v3241_v24  ;;  %v3874_v10 = vadd.f32 1.0, %v4789_v47 }
 0x3fb   : > { %v3377_v22 = vmul.f32 2.1237322e-06, %v8412_v61  ;;  %v4793_v26 = vclamps-f32 %v2252_v18, 1.0  ;;  %v3200_v3 = vsub.f32 1.0, %v3199_v46  ;;  %v3310_v5 = vmul.f32 %v3309_v39, %v8454_v0  ;;  %v9925_v39 = vld [vmem:[#allocation59_spill] sm:$0xff] }
 0x3fc   : > { %v8498_v14 = vmin.f32 %v3335_v50, 16.0  ;;  %v3429_v37 = vadd.f32 0.001143296, %v3428_v54  ;;  %vm3243_vm14 = vweird.f32 %v8362_v34  ;;  %v3247_v12 = vand.u32 2147483647, %v8362_v34  ;;  %v9926_v54 = vld [vmem:[#allocation68_spill] sm:$0xff] }
 0x3fd   : > { %v8502_v8 = vadd.f32 1.0, %v3276_v31  ;;  %v3878_v62 = vadd.f32 1.0, %v4793_v26  ;;  %v3226_v28 = vadd.f32 1.1283791, %v3225_v1  ;;  %vm8506_vm15 = vmor %vm3243_vm14, %vm3244_vm13  ;;  %v3250_v46 = vor.u32 1.1754944e-38, %v3249_v32 }
 0x3fe   : > { %v3265_v24 = vmul.f32 %v3264_v41, %v8314_v55  ;;  %v3392_v47 = vmul.f32 %v3391_v63, %v8412_v61  ;;  %v3246_v33 = vsel %vm8506_vm15, %v8415_v23, %v3242_v25  ;;  %v3378_v34 = vadd.f32 0.00028619796, %v3377_v22 }
 0x3ff   : > { %v3938_v50 = vmul.f32 %v3874_v10, %v9925_v39  ;;  %v3942_v30 = vmul.f32 %v3878_v62, %v9926_v54  ;;  %v3297_v1 = vmul.f32 2.1237322e-06, %v8454_v0  ;;  %v3311_v31 = vadd.f32 0.014752088, %v3310_v5 }
 0x400   : > { %v3348_v18 = vmul.f32 3.8918573e-05, %v8498_v14  ;;  %v3430_v32 = vmul.f32 %v3429_v37, %v8477_v58  ;;  %v3201_v55 = vmul.f32 %v8468_v45, %v3200_v3  ;;  %vm3248_vm0 = vcmp.eq.f32.partialorder %v3247_v12, 8.507059e+37 }
 0x401   : > { %5245 = vrcp.f32 %v8502_v8  ;;  %v3994_v41 = vpack.c.bf16 %v3942_v30, %v3938_v50  ;;  %v3251_v63 = vsel %vm3248_vm0, %v3250_v46, %v3246_v33  ;;  %v3266_v25 = vadd.f32 1.1283791, %v3265_v24  ;;  %v1110_v50 = vpop.f32.mrf.mxu2 }
 0x402   : > { %v3393_v22 = vadd.f32 0.112945676, %v3392_v47  ;;  %v3227_v26 = vmul.f32 %v3226_v28, %v8135_v40  ;;  %v3379_v10 = vmul.f32 %v3378_v34, %v8412_v61  ;;  %v2268_v5 = vmul.f32 3.8918573e-05, %v7035_v53 }
 0x403   : > { %4440 = vmatmul.bf16.gmra.mxu3 %v3994_v41  ;;  %v2308_v37 = vmul.f32 3.8918573e-05, %v7070_v6  ;;  %v3298_v62 = vadd.f32 0.00028619796, %v3297_v1  ;;  %v3312_v3 = vmul.f32 %v3311_v31, %v8454_v0  ;;  %v3349_v12 = vadd.f32 0.001143296, %v3348_v18 }
 0x404   : > { %v3431_v29 = vadd.f32 0.014752088, %v3430_v32  ;;  %v8529_v39 = vadd.f32 %v8468_v45, %v3201_v55  ;;  %v8531_v46 = vmul.f32 %v3251_v63, %v3227_v26  ;;  %v2269_v24 = vadd.f32 0.001143296, %v2268_v5  ;;  %v9928_v26 = vld [vmem:[#allocation48_spill] sm:$0xff] }
 0x405   : > { %v2309_v47 = vadd.f32 0.001143296, %v2308_v37  ;;  %v8534_v40 = vmul.f32 %v3266_v25, %v8271_v60  ;;  %v3394_v34 = vmul.f32 %v3393_v22, %v8412_v61  ;;  %v3380_v30 = vadd.f32 0.0036580483, %v3379_v10 }
 0x406   : > { %v2270_v1 = vmul.f32 %v2269_v24, %v7035_v53  ;;  %v2348_v18 = vmul.f32 3.8918573e-05, %v7072_v51  ;;  %v3299_v32 = vmul.f32 %v3298_v62, %v8454_v0  ;;  %v3313_v60 = vadd.f32 0.112945676, %v3312_v3  ;;  %v9929_v62 = vld [vmem:[#allocation36_spill] sm:$0xff] }
 0x407   : > { %v8539_v54 = vpop.eup %5245  ;;  %v2310_v31 = vmul.f32 %v2309_v47, %v7070_v6  ;;  %v3350_v55 = vmul.f32 %v3349_v12, %v8498_v14  ;;  %v3432_v41 = vmul.f32 %v3431_v29, %v8477_v58  ;;  %v3417_v63 = vmul.f32 2.1237322e-06, %v8477_v58 }
 0x408   : > { %v8549_v25 = vadd.f32 %v1110_v50, %v9684_v36  ;;  %v2271_v22 = vadd.f32 0.014752088, %v2270_v1  ;;  %v2428_v10 = vmul.f32 3.8918573e-05, %v9928_v26  ;;  %v8554_v5 = vmul.f32 %v8539_v54, %v8502_v8 }
 0x409   : > { %v3395_v37 = vadd.f32 0.4994258, %v3394_v34  ;;  %v2311_v24 = vadd.f32 0.014752088, %v2310_v31  ;;  %v2468_v3 = vmul.f32 3.8918573e-05, %v9929_v62  ;;  %v3381_v12 = vmul.f32 %v3380_v30, %v8412_v61 }
 0x40a   : > { %9927 = vst [vmem:[#allocation45_spill] sm:$0xff] %v8549_v25  ;;  %v2272_v29 = vmul.f32 %v2271_v22, %v7035_v53  ;;  %v2429_v47 = vadd.f32 0.001143296, %v2428_v10  ;;  %v2349_v52 = vadd.f32 0.001143296, %v2348_v18  ;;  %v3314_v18 = vmul.f32 %v3313_v60, %v8454_v0 }
 0x40b   : > { %v3351_v23 = vadd.f32 0.014752088, %v3350_v55  ;;  %v3433_v50 = vadd.f32 0.112945676, %v3432_v41  ;;  %v2312_v1 = vmul.f32 %v2311_v24, %v7070_v6  ;;  %v2469_v28 = vadd.f32 0.001143296, %v2468_v3 }
 0x40c   : > { %v8561_v33 = vmul.f32 0.70710677, %v8549_v25  ;;  %v2273_v36 = vadd.f32 0.112945676, %v2272_v29  ;;  %v2430_v34 = vmul.f32 %v2429_v47, %v9928_v26  ;;  %v2350_v31 = vmul.f32 %v2349_v52, %v7072_v51 }
 0x40d   : > { %v3396_v35 = vmul.f32 %v3395_v37, %v8412_v61  ;;  %v3418_v30 = vadd.f32 0.00028619796, %v3417_v63  ;;  %v2313_v9 = vadd.f32 0.112945676, %v2312_v1  ;;  %v2470_v22 = vmul.f32 %v2469_v28, %v9929_v62 }
 0x40e   : > { %9930 = vst [vmem:[#allocation62_spill] sm:$0xff] %v8561_v33  ;;  %v3382_v55 = vadd.f32 0.05243302, %v3381_v12  ;;  %v2274_v41 = vmul.f32 %v2273_v36, %v7035_v53  ;;  %v2431_v10 = vadd.f32 0.014752088, %v2430_v34  ;;  %v3434_v24 = vmul.f32 %v3433_v50, %v8477_v58 }
 0x40f   : > { %v2314_v3 = vmul.f32 %v2313_v9, %v7070_v6  ;;  %v2471_v29 = vadd.f32 0.014752088, %v2470_v22  ;;  %v2351_v47 = vadd.f32 0.014752088, %v2350_v31  ;;  %v3352_v52 = vmul.f32 %v3351_v23, %v8498_v14 }
 0x410   : > { %v3455_v63 = vmul.f32 %v8561_v33, %v8561_v33  ;;  %v2275_v37 = vadd.f32 0.4994258, %v2274_v41  ;;  %v2432_v28 = vmul.f32 %v2431_v10, %v9928_v26  ;;  %v8575_v1 = vadd.f32 1.0, %v3396_v35 }
 0x411   : > { %v3419_v60 = vmul.f32 %v3418_v30, %v8477_v58  ;;  %v2315_v36 = vadd.f32 0.4994258, %v2314_v3  ;;  %v2472_v12 = vmul.f32 %v2471_v29, %v9929_v62  ;;  %v3315_v50 = vadd.f32 0.4994258, %v3314_v18  ;;  %v1159_v29 = vpop.f32.mrf.mxu3 }
 0x412   : > { %v3383_v9 = vmul.f32 %v3382_v55, %v8412_v61  ;;  %v2276_v34 = vmul.f32 %v2275_v37, %v7035_v53  ;;  %v2433_v31 = vadd.f32 0.112945676, %v2432_v28  ;;  %v3435_v23 = vadd.f32 0.4994258, %v3434_v24 }
 0x413   : > { %v2316_v22 = vmul.f32 %v2315_v36, %v7070_v6  ;;  %v2473_v44 = vadd.f32 0.112945676, %v2472_v12  ;;  %v2352_v41 = vmul.f32 %v2351_v47, %v7072_v51  ;;  %v3353_v10 = vadd.f32 0.112945676, %v3352_v52 }
 0x414   : > { %v8583_v35 = vmin.f32 %v3455_v63, 16.0  ;;  %v8585_v25 = vadd.f32 1.0, %v2276_v34  ;;  %v2434_v30 = vmul.f32 %v2433_v31, %v9928_v26  ;;  %v3280_v18 = vsub.f32 1.0, %v8554_v5 }
 0x415   : > { %5247 = vrcp.f32 %v8575_v1  ;;  %v3420_v55 = vadd.f32 0.0036580483, %v3419_v60  ;;  %v8590_v53 = vadd.f32 1.0, %v2316_v22  ;;  %v3300_v24 = vadd.f32 0.0036580483, %v3299_v32 }
 0x416   : > { %v3337_v6 = vmul.f32 2.1237322e-06, %v8498_v14  ;;  %v3384_v3 = vadd.f32 0.18741608, %v3383_v9  ;;  %v2474_v47 = vmul.f32 %v2473_v44, %v9929_v62  ;;  %v3316_v52 = vmul.f32 %v3315_v50, %v8454_v0 }
 0x417   : > { %v3436_v63 = vmul.f32 %v3435_v23, %v8477_v58  ;;  %5249 = vrcp.f32 %v8585_v25  ;;  %v2353_v37 = vadd.f32 0.112945676, %v2352_v41  ;;  %v9931_v5 = vand.u32 2147483648, %v8502_v8 }
 0x418   : > { %v3354_v60 = vmul.f32 %v3353_v10, %v8498_v14  ;;  %v3468_v32 = vmul.f32 3.8918573e-05, %v8583_v35  ;;  %v2435_v36 = vadd.f32 0.4994258, %v2434_v30  ;;  %v3281_v12 = vmul.f32 %v8539_v54, %v3280_v18 }
 0x419   : > { %v8599_v28 = vor.u32 1.1754944e-38, %v9931_v5  ;;  %v3421_v44 = vmul.f32 %v3420_v55, %v8477_v58  ;;  %v8606_v50 = vadd.f32 %v1159_v29, %v9806_v59  ;;  %5251 = vrcp.f32 %v8590_v53 }
 0x41a   : > { %v8610_v9 = vmul.f32 %v3300_v24, %v8454_v0  ;;  %v3385_v34 = vmul.f32 %v3384_v3, %v8412_v61  ;;  %v2436_v31 = vmul.f32 %v2435_v36, %v9928_v26  ;;  %v2475_v23 = vadd.f32 0.4994258, %v2474_v47  ;;  %v9934_v36 = vld [vmem:[#allocation69_spill] sm:$0xff] }
 0x41b   : > { %9932 = vst [vmem:[#allocation55_spill] sm:$0xff] %v8606_v50  ;;  %v8614_v22 = vpop.eup %5247  ;;  %v8616_v41 = vadd.f32 1.0, %v3316_v52  ;;  %v8618_v10 = vadd.f32 0.00028619796, %v3337_v6  ;;  %v8620_v30 = vadd.f32 1.0, %v3436_v63  ;;  %v2354_v18 = vmul.f32 %v2353_v37, %v7072_v51 }
 0x41c   : > { %v8623_v55 = vadd.f32 0.4994258, %v3354_v60  ;;  %v3469_v29 = vadd.f32 0.001143296, %v3468_v32  ;;  %v8625_v24 = vadd.f32 1.0, %v2436_v31  ;;  %v2476_v61 = vmul.f32 %v2475_v23, %v9929_v62 }
 0x41d   : > { %v5250_v3 = vpop.eup %5249  ;;  %v8629_v26 = vadd.f32 %v8539_v54, %v3281_v12  ;;  %v8631_v47 = vadd.f32 0.05243302, %v3421_v44  ;;  %v8634_v6 = vmul.f32 0.70710677, %v8606_v50  ;;  %v2355_v52 = vadd.f32 0.4994258, %v2354_v18 }
 0x41e   : > { %v8636_v63 = vadd.f32 1.1283791, %v3385_v34  ;;  %v8640_v37 = vmul.f32 %v8614_v22, %v8575_v1  ;;  %v2279_v5 = vmul.f32 %v5250_v3, %v8585_v25  ;;  %5253 = vrcp.f32 %v8625_v24  ;;  %v9935_v50 = vld [vmem:[#allocation24_spill] sm:$0xff] }
 0x41f   : > { %9933 = vst [vmem:[#allocation61_spill] sm:$0xff] %v8634_v6  ;;  %v5252_v62 = vpop.eup %5251  ;;  %5255 = vrcp.f32 %v8620_v30  ;;  %v2287_v60 = vand.u32 2147483647, %v8585_v25  ;;  %v8646_v32 = vadd.f32 1.0, %v2476_v61  ;;  %v2508_v12 = vmul.f32 3.8918573e-05, %v9934_v36 }
 0x420   : > { %v8650_v44 = vmul.f32 %v3469_v29, %v8583_v35  ;;  %v2280_v34 = vsub.f32 1.0, %v2279_v5  ;;  %v2319_v31 = vmul.f32 %v5252_v62, %v8590_v53  ;;  %v2356_v23 = vmul.f32 %v2355_v52, %v7072_v51 }
 0x421   : > { %v3495_v18 = vmul.f32 %v8634_v6, %v8634_v6  ;;  %v2289_v59 = vand.u32 2147483648, %v8585_v25  ;;  %5257 = vrcp.f32 %v8646_v32  ;;  %v2388_v61 = vmul.f32 3.8918573e-05, %v9935_v50 }
 0x422   : > { %v2281_v7 = vmul.f32 %v5250_v3, %v2280_v34  ;;  %vm2283_vm1 = vweird.f32 %v8585_v25  ;;  %vm2284_vm2 = vweird.f32 %v5250_v3  ;;  %v2320_v29 = vsub.f32 1.0, %v2319_v31 }
 0x423   : > { %vm8660_vm3 = vcmp.eq.f32.partialorder %v2287_v60, 8.507059e+37  ;;  %v2329_v51 = vand.u32 2147483648, %v8590_v53  ;;  %v8665_v52 = vadd.f32 1.0, %v2356_v23  ;;  %v2509_v6 = vadd.f32 0.001143296, %v2508_v12  ;;  %vm2285_vm5 = vmor %vm2283_vm1, %vm2284_vm2 }
 0x424   : > { %v5254_v27 = vpop.eup %5253  ;;  %v2282_v33 = vadd.f32 %v5250_v3, %v2281_v7  ;;  %v2321_v57 = vmul.f32 %v5252_v62, %v2320_v29  ;;  %vm2324_vm4 = vweird.f32 %v5252_v62  ;;  %v2327_v38 = vand.u32 2147483647, %v8590_v53 }
 0x425   : > { %v8668_v34 = vpop.eup %5255  ;;  %v2290_v25 = vor.u32 1.1754944e-38, %v2289_v59  ;;  %v2439_v60 = vmul.f32 %v5254_v27, %v8625_v24  ;;  %vm2323_vm6 = vweird.f32 %v8590_v53  ;;  %v2389_v31 = vadd.f32 0.001143296, %v2388_v61 }
 0x426   : > { %v2286_v19 = vsel %vm2285_vm5, %v5250_v3, %v2282_v33  ;;  %v2449_v23 = vand.u32 2147483648, %v8625_v24  ;;  %v2322_v16 = vadd.f32 %v5252_v62, %v2321_v57  ;;  %5259 = vrcp.f32 %v8665_v52  ;;  %vm2325_vm7 = vmor %vm2323_vm6, %vm2324_vm4  ;;  %v9938_v3 = vld [vmem:[#allocation74_spill] sm:$0xff] }
 0x427   : > { %v5258_v7 = vpop.eup %5257  ;;  %v2291_v12 = vsel %vm8660_vm3, %v2290_v25, %v2286_v19  ;;  %v2440_v29 = vsub.f32 1.0, %v2439_v60  ;;  %v2330_v21 = vor.u32 1.1754944e-38, %v2329_v51  ;;  %v2510_v59 = vmul.f32 %v2509_v6, %v9934_v36  ;;  %v9939_v25 = vld [vmem:[#allocation70_spill] sm:$0xff] }
 0x428   : > { %v2447_v11 = vand.u32 2147483647, %v8625_v24  ;;  %v2326_v53 = vsel %vm2325_vm7, %v5252_v62, %v2322_v16  ;;  %vm2328_vm8 = vcmp.eq.f32.partialorder %v2327_v38, 8.507059e+37  ;;  %v2479_v33 = vmul.f32 %v5258_v7, %v8646_v32  ;;  %v9940_v62 = vld [vmem:[#allocation76_spill] sm:$0xff] }
 0x429   : > { %v2292_v57 = vmul.f32 %v2291_v12, %v9938_v3  ;;  %v2441_v61 = vmul.f32 %v5254_v27, %v2440_v29  ;;  %vm2444_vm9 = vweird.f32 %v5254_v27  ;;  %v2331_v13 = vsel %vm2328_vm8, %v2330_v21, %v2326_v53 }
 0x42a   : > { %vm2443_vm10 = vweird.f32 %v8625_v24  ;;  %v2450_v19 = vor.u32 1.1754944e-38, %v2449_v23  ;;  %v2480_v5 = vsub.f32 1.0, %v2479_v33  ;;  %v2548_v60 = vmul.f32 3.8918573e-05, %v9939_v25 }
 0x42b   : > { %v2442_v51 = vadd.f32 %v5254_v27, %v2441_v61  ;;  %v2489_v6 = vand.u32 2147483648, %v8646_v32  ;;  %v2511_v42 = vadd.f32 0.014752088, %v2510_v59  ;;  %v2390_v16 = vmul.f32 %v2389_v31, %v9935_v50  ;;  %vm2445_vm11 = vmor %vm2443_vm10, %vm2444_vm9  ;;  %v9941_v59 = vld [vmem:[#allocation80_spill] sm:$0xff] }
 0x42c   : > { %v8685_v38 = vpop.eup %5259  ;;  %v2332_v12 = vmul.f32 %v2331_v13, %v9940_v62  ;;  %v2481_v29 = vmul.f32 %v5258_v7, %v2480_v5  ;;  %vm2484_vm12 = vweird.f32 %v5258_v7  ;;  %v2487_v21 = vand.u32 2147483647, %v8646_v32 }
 0x42d   : > { %v8689_v24 = vmin.f32 %v3495_v18, 16.0  ;;  %v4794_v23 = vclamps-f32 %v2292_v57, 1.0  ;;  %v2446_v53 = vsel %vm2445_vm11, %v5254_v27, %v2442_v51  ;;  %vm2448_vm13 = vcmp.eq.f32.partialorder %v2447_v11, 8.507059e+37  ;;  %v9942_v51 = vld [vmem:[#allocation81_spill] sm:$0xff] }
 0x42e   : > { %v2451_v33 = vsel %vm2448_vm13, %v2450_v19, %v2446_v53  ;;  %v2482_v3 = vadd.f32 %v5258_v7, %v2481_v29  ;;  %vm2483_vm14 = vweird.f32 %v8646_v32  ;;  %v2359_v31 = vmul.f32 %v8685_v38, %v8665_v52 }
 0x42f   : > { %v2452_v61 = vmul.f32 %v2451_v33, %v9941_v59  ;;  %vm2485_vm15 = vmor %vm2483_vm14, %vm2484_vm12  ;;  %v2490_v13 = vor.u32 1.1754944e-38, %v2489_v6  ;;  %v2512_v5 = vmul.f32 %v2511_v42, %v9934_v36  ;;  %v2391_v62 = vadd.f32 0.014752088, %v2390_v16 }
 0x430   : > { %v4795_v49 = vclamps-f32 %v2332_v12, 1.0  ;;  %v2486_v18 = vsel %vm2485_vm15, %v5258_v7, %v2482_v3  ;;  %vm2488_vm0 = vcmp.eq.f32.partialorder %v2487_v21, 8.507059e+37  ;;  %v2549_v57 = vadd.f32 0.001143296, %v2548_v60 }
 0x431   : > { %vm3284_vm1 = vweird.f32 %v8539_v54  ;;  %v4798_v11 = vclamps-f32 %v2452_v61, 1.0  ;;  %v3879_v27 = vadd.f32 1.0, %v4794_v23  ;;  %v2491_v19 = vsel %vm2488_vm0, %v2490_v13, %v2486_v18  ;;  %v9944_v13 = vld [vmem:[#allocation47_spill] sm:$0xff] }
 0x432   : > { %v2513_v32 = vadd.f32 0.112945676, %v2512_v5  ;;  %v2492_v29 = vmul.f32 %v2491_v19, %v9942_v51  ;;  %v2360_v53 = vsub.f32 1.0, %v2359_v31  ;;  %v2392_v33 = vmul.f32 %v2391_v62, %v9935_v50  ;;  %v9943_v31 = vld [vmem:[#allocation25_spill] sm:$0xff] }
 0x433   : > { %v2550_v6 = vmul.f32 %v2549_v57, %v9939_v25  ;;  %vm3283_vm2 = vweird.f32 %v8502_v8  ;;  %v3471_v42 = vadd.f32 0.014752088, %v8650_v44  ;;  %v3508_v7 = vmul.f32 3.8918573e-05, %v8689_v24 }
 0x434   : > { %v3883_v60 = vadd.f32 1.0, %v4798_v11  ;;  %v2514_v16 = vmul.f32 %v2513_v32, %v9934_v36  ;;  %v4799_v12 = vclamps-f32 %v2492_v29, 1.0  ;;  %v3880_v21 = vadd.f32 1.0, %v4795_v49  ;;  %v9945_v29 = vld [vmem:[#allocation26_spill] sm:$0xff]  ;;  %vm8730_vm4 = vmor %vm3283_vm2, %vm3284_vm1 }
 0x435   : > { %v2393_v23 = vadd.f32 0.112945676, %v2392_v33  ;;  %v2551_v3 = vadd.f32 0.014752088, %v2550_v6  ;;  %v3400_v59 = vsub.f32 1.0, %v8640_v37  ;;  %v3943_v61 = vmul.f32 %v3879_v27, %v9943_v31  ;;  %v9946_v33 = vld [vmem:[#allocation73_spill] sm:$0xff] }
 0x436   : > { %v3947_v5 = vmul.f32 %v3883_v60, %v9944_v13  ;;  %v2515_v62 = vadd.f32 0.4994258, %v2514_v16  ;;  %v3884_v18 = vadd.f32 1.0, %v4799_v12  ;;  %v2361_v57 = vmul.f32 %v8685_v38, %v2360_v53 }
 0x437   : > { %v2394_v44 = vmul.f32 %v2393_v23, %v9935_v50  ;;  %v2552_v11 = vmul.f32 %v2551_v3, %v9939_v25  ;;  %v3472_v19 = vmul.f32 %v3471_v42, %v8583_v35  ;;  %v3509_v32 = vadd.f32 0.001143296, %v3508_v7 }
 0x438   : > { %v3995_v49 = vpack.c.bf16 %v3947_v5, %v3943_v61  ;;  %v2516_v51 = vmul.f32 %v2515_v62, %v9934_v36  ;;  %v3944_v37 = vmul.f32 %v3880_v21, %v9945_v29  ;;  %v3948_v27 = vmul.f32 %v3884_v18, %v9946_v33 }
 0x439   : > { %v2395_v6 = vadd.f32 0.4994258, %v2394_v44  ;;  %v2553_v60 = vadd.f32 0.112945676, %v2552_v11  ;;  %v3401_v16 = vmul.f32 %v8614_v22, %v3400_v59  ;;  %v3423_v53 = vmul.f32 %v8631_v47, %v8477_v58 }
 0x43a   : > { %4298 = vmatmul.bf16.gmra.mxu0 %v3995_v49  ;;  %vm2364_vm3 = vweird.f32 %v8685_v38  ;;  %v8718_v12 = vadd.f32 1.0, %v2516_v51  ;;  %v3996_v42 = vpack.c.bf16 %v3948_v27, %v3944_v37  ;;  %v2362_v7 = vadd.f32 %v8685_v38, %v2361_v57 }
 0x43b   : > { %v2396_v36 = vmul.f32 %v2395_v6, %v9935_v50  ;;  %v2554_v21 = vmul.f32 %v2553_v60, %v9939_v25  ;;  %v3473_v23 = vadd.f32 0.112945676, %v3472_v19  ;;  %v3510_v3 = vmul.f32 %v3509_v32, %v8689_v24 }
 0x43c   : > { %v2369_v59 = vand.u32 2147483648, %v8665_v52  ;;  %5261 = vrcp.f32 %v8718_v12  ;;  %4347 = vmatmul.bf16.gmra.mxu1 %v3996_v42  ;;  %vm2363_vm5 = vweird.f32 %v8665_v52  ;;  %v2367_v50 = vand.u32 2147483647, %v8665_v52 }
 0x43d   : > { %v8736_v31 = vadd.f32 1.0, %v2396_v36  ;;  %v2555_v61 = vadd.f32 0.4994258, %v2554_v21  ;;  %5263 = vrcp.f32 %v8616_v41  ;;  %v8745_v5 = vmul.f32 %v8623_v55, %v8498_v14  ;;  %vm8751_vm6 = vmor %vm2363_vm5, %vm2364_vm3 }
 0x43e   : > { %v3439_v62 = vmul.f32 %v8668_v34, %v8620_v30  ;;  %v3409_v18 = vand.u32 2147483648, %v8575_v1  ;;  %v3424_v57 = vadd.f32 0.18741608, %v3423_v53  ;;  %v2366_v44 = vsel %vm8751_vm6, %v8685_v38, %v2362_v7 }
 0x43f   : > { %5265 = vrcp.f32 %v8736_v31  ;;  %v3474_v55 = vmul.f32 %v3473_v23, %v8583_v35  ;;  %v3511_v11 = vadd.f32 0.014752088, %v3510_v3  ;;  %v2370_v19 = vor.u32 1.1754944e-38, %v2369_v59  ;;  %v9953_v23 = vld [vmem:[#allocation77_spill] sm:$0xff] }
 0x440   : > { %v2556_v32 = vmul.f32 %v2555_v61, %v9939_v25  ;;  %v8764_v49 = vmul.f32 %v8636_v63, %v8369_v43  ;;  %v8767_v51 = vadd.f32 %v8614_v22, %v3401_v16  ;;  %vm3404_vm7 = vweird.f32 %v8614_v22 }
 0x441   : > { %vm2368_vm8 = vcmp.eq.f32.partialorder %v2367_v50, 8.507059e+37  ;;  %vm3403_vm9 = vweird.f32 %v8575_v1  ;;  %v3440_v38 = vsub.f32 1.0, %v3439_v62  ;;  %v8774_v25 = vor.u32 1.1754944e-38, %v3409_v18 }
 0x442   : > { %v5262_v29 = vpop.eup %5261  ;;  %v2371_v37 = vsel %vm2368_vm8, %v2370_v19, %v2366_v44  ;;  %v8771_v33 = vadd.f32 1.0, %v2556_v32  ;;  %v3457_v43 = vmul.f32 2.1237322e-06, %v8583_v35  ;;  %vm8780_vm10 = vmor %vm3403_vm9, %vm3404_vm7  ;;  %v8785_v16 = vmul.f32 %v3424_v57, %v8477_v58  ;;  %v9954_v19 = vld [vmem:[#allocation50_spill] sm:$0xff] }
 0x443   : > { %v2519_v63 = vmul.f32 %v5262_v29, %v8718_v12  ;;  %v8778_v6 = vpop.eup %5263  ;;  %v3475_v53 = vadd.f32 0.4994258, %v3474_v55  ;;  %v3512_v42 = vmul.f32 %v3511_v11, %v8689_v24  ;;  %v2372_v3 = vmul.f32 %v2371_v37, %v9953_v23  ;;  %v9955_v32 = vld [vmem:[#allocation38_spill] sm:$0xff] }
 0x444   : > { %5267 = vrcp.f32 %v8771_v33  ;;  %v3441_v50 = vmul.f32 %v8668_v34, %v3440_v38  ;;  %v2529_v61 = vand.u32 2147483648, %v8718_v12  ;;  %v3458_v52 = vadd.f32 0.00028619796, %v3457_v43  ;;  %v9958_v58 = vld [vmem:[#allocation82_spill] sm:$0xff] }
 0x445   : > { %v5266_v7 = vpop.eup %5265  ;;  %v2520_v59 = vsub.f32 1.0, %v2519_v63  ;;  %vm2524_vm11 = vweird.f32 %v5262_v29  ;;  %v2527_v57 = vand.u32 2147483647, %v8718_v12  ;;  %v3476_v44 = vmul.f32 %v3475_v53, %v8583_v35 }
 0x446   : > { %v2399_v62 = vmul.f32 %v5266_v7, %v8736_v31  ;;  %v3513_v55 = vadd.f32 0.112945676, %v3512_v42  ;;  %v3999_v37 = vpack.c.bf16 %v9955_v32, %v9954_v19  ;;  %v4796_v63 = vclamps-f32 %v2372_v3, 1.0  ;;  %v9956_v3 = vld [vmem:[#allocation22_spill] sm:$0xff] }
 0x447   : > { %v2521_v18 = vmul.f32 %v5262_v29, %v2520_v59  ;;  %vm2523_vm12 = vweird.f32 %v8718_v12  ;;  %v2409_v23 = vand.u32 2147483648, %v8736_v31  ;;  %vm3443_vm13 = vweird.f32 %v8620_v30 }
 0x448   : > { %v2400_v11 = vsub.f32 1.0, %v2399_v62  ;;  %vm2525_vm14 = vmor %vm2523_vm12, %vm2524_vm11  ;;  %v2530_v43 = vor.u32 1.1754944e-38, %v2529_v61  ;;  %vm2404_vm15 = vweird.f32 %v5266_v7  ;;  %v2407_v53 = vand.u32 2147483647, %v8736_v31 }
 0x449   : > { %v2522_v38 = vadd.f32 %v5262_v29, %v2521_v18  ;;  %vm2528_vm0 = vcmp.eq.f32.partialorder %v2527_v57, 8.507059e+37  ;;  %v9957_v18 = vld [vmem:[#allocation31_spill] sm:$0xff]  ;;  %v3514_v12 = vmul.f32 %v3513_v55, %v8689_v24  ;;  %vm2403_vm1 = vweird.f32 %v8736_v31 }
 0x44a   : > { %v5268_v13 = vpop.eup %5267  ;;  %v2401_v59 = vmul.f32 %v5266_v7, %v2400_v11  ;;  %4303 = vmatmul.bf16.gmra.mxu0 %v3999_v37  ;;  %v4000_v19 = vpack.c.bf16 %v9957_v18, %v9956_v3  ;;  %v3881_v11 = vadd.f32 1.0, %v4796_v63  ;;  %vm2405_vm2 = vmor %vm2403_vm1, %vm2404_vm15  ;;  %v2410_v36 = vor.u32 1.1754944e-38, %v2409_v23  ;;  %v9959_v63 = vld [vmem:[#allocation79_spill] sm:$0xff] }
 0x44b   : > { %v2526_v42 = vsel %vm2525_vm14, %v5262_v29, %v2522_v38  ;;  %v2559_v62 = vmul.f32 %v5268_v13, %v8771_v33  ;;  %vm2408_vm3 = vcmp.eq.f32.partialorder %v2407_v53, 8.507059e+37  ;;  %v2567_v57 = vand.u32 2147483647, %v8771_v33 }
 0x44c   : > { %v2531_v32 = vsel %vm2528_vm0, %v2530_v43, %v2526_v42  ;;  %v2402_v21 = vadd.f32 %v5266_v7, %v2401_v59  ;;  %4352 = vmatmul.bf16.gmra.mxu1 %v4000_v19  ;;  %v2569_v37 = vand.u32 2147483648, %v8771_v33  ;;  %vm2564_vm5 = vweird.f32 %v5268_v13  ;;  %v9960_v59 = vld [vmem:[#allocation34_spill] sm:$0xff] }
 0x44d   : > { %v2532_v61 = vmul.f32 %v2531_v32, %v9958_v58  ;;  %v2560_v27 = vsub.f32 1.0, %v2559_v62  ;;  %vm3204_vm6 = vweird.f32 %v8468_v45  ;;  %v3442_v31 = vadd.f32 %v8668_v34, %v3441_v50 }
 0x44e   : > { %v2406_v29 = vsel %vm2405_vm2, %v5266_v7, %v2402_v21  ;;  %vm3444_vm7 = vweird.f32 %v8668_v34  ;;  %v3459_v58 = vmul.f32 %v3458_v52, %v8583_v35  ;;  %v8820_v7 = vadd.f32 1.0, %v3476_v44  ;;  %v9963_v44 = vld [vmem:[#allocation75_spill] sm:$0xff] }
 0x44f   : > { %v4800_v38 = vclamps-f32 %v2532_v61, 1.0  ;;  %v2411_v3 = vsel %vm2408_vm3, %v2410_v36, %v2406_v29  ;;  %v2561_v55 = vmul.f32 %v5268_v13, %v2560_v27  ;;  %vm2563_vm8 = vweird.f32 %v8771_v33  ;;  %vm8828_vm12 = vmor %vm3443_vm13, %vm3444_vm7 }
 0x450   : > { %v2412_v23 = vmul.f32 %v2411_v3, %v9959_v63  ;;  %vm3203_vm9 = vweird.f32 %v8398_v15  ;;  %v3497_v27 = vmul.f32 2.1237322e-06, %v8689_v24  ;;  %v3515_v36 = vadd.f32 0.4994258, %v3514_v12  ;;  %vm2565_vm11 = vmor %vm2563_vm8, %vm2564_vm5 }
 0x451   : > { %v3885_v21 = vadd.f32 1.0, %v4800_v38  ;;  %v2562_v43 = vadd.f32 %v5268_v13, %v2561_v55  ;;  %v3945_v53 = vmul.f32 %v3881_v11, %v9960_v59  ;;  %v2570_v50 = vor.u32 1.1754944e-38, %v2569_v37 }
 0x452   : > { %v4797_v62 = vclamps-f32 %v2412_v23, 1.0  ;;  %vm2568_vm14 = vcmp.eq.f32.partialorder %v2567_v57, 8.507059e+37  ;;  %v9964_v33 = vand.u32 2147483647, %v8575_v1  ;;  %v3426_v19 = vadd.f32 1.1283791, %v8785_v16 }
 0x453   : > { %v3949_v42 = vmul.f32 %v3885_v21, %v9963_v44  ;;  %v2566_v18 = vsel %vm2565_vm11, %v5268_v13, %v2562_v43  ;;  %v3446_v12 = vsel %vm8828_vm12, %v8668_v34, %v3442_v31  ;;  %v9965_v61 = vsel %vm8780_vm10, %v8614_v22, %v8767_v51  ;;  %v9967_v1 = vld [vmem:[#allocation83_spill] sm:$0xff] }
 0x454   : > { %vm3408_vm15 = vcmp.eq.f32.partialorder %v9964_v33, 8.507059e+37  ;;  %v2571_v32 = vsel %vm2568_vm14, %v2570_v50, %v2566_v18  ;;  %v9966_v13 = vand.u32 2147483648, %v8620_v30  ;;  %v9968_v16 = vand.u32 2147483647, %v8620_v30 }
 0x455   : > { %v3411_v11 = vsel %vm3408_vm15, %v8774_v25, %v9965_v61  ;;  %v3997_v57 = vpack.c.bf16 %v3949_v42, %v3945_v53  ;;  %v2572_v37 = vmul.f32 %v2571_v32, %v9967_v1  ;;  %v3460_v38 = vadd.f32 0.0036580483, %v3459_v58 }
 0x456   : > { %v3450_v29 = vor.u32 1.1754944e-38, %v9966_v13  ;;  %vm3448_vm13 = vcmp.eq.f32.partialorder %v9968_v16, 8.507059e+37  ;;  %5269 = vrcp.f32 %v8820_v7  ;;  %v3516_v34 = vmul.f32 %v3515_v36, %v8689_v24 }
 0x457   : > { %v3498_v3 = vadd.f32 0.00028619796, %v3497_v27  ;;  %4396 = vmatmul.bf16.gmra.mxu2 %v3997_v57  ;;  %v4801_v22 = vclamps-f32 %v2572_v37, 1.0  ;;  %v3882_v51 = vadd.f32 1.0, %v4797_v62  ;;  %v9969_v25 = vand.u32 2147483647, %v8502_v8 }
 0x458   : > { %v3451_v60 = vsel %vm3448_vm13, %v3450_v29, %v3446_v12  ;;  %v3412_v55 = vmul.f32 %v3411_v11, %v8764_v49  ;;  %v3427_v31 = vmul.f32 %v3426_v19, %v8437_v48  ;;  %v4003_v30 = vpack.c.bf16 %v8373_v20, %v8132_v2  ;;  %v9977_v19 = vld [vmem:[#allocation54_spill] sm:$0xff]  ;;  %v9978_v12 = vld [vmem:[#allocation27_spill] sm:$0xff]  ;;  %v9979_v37 = vld [vmem:[#allocation44_spill] sm:$0xff] }
 0x459   : > { %vm3288_vm10 = vcmp.eq.f32.partialorder %v9969_v25, 8.507059e+37  ;;  %v9970_v58 = vsel %vm8730_vm4, %v8539_v54, %v8629_v26  ;;  %v3302_v23 = vadd.f32 0.05243302, %v8610_v9  ;;  %v3339_v8 = vmul.f32 %v8618_v10, %v8498_v14  ;;  %vm8877_vm4 = vmor %vm3203_vm9, %vm3204_vm6  ;;  %v9974_v10 = vld [vmem:[#allocation78_spill] sm:$0xff] }
 0x45a   : > { %v3291_v63 = vsel %vm3288_vm10, %v8599_v28, %v9970_v58  ;;  %v3886_v21 = vadd.f32 1.0, %v4801_v22  ;;  %v8868_v49 = vadd.f32 1.0, %v8745_v5  ;;  %v3452_v48 = vmul.f32 %v3451_v60, %v3427_v31  ;;  %4308 = vmatmul.bf16.gmra.mxu0 %v4003_v30  ;;  %v9973_v28 = vld [vmem:[#allocation28_spill] sm:$0xff]  ;;  %v9981_v30 = vld [vmem:[#allocation33_spill] sm:$0xff] }
 0x45b   : > { %v3461_v43 = vmul.f32 %v3460_v38, %v8583_v35  ;;  %v8871_v2 = vadd.f32 1.0, %v3516_v34  ;;  %v3499_v54 = vmul.f32 %v3498_v3, %v8689_v24  ;;  %v3946_v9 = vmul.f32 %v3882_v51, %v9973_v28  ;;  %v9980_v34 = vld [vmem:[#allocation42_spill] sm:$0xff]  ;;  %v9984_v28 = vld [vmem:[#allocation63_spill] sm:$0xff] }
 0x45c   : > { %v3950_v26 = vmul.f32 %v3886_v21, %v9974_v10  ;;  %v4004_v47 = vpack.c.bf16 %v8378_v56, %v8343_v4  ;;  %v8886_v5 = vpop.eup %5269  ;;  %v3206_v27 = vsel %vm8877_vm4, %v8468_v45, %v8529_v39  ;;  %v3207_v36 = vand.u32 2147483647, %v8398_v15 }
 0x45d   : > { %v9975_v59 = vand.u32 2147483648, %v8398_v15  ;;  %v4822_v50 = vclamps-f32 %v3412_v55, 1.0  ;;  %v3292_v52 = vmul.f32 %v3291_v63, %v8534_v40  ;;  %v3303_v44 = vmul.f32 %v3302_v23, %v8454_v0  ;;  %v9976_v40 = vld [vmem:[#allocation52_spill] sm:$0xff] }
 0x45e   : > { %v3340_v42 = vadd.f32 0.0036580483, %v3339_v8  ;;  %v3998_v62 = vpack.c.bf16 %v3950_v26, %v3946_v9  ;;  %4357 = vmatmul.bf16.gmra.mxu1 %v4004_v47  ;;  %v4818_v4 = vclamps-f32 %v8531_v46, 1.0  ;;  %v3319_v56 = vmul.f32 %v8778_v6, %v8616_v41 }
 0x45f   : > { %v3210_v53 = vor.u32 1.1754944e-38, %v9975_v59  ;;  %v3462_v18 = vadd.f32 0.05243302, %v3461_v43  ;;  %5271 = vrcp.f32 %v8871_v2  ;;  %v4823_v15 = vclamps-f32 %v3452_v48, 1.0  ;;  %v9982_v48 = vld [vmem:[#allocation71_spill] sm:$0xff]  ;;  %v9983_v43 = vld [vmem:[#allocation32_spill] sm:$0xff] }
 0x460   : > { %5273 = vrcp.f32 %v8868_v49  ;;  %v3479_v45 = vmul.f32 %v8886_v5, %v8820_v7  ;;  %v3500_v39 = vadd.f32 0.0036580483, %v3499_v54  ;;  %4445 = vmatmul.bf16.gmra.mxu3 %v3998_v62  ;;  %v3172_v33 = vmul.f32 %v9976_v40, %v8388_v17 }
 0x461   : > { %v3187_v46 = vmul.f32 %v9978_v12, %v9977_v19  ;;  %vm3208_vm0 = vcmp.eq.f32.partialorder %v3207_v36, 8.507059e+37  ;;  %v3907_v32 = vadd.f32 1.0, %v4822_v50  ;;  %v4819_v11 = vclamps-f32 %v3292_v52, 1.0 }
 0x462   : > { %v3211_v61 = vsel %vm3208_vm0, %v3210_v53, %v3206_v27  ;;  %v3304_v13 = vadd.f32 0.18741608, %v3303_v44  ;;  %v3341_v29 = vmul.f32 %v3340_v42, %v8498_v14  ;;  %v3903_v57 = vadd.f32 1.0, %v4818_v4  ;;  %v9985_v53 = vld [vmem:[#allocation40_spill] sm:$0xff] }
 0x463   : > { %v3320_v1 = vsub.f32 1.0, %v3319_v56  ;;  %v1219_v16 = vmul.f32 0.5, %v9979_v37  ;;  %v3463_v38 = vmul.f32 %v3462_v18, %v8583_v35  ;;  %v1215_v60 = vmul.f32 0.5, %v9980_v34 }
 0x464   : > { %v3908_v3 = vadd.f32 1.0, %v4823_v15  ;;  %v3480_v17 = vsub.f32 1.0, %v3479_v45  ;;  %v3501_v22 = vmul.f32 %v3500_v39, %v8689_v24  ;;  %v4816_v25 = vclamps-f32 %v3172_v33, 1.0 }
 0x465   : > { %v8913_v51 = vpop.eup %5271  ;;  %v3212_v55 = vmul.f32 %v3211_v61, %v3187_v46  ;;  %v3971_v31 = vmul.f32 %v3907_v32, %v1219_v16  ;;  %v1220_v58 = vmul.f32 0.5, %v9981_v30  ;;  %v3904_v23 = vadd.f32 1.0, %v4819_v11  ;;  %v9988_v11 = vld [vmem:[#allocation60_spill] sm:$0xff] }
 0x466   : > { %v8916_v63 = vpop.eup %5273  ;;  %v3305_v8 = vmul.f32 %v3304_v13, %v8454_v0  ;;  %v3342_v21 = vadd.f32 0.05243302, %v3341_v29  ;;  %v4001_v20 = vpack.c.bf16 %v9983_v43, %v9982_v48  ;;  %v3967_v54 = vmul.f32 %v3903_v57, %v1215_v60  ;;  %v9989_v13 = vld [vmem:[#allocation41_spill] sm:$0xff]  ;;  %v9990_v57 = vld [vmem:[#allocation56_spill] sm:$0xff] }
 0x467   : > { %v1216_v9 = vmul.f32 0.5, %v9984_v28  ;;  %v3321_v10 = vmul.f32 %v8778_v6, %v3320_v1  ;;  %v3464_v26 = vadd.f32 0.18741608, %v3463_v38  ;;  %v3972_v47 = vmul.f32 %v3908_v3, %v1220_v58 }
 0x468   : > { %v3481_v27 = vmul.f32 %v8886_v5, %v3480_v17  ;;  %v3502_v36 = vadd.f32 0.05243302, %v3501_v22  ;;  %v3519_v59 = vmul.f32 %v8913_v51, %v8871_v2  ;;  %4401 = vmatmul.bf16.gmra.mxu2 %v4001_v20  ;;  %v1213_v0 = vmul.f32 0.5, %v9985_v53  ;;  %v1015_v22 = vpop.f32.mrf.mxu0  ;;  %v9996_v20 = vld [vmem:[#allocation62_spill] sm:$0xff] }
 0x469   : > { %v3901_v50 = vadd.f32 1.0, %v4816_v25  ;;  %v3359_v52 = vmul.f32 %v8916_v63, %v8868_v49  ;;  %v4007_v44 = vpack.c.bf16 %v3971_v31, %v3967_v54  ;;  %v4817_v42 = vclamps-f32 %v3212_v55, 1.0  ;;  %v9994_v31 = vld [vmem:[#allocation18_spill] sm:$0xff] }
 0x46a   : > { %v3968_v62 = vmul.f32 %v3904_v23, %v1216_v9  ;;  %v3306_v4 = vadd.f32 1.1283791, %v3305_v8  ;;  %v3343_v56 = vmul.f32 %v3342_v21, %v8498_v14  ;;  %v3322_v18 = vadd.f32 %v8778_v6, %v3321_v10  ;;  %v9995_v23 = vld [vmem:[#allocation66_spill] sm:$0xff] }
 0x46b   : > { %vm3324_vm1 = vweird.f32 %v8778_v6  ;;  %v3465_v15 = vmul.f32 %v3464_v26, %v8583_v35  ;;  %vm3484_vm2 = vweird.f32 %v8886_v5  ;;  %4313 = vmatmul.bf16.gmra.mxu0 %v4007_v44  ;;  %v3482_v45 = vadd.f32 %v8886_v5, %v3481_v27 }
 0x46c   : > { %v3503_v39 = vmul.f32 %v3502_v36, %v8689_v24  ;;  %v3520_v40 = vsub.f32 1.0, %v3519_v59  ;;  %v4008_v33 = vpack.c.bf16 %v3972_v47, %v3968_v62  ;;  %vm3323_vm3 = vweird.f32 %v8616_v41  ;;  %v9997_v36 = vld [vmem:[#allocation30_spill] sm:$0xff]  ;;  %v9998_v59 = vld [vmem:[#allocation49_spill] sm:$0xff] }
 0x46d   : > { %v3329_v19 = vand.u32 2147483648, %v8616_v41  ;;  %v3360_v12 = vsub.f32 1.0, %v3359_v52  ;;  %v3489_v46 = vand.u32 2147483648, %v8820_v7  ;;  %vm8939_vm5 = vmor %vm3323_vm3, %vm3324_vm1  ;;  %v3327_v35 = vand.u32 2147483647, %v8616_v41 }
 0x46e   : > { %vm3483_vm6 = vweird.f32 %v8820_v7  ;;  %v3487_v61 = vand.u32 2147483647, %v8820_v7  ;;  %v4002_v29 = vpack.c.bf16 %v9989_v13, %v9988_v11  ;;  %4362 = vmatmul.bf16.gmra.mxu1 %v4008_v33  ;;  %v9991_v1 = vclamps-f32 %v9990_v57, 1.0  ;;  %v10005_v11 = vld [vmem:[#allocation35_spill] sm:$0xff] }
 0x46f   : > { %v3965_v16 = vmul.f32 %v3901_v50, %v1213_v0  ;;  %v3326_v38 = vsel %vm8939_vm5, %v8778_v6, %v3322_v18  ;;  %v3344_v34 = vadd.f32 0.18741608, %v3343_v56  ;;  %vm8955_vm7 = vmor %vm3483_vm6, %vm3484_vm2  ;;  %v3466_v7 = vadd.f32 1.1283791, %v3465_v15 }
 0x470   : > { %v3898_v37 = vadd.f32 1.0, %v9991_v1  ;;  %v3486_v60 = vsel %vm8955_vm7, %v8886_v5, %v3482_v45  ;;  %v3504_v3 = vadd.f32 0.18741608, %v3503_v39  ;;  %v3521_v17 = vmul.f32 %v8913_v51, %v3520_v40  ;;  %4450 = vmatmul.bf16.gmra.mxu3 %v4002_v29 }
 0x471   : > { %v3330_v25 = vor.u32 1.1754944e-38, %v3329_v19  ;;  %v3361_v6 = vmul.f32 %v8916_v63, %v3360_v12  ;;  %v3490_v55 = vor.u32 1.1754944e-38, %v3489_v46  ;;  %v8965_v30 = vadd.f32 %v1015_v22, %v9994_v31  ;;  %v10003_v12 = vld [vmem:[#allocation29_spill] sm:$0xff] }
 0x472   : > { %v3902_v58 = vadd.f32 1.0, %v4817_v42  ;;  %v3307_v8 = vmul.f32 %v3306_v4, %v9995_v23  ;;  %vm3328_vm8 = vcmp.eq.f32.partialorder %v3327_v35, 8.507059e+37  ;;  %vm3488_vm9 = vcmp.eq.f32.partialorder %v3487_v61, 8.507059e+37  ;;  %v10004_v35 = vld [vmem:[#allocation61_spill] sm:$0xff] }
 0x473   : > { %v3331_v21 = vsel %vm3328_vm8, %v3330_v25, %v3326_v38  ;;  %v3345_v5 = vmul.f32 %v3344_v34, %v8498_v14  ;;  %v3491_v48 = vsel %vm3488_vm9, %v3490_v55, %v3486_v60  ;;  %v8970_v43 = vmul.f32 0.70710677, %v8965_v30  ;;  %v10006_v60 = vld [vmem:[#allocation45_spill] sm:$0xff] }
 0x474   : > { %v3467_v54 = vmul.f32 %v3466_v7, %v9996_v20  ;;  %v3505_v28 = vmul.f32 %v3504_v3, %v8689_v24  ;;  %v3522_v9 = vadd.f32 %v8913_v51, %v3521_v17  ;;  %vm3524_vm11 = vweird.f32 %v8913_v51  ;;  %v10007_v17 = vld [vmem:[#allocation51_spill] sm:$0xff] }
 0x475   : > { %v3362_v10 = vadd.f32 %v8916_v63, %v3361_v6  ;;  %vm3364_vm12 = vweird.f32 %v8916_v63  ;;  %v3529_v26 = vand.u32 2147483648, %v8871_v2  ;;  %v3535_v14 = vmul.f32 %v8970_v43, %v8970_v43 }
 0x476   : > { %v3492_v47 = vmul.f32 %v3491_v48, %v3467_v54  ;;  %vm3523_vm14 = vweird.f32 %v8871_v2  ;;  %v3527_v27 = vand.u32 2147483647, %v8871_v2  ;;  %v4005_v24 = vpack.c.bf16 %v3965_v16, %v9997_v36  ;;  %v10008_v48 = vld [vmem:[#allocation19_spill] sm:$0xff] }
 0x477   : > { %v1214_v53 = vmul.f32 0.5, %v9998_v59  ;;  %vm3363_vm15 = vweird.f32 %v8868_v49  ;;  %v3369_v0 = vand.u32 2147483648, %v8868_v49  ;;  %vm8987_vm13 = vmor %vm3523_vm14, %vm3524_vm11  ;;  %v8991_v52 = vmin.f32 %v3535_v14, 16.0  ;;  %v10009_v14 = vld [vmem:[#allocation55_spill] sm:$0xff] }
 0x478   : > { %v3332_v44 = vmul.f32 %v3331_v21, %v3307_v8  ;;  %v3367_v42 = vand.u32 2147483647, %v8868_v49  ;;  %v3506_v62 = vadd.f32 1.1283791, %v3505_v28  ;;  %v3526_v2 = vsel %vm8987_vm13, %v8913_v51, %v3522_v9  ;;  %4406 = vmatmul.bf16.gmra.mxu2 %v4005_v24  ;;  %vm8999_vm10 = vmor %vm3363_vm15, %vm3364_vm12  ;;  %v1064_v21 = vpop.f32.mrf.mxu1  ;;  %v10010_v24 = vld [vmem:[#allocation53_spill] sm:$0xff] }
 0x479   : > { %v3966_v4 = vmul.f32 %v3902_v58, %v1214_v53  ;;  %v3346_v56 = vadd.f32 1.1283791, %v3345_v5  ;;  %v3530_v15 = vor.u32 1.1754944e-38, %v3529_v26  ;;  %v3548_v45 = vmul.f32 3.8918573e-05, %v8991_v52 }
 0x47a   : > { %v3366_v49 = vsel %vm8999_vm10, %v8916_v63, %v3362_v10  ;;  %v4824_v39 = vclamps-f32 %v3492_v47, 1.0  ;;  %vm3528_vm4 = vcmp.eq.f32.partialorder %v3527_v27, 8.507059e+37  ;;  %v3537_v51 = vmul.f32 2.1237322e-06, %v8991_v52 }
 0x47b   : > { %v3370_v40 = vor.u32 1.1754944e-38, %v3369_v0  ;;  %v3531_v33 = vsel %vm3528_vm4, %v3530_v15, %v3526_v2  ;;  %v3549_v19 = vadd.f32 0.001143296, %v3548_v45  ;;  %v3962_v46 = vmul.f32 %v3898_v37, %v10003_v12  ;;  %v1113_v15 = vpop.f32.mrf.mxu2  ;;  %v1162_v45 = vpop.f32.mrf.mxu3 }
 0x47c   : > { %v4820_v32 = vclamps-f32 %v3332_v44, 1.0  ;;  %vm3368_vm0 = vcmp.eq.f32.partialorder %v3367_v42, 8.507059e+37  ;;  %v3507_v61 = vmul.f32 %v3506_v62, %v10004_v35  ;;  %v3347_v13 = vmul.f32 %v3346_v56, %v10005_v11  ;;  %v1017_v12 = vpop.f32.mrf.mxu0 }
 0x47d   : > { %v3371_v29 = vsel %vm3368_vm0, %v3370_v40, %v3366_v49  ;;  %v3550_v57 = vmul.f32 %v3549_v19, %v8991_v52  ;;  %v3909_v1 = vadd.f32 1.0, %v4824_v39  ;;  %v4006_v16 = vpack.c.bf16 %v3966_v4, %v3962_v46  ;;  %v10011_v49 = vld [vmem:[#allocation20_spill] sm:$0xff] }
 0x47e   : > { %v3532_v63 = vmul.f32 %v3531_v33, %v3507_v61  ;;  %v3538_v38 = vadd.f32 0.00028619796, %v3537_v51  ;;  %v3905_v41 = vadd.f32 1.0, %v4820_v32  ;;  %v3372_v7 = vmul.f32 %v3371_v29, %v3347_v13  ;;  %v10012_v51 = vld [vmem:[#allocation21_spill] sm:$0xff] }
 0x47f   : > { %v3551_v34 = vadd.f32 0.014752088, %v3550_v57  ;;  %v1221_v3 = vmul.f32 0.5, %v10006_v60  ;;  %v1217_v22 = vmul.f32 0.5, %v10007_v17  ;;  %v9018_v20 = vadd.f32 %v1064_v21, %v10008_v48 }
 0x480   : > { %4455 = vmatmul.bf16.gmra.mxu3 %v4006_v16  ;;  %v4825_v6 = vclamps-f32 %v3532_v63, 1.0  ;;  %v3539_v55 = vmul.f32 %v3538_v38, %v8991_v52  ;;  %v4821_v8 = vclamps-f32 %v3372_v7, 1.0  ;;  %v1222_v47 = vmul.f32 0.5, %v10009_v14 }
 0x481   : > { %v3552_v37 = vmul.f32 %v3551_v34, %v8991_v52  ;;  %v3973_v25 = vmul.f32 %v3909_v1, %v1221_v3  ;;  %v3969_v23 = vmul.f32 %v3905_v41, %v1217_v22  ;;  %v9022_v27 = vmul.f32 0.70710677, %v9018_v20 }
 0x482   : > { %v3910_v54 = vadd.f32 1.0, %v4825_v6  ;;  %v3540_v9 = vadd.f32 0.0036580483, %v3539_v55  ;;  %v3906_v26 = vadd.f32 1.0, %v4821_v8  ;;  %v1218_v59 = vmul.f32 0.5, %v10010_v24 }
 0x483   : > { %v3553_v58 = vadd.f32 0.112945676, %v3552_v37  ;;  %v4009_v28 = vpack.c.bf16 %v3973_v25, %v3969_v23  ;;  %v3575_v50 = vmul.f32 %v9022_v27, %v9022_v27  ;;  %v9037_v39 = vadd.f32 %v1113_v15, %v10011_v49 }
 0x484   : > { %v3974_v53 = vmul.f32 %v3910_v54, %v1222_v47  ;;  %v3541_v0 = vmul.f32 %v3540_v9, %v8991_v52  ;;  %v3970_v42 = vmul.f32 %v3906_v26, %v1218_v59  ;;  %v9040_v40 = vadd.f32 %v1162_v45, %v10012_v51 }
 0x485   : > { %v3554_v5 = vmul.f32 %v3553_v58, %v8991_v52  ;;  %v9031_v62 = vmin.f32 %v3575_v50, 16.0  ;;  %v9043_v46 = vmul.f32 0.70710677, %v9037_v39  ;;  %v9052_v13 = vadd.f32 %v1017_v12, %v9994_v31 }
 0x486   : > { %v4010_v2 = vpack.c.bf16 %v3974_v53, %v3970_v42  ;;  %v3542_v4 = vadd.f32 0.05243302, %v3541_v0  ;;  %10013 = vst [vmem:[#allocation37_spill] sm:$0xff] %v9040_v40  ;;  %v9046_v32 = vmul.f32 0.70710677, %v9040_v40 }
 0x487   : > { %v3555_v10 = vadd.f32 0.4994258, %v3554_v5  ;;  %v3577_v56 = vmul.f32 2.1237322e-06, %v9031_v62  ;;  %v3588_v18 = vmul.f32 3.8918573e-05, %v9031_v62  ;;  %v3615_v57 = vmul.f32 %v9043_v46, %v9043_v46  ;;  %v1066_v5 = vpop.f32.mrf.mxu1 }
 0x488   : > { %4411 = vmatmul.bf16.gmra.mxu2 %v4009_v28  ;;  %v3543_v35 = vmul.f32 %v3542_v4, %v8991_v52  ;;  %v3655_v1 = vmul.f32 %v9046_v32, %v9046_v32  ;;  %v9067_v31 = vmul.f32 0.70710677, %v9052_v13 }
 0x489   : > { %v3556_v36 = vmul.f32 %v3555_v10, %v8991_v52  ;;  %v3578_v33 = vadd.f32 0.00028619796, %v3577_v56  ;;  %v3589_v19 = vadd.f32 0.001143296, %v3588_v18  ;;  %v9062_v34 = vmin.f32 %v3615_v57, 16.0 }
 0x48a   : > { %v9064_v41 = vmin.f32 %v3655_v1, 16.0  ;;  %v3544_v7 = vadd.f32 0.18741608, %v3543_v35  ;;  %v3695_v55 = vmul.f32 %v9067_v31, %v9067_v31  ;;  %v1115_v35 = vpop.f32.mrf.mxu2 }
 0x48b   : > { %v9029_v44 = vadd.f32 1.0, %v3556_v36  ;;  %v3579_v61 = vmul.f32 %v3578_v33, %v9031_v62  ;;  %v3590_v11 = vmul.f32 %v3589_v19, %v9031_v62  ;;  %v3617_v37 = vmul.f32 2.1237322e-06, %v9062_v34 }
 0x48c   : > { %v3628_v17 = vmul.f32 3.8918573e-05, %v9062_v34  ;;  %v3657_v22 = vmul.f32 2.1237322e-06, %v9064_v41  ;;  %v3668_v6 = vmul.f32 3.8918573e-05, %v9064_v41  ;;  %v3545_v10 = vmul.f32 %v3544_v7, %v8991_v52 }
 0x48d   : > { %5275 = vrcp.f32 %v9029_v44  ;;  %v3591_v16 = vadd.f32 0.014752088, %v3590_v11  ;;  %v3580_v38 = vadd.f32 0.0036580483, %v3579_v61  ;;  %v3618_v23 = vadd.f32 0.00028619796, %v3617_v37  ;;  %v9097_v61 = vpop.f32.mrf.mxu3 }
 0x48e   : > { %v3629_v8 = vadd.f32 0.001143296, %v3628_v17  ;;  %v3658_v21 = vadd.f32 0.00028619796, %v3657_v22  ;;  %v3669_v9 = vadd.f32 0.001143296, %v3668_v6  ;;  %vm3563_vm2 = vweird.f32 %v9029_v44 }
 0x48f   : > { %v3592_v3 = vmul.f32 %v3591_v16, %v9031_v62  ;;  %v3581_v58 = vmul.f32 %v3580_v38, %v9031_v62  ;;  %v3619_v26 = vmul.f32 %v3618_v23, %v9062_v34  ;;  %v9084_v59 = vmin.f32 %v3695_v55, 16.0  ;;  %v9116_v37 = vpop.f32.mrf.mxu1 }
 0x490   : > { %4460 = vmatmul.bf16.gmra.mxu3 %v4010_v2  ;;  %v3630_v14 = vmul.f32 %v3629_v8, %v9062_v34  ;;  %v3659_v47 = vmul.f32 %v3658_v21, %v9064_v41  ;;  %v3670_v24 = vmul.f32 %v3669_v9, %v9064_v41  ;;  %v3546_v56 = vadd.f32 1.1283791, %v3545_v10 }
 0x491   : > { %v3593_v25 = vadd.f32 0.112945676, %v3592_v3  ;;  %v3582_v53 = vadd.f32 0.05243302, %v3581_v58  ;;  %v3620_v0 = vadd.f32 0.0036580483, %v3619_v26  ;;  %v9114_v3 = vpop.f32.mrf.mxu0 }
 0x492   : > { %v3631_v50 = vadd.f32 0.014752088, %v3630_v14  ;;  %v3660_v2 = vadd.f32 0.0036580483, %v3659_v47  ;;  %v3671_v4 = vadd.f32 0.014752088, %v3670_v24  ;;  %v3547_v38 = vmul.f32 %v3546_v56, %v8970_v43 }
 0x493   : > { %v9054_v29 = vpop.eup %5275  ;;  %v3594_v28 = vmul.f32 %v3593_v25, %v9031_v62  ;;  %v3569_v18 = vand.u32 2147483648, %v9029_v44  ;;  %v3567_v45 = vand.u32 2147483647, %v9029_v44  ;;  %v3697_v12 = vmul.f32 2.1237322e-06, %v9084_v59 }
 0x494   : > { %v3559_v63 = vmul.f32 %v9054_v29, %v9029_v44  ;;  %vm3564_vm1 = vweird.f32 %v9054_v29  ;;  %v3632_v15 = vmul.f32 %v3631_v50, %v9062_v34  ;;  %v3672_v19 = vmul.f32 %v3671_v4, %v9064_v41 }
 0x495   : > { %v3595_v36 = vadd.f32 0.4994258, %v3594_v28  ;;  %vm9101_vm3 = vmor %vm3563_vm2, %vm3564_vm1  ;;  %v3583_v57 = vmul.f32 %v3582_v53, %v9031_v62  ;;  %v3621_v1 = vmul.f32 %v3620_v0, %v9062_v34  ;;  %v3661_v16 = vmul.f32 %v3660_v2, %v9064_v41  ;;  %v9133_v0 = vpop.f32.mrf.mxu2  ;;  %v9135_v50 = vpop.f32.mrf.mxu3 }
 0x496   : > { %v3560_v60 = vsub.f32 1.0, %v3559_v63  ;;  %v3633_v44 = vadd.f32 0.112945676, %v3632_v15  ;;  %v3570_v7 = vor.u32 1.1754944e-38, %v3569_v18  ;;  %vm3568_vm5 = vcmp.eq.f32.partialorder %v3567_v45, 8.507059e+37 }
 0x497   : > { %v3596_v52 = vmul.f32 %v3595_v36, %v9031_v62  ;;  %v3673_v17 = vadd.f32 0.112945676, %v3672_v19  ;;  %v3698_v22 = vadd.f32 0.00028619796, %v3697_v12  ;;  %v1067_v25 = vadd.f32 %v1066_v5, %v10008_v48  ;;  %v9149_v19 = vpop.f32.mrf.mxu1 }
 0x498   : > { %v3561_v54 = vmul.f32 %v9054_v29, %v3560_v60  ;;  %v3634_v60 = vmul.f32 %v3633_v44, %v9062_v34  ;;  %v3622_v55 = vadd.f32 0.05243302, %v3621_v1  ;;  %v3662_v23 = vadd.f32 0.05243302, %v3661_v16 }
 0x499   : > { %v9093_v33 = vadd.f32 1.0, %v3596_v52  ;;  %v3674_v8 = vmul.f32 %v3673_v17, %v9064_v41  ;;  %v3699_v43 = vmul.f32 %v3698_v22, %v9084_v59  ;;  %v3708_v21 = vmul.f32 3.8918573e-05, %v9084_v59  ;;  %v9147_v45 = vpop.f32.mrf.mxu0 }
 0x49a   : > { %v3562_v42 = vadd.f32 %v9054_v29, %v3561_v54  ;;  %v3635_v58 = vadd.f32 0.4994258, %v3634_v60  ;;  %v3623_v48 = vmul.f32 %v3622_v55, %v9062_v34  ;;  %v9128_v47 = vmul.f32 0.70710677, %v1067_v25 }
 0x49b   : > { %5277 = vrcp.f32 %v9093_v33  ;;  %v3700_v10 = vadd.f32 0.0036580483, %v3699_v43  ;;  %v3709_v26 = vadd.f32 0.001143296, %v3708_v21  ;;  %v3675_v14 = vadd.f32 0.4994258, %v3674_v8 }
 0x49c   : > { %v3566_v63 = vsel %vm9101_vm3, %v9054_v29, %v3562_v42  ;;  %v3584_v29 = vadd.f32 0.18741608, %v3583_v57  ;;  %v3636_v54 = vmul.f32 %v3635_v58, %v9062_v34  ;;  %v3663_v24 = vmul.f32 %v3662_v23, %v9064_v41 }
 0x49d   : > { %v3571_v6 = vsel %vm3568_vm5, %v3570_v7, %v3566_v63  ;;  %v3710_v53 = vmul.f32 %v3709_v26, %v9084_v59  ;;  %v3701_v52 = vmul.f32 %v3700_v10, %v9084_v59  ;;  %v9142_v4 = vadd.f32 %v1115_v35, %v10011_v49  ;;  %v9185_v43 = vpop.f32.mrf.mxu2  ;;  %v9187_v21 = vpop.f32.mrf.mxu3 }
 0x49e   : > { %v3572_v9 = vmul.f32 %v3571_v6, %v3547_v38  ;;  %v9126_v5 = vadd.f32 1.0, %v3636_v54  ;;  %v3585_v36 = vmul.f32 %v3584_v29, %v9031_v62  ;;  %v3624_v62 = vadd.f32 0.18741608, %v3623_v48 }
 0x49f   : > { %v3676_v56 = vmul.f32 %v3675_v14, %v9064_v41  ;;  %v3711_v18 = vadd.f32 0.014752088, %v3710_v53  ;;  %v3735_v15 = vmul.f32 %v9128_v47, %v9128_v47  ;;  %v1223_v12 = vmul.f32 0.5, %v8965_v30  ;;  %v9204_v48 = vpop.f32.mrf.mxu1 }
 0x4a0   : > { %v4826_v2 = vclamps-f32 %v3572_v9, 1.0  ;;  %5279 = vrcp.f32 %v9126_v5  ;;  %v9153_v11 = vmul.f32 0.5, %v9018_v20  ;;  %v3586_v57 = vadd.f32 1.1283791, %v3585_v36 }
 0x4a1   : > { %v9123_v28 = vpop.eup %5277  ;;  %v3664_v1 = vadd.f32 0.18741608, %v3663_v24  ;;  %v9156_v35 = vmul.f32 0.5, %v9052_v13  ;;  %v3702_v44 = vadd.f32 0.05243302, %v3701_v52  ;;  %v9158_v63 = vmul.f32 0.5, %v1067_v25  ;;  %v9202_v26 = vpop.f32.mrf.mxu0 }
 0x4a2   : > { %v3599_v42 = vmul.f32 %v9123_v28, %v9093_v33  ;;  %v3911_v16 = vadd.f32 1.0, %v4826_v2  ;;  %v3712_v38 = vmul.f32 %v3711_v18, %v9084_v59  ;;  %v9161_v7 = vmin.f32 %v3735_v15, 16.0 }
 0x4a3   : > { %v9164_v60 = vmul.f32 0.70710677, %v9142_v4  ;;  %v3607_v30 = vand.u32 2147483647, %v9093_v33  ;;  %v3609_v20 = vand.u32 2147483648, %v9093_v33  ;;  %v3625_v17 = vmul.f32 %v3624_v62, %v9062_v34 }
 0x4a4   : > { %v3600_v49 = vsub.f32 1.0, %v3599_v42  ;;  %v9169_v22 = vadd.f32 1.0, %v3676_v56  ;;  %v9174_v25 = vmul.f32 %v3586_v57, %v9022_v27  ;;  %v3665_v6 = vmul.f32 %v3664_v1, %v9064_v41 }
 0x4a5   : > { %v3713_v29 = vadd.f32 0.112945676, %v3712_v38  ;;  %v9179_v55 = vadd.f32 %v9097_v61, %v10012_v51  ;;  %v3703_v23 = vmul.f32 %v3702_v44, %v9084_v59  ;;  %v3737_v34 = vmul.f32 2.1237322e-06, %v9161_v7 }
 0x4a6   : > { %v9171_v13 = vpop.eup %5279  ;;  %v3601_v58 = vmul.f32 %v9123_v28, %v3600_v49  ;;  %v3748_v8 = vmul.f32 3.8918573e-05, %v9161_v7  ;;  %v9189_v27 = vmul.f32 %v3911_v16, %v1223_v12  ;;  %vm3603_vm6 = vweird.f32 %v9093_v33 }
 0x4a7   : > { %10016 = vst [vmem:[#allocation43_spill] sm:$0xff] %v9179_v55  ;;  %v3714_v41 = vmul.f32 %v3713_v29, %v9084_v59  ;;  %v3775_v51 = vmul.f32 %v9164_v60, %v9164_v60  ;;  %vm9195_vm7 = vcmp.eq.f32.partialorder %v3607_v30, 8.507059e+37  ;;  %v3610_v54 = vor.u32 1.1754944e-38, %v3609_v20 }
 0x4a8   : > { %v3626_v9 = vadd.f32 1.1283791, %v3625_v17  ;;  %v3639_v10 = vmul.f32 %v9171_v13, %v9126_v5  ;;  %5281 = vrcp.f32 %v9169_v22  ;;  %vm3604_vm8 = vweird.f32 %v9123_v28 }
 0x4a9   : > { %v3715_v14 = vadd.f32 0.4994258, %v3714_v41  ;;  %v3738_v36 = vadd.f32 0.00028619796, %v3737_v34  ;;  %v3749_v24 = vadd.f32 0.001143296, %v3748_v8  ;;  %v3602_v53 = vadd.f32 %v9123_v28, %v3601_v58  ;;  %vm9225_vm9 = vmor %vm3603_vm6, %vm3604_vm8  ;;  %v9239_v58 = vpop.f32.mrf.mxu2 }
 0x4aa   : > { %v9208_v42 = vadd.f32 1.1283791, %v3665_v6  ;;  %v3704_v52 = vadd.f32 0.18741608, %v3703_v23  ;;  %v9210_v2 = vmin.f32 %v3775_v51, 16.0  ;;  %v3649_v62 = vand.u32 2147483648, %v9126_v5  ;;  %v9241_v23 = vpop.f32.mrf.mxu3 }
 0x4ab   : > { %v3716_v56 = vmul.f32 %v3715_v14, %v9084_v59  ;;  %v3739_v18 = vmul.f32 %v3738_v36, %v9161_v7  ;;  %v3750_v15 = vmul.f32 %v3749_v24, %v9161_v7  ;;  %v9217_v12 = vmul.f32 %v3626_v9, %v9043_v46  ;;  %v9255_v14 = vpop.f32.mrf.mxu1 }
 0x4ac   : > { %v3640_v57 = vsub.f32 1.0, %v3639_v10  ;;  %v3777_v1 = vmul.f32 2.1237322e-06, %v9210_v2  ;;  %v3788_v49 = vmul.f32 3.8918573e-05, %v9210_v2  ;;  %v3689_v16 = vand.u32 2147483648, %v9169_v22  ;;  %v9253_v10 = vpop.f32.mrf.mxu0 }
 0x4ad   : > { %v9230_v38 = vadd.f32 1.0, %v3716_v56  ;;  %v3740_v30 = vadd.f32 0.0036580483, %v3739_v18  ;;  %v3751_v46 = vadd.f32 0.014752088, %v3750_v15  ;;  %v3606_v17 = vsel %vm9225_vm9, %v9123_v28, %v3602_v53 }
 0x4ae   : > { %v9232_v20 = vpop.eup %5281  ;;  %v3647_v6 = vand.u32 2147483647, %v9126_v5  ;;  %v3705_v33 = vmul.f32 %v3704_v52, %v9084_v59  ;;  %v3778_v29 = vadd.f32 0.00028619796, %v3777_v1  ;;  %v9243_v34 = vor.u32 1.1754944e-38, %v3649_v62 }
 0x4af   : > { %5283 = vrcp.f32 %v9230_v38  ;;  %v3789_v8 = vadd.f32 0.001143296, %v3788_v49  ;;  %v9247_v41 = vmul.f32 0.70710677, %v9179_v55  ;;  %v3641_v51 = vmul.f32 %v9171_v13, %v3640_v57 }
 0x4b0   : > { %v3741_v9 = vmul.f32 %v3740_v30, %v9161_v7  ;;  %v3752_v59 = vmul.f32 %v3751_v46, %v9161_v7  ;;  %v3611_v36 = vsel %vm9195_vm7, %v3610_v54, %v3606_v17  ;;  %v3679_v24 = vmul.f32 %v9232_v20, %v9169_v22  ;;  %v9272_v54 = vld [vmem:[%s9540_s6] ss:$0 sm:$0xff] }
 0x4b1   : > { %10021 = vst [vmem:[#allocation57_spill] sm:$0xff] %v9247_v41  ;;  %v9261_v53 = vor.u32 1.1754944e-38, %v3689_v16  ;;  %v3779_v52 = vmul.f32 %v3778_v29, %v9210_v2  ;;  %vm3643_vm11 = vweird.f32 %v9126_v5  ;;  %v3706_v62 = vadd.f32 1.1283791, %v3705_v33 }
 0x4b2   : > { %v3742_v56 = vadd.f32 0.05243302, %v3741_v9  ;;  %v3753_v18 = vadd.f32 0.112945676, %v3752_v59  ;;  %vm3644_vm12 = vweird.f32 %v9171_v13  ;;  %v3790_v57 = vmul.f32 %v3789_v8, %v9210_v2 }
 0x4b3   : > { %v3780_v15 = vadd.f32 0.0036580483, %v3779_v52  ;;  %v3815_v61 = vmul.f32 %v9247_v41, %v9247_v41  ;;  %v9275_v1 = vmul.f32 %v3611_v36, %v9174_v25  ;;  %v3642_v49 = vadd.f32 %v9171_v13, %v3641_v51  ;;  %v9290_v36 = vpop.f32.mrf.mxu2  ;;  %vm9296_vm15 = vmor %vm3643_vm11, %vm3644_vm12 }
 0x4b4   : > { %v3743_v44 = vmul.f32 %v3742_v56, %v9161_v7  ;;  %v3754_v16 = vmul.f32 %v3753_v18, %v9161_v7  ;;  %vm9280_vm14 = vcmp.eq.f32.partialorder %v3647_v6, 8.507059e+37  ;;  %v3680_v17 = vsub.f32 1.0, %v3679_v24  ;;  %v9304_v56 = vpop.f32.mrf.mxu3 }
 0x4b5   : > { %v5284_v30 = vpop.eup %5283  ;;  %v3781_v33 = vmul.f32 %v3780_v15, %v9210_v2  ;;  %v3791_v29 = vadd.f32 0.014752088, %v3790_v57  ;;  %v9285_v8 = vmin.f32 %v3815_v61, 16.0  ;;  %v3707_v25 = vmul.f32 %v3706_v62, %v9067_v31  ;;  %v9310_v61 = vpop.f32.mrf.mxu0 }
 0x4b6   : > { %v3719_v9 = vmul.f32 %v5284_v30, %v9230_v38  ;;  %v3727_v51 = vand.u32 2147483647, %v9230_v38  ;;  %v3744_v59 = vadd.f32 0.18741608, %v3743_v44  ;;  %v3755_v24 = vadd.f32 0.4994258, %v3754_v16  ;;  %v9312_v44 = vpop.f32.mrf.mxu1 }
 0x4b7   : > { %v3792_v52 = vmul.f32 %v3791_v29, %v9210_v2  ;;  %v3817_v31 = vmul.f32 2.1237322e-06, %v9285_v8  ;;  %v4285_v62 = vadd.f32 %v9272_v54, %v9114_v3  ;;  %v3646_v18 = vsel %vm9296_vm15, %v9171_v13, %v3642_v49 }
 0x4b8   : > { %v3720_v15 = vsub.f32 1.0, %v3719_v9  ;;  %v3782_v5 = vadd.f32 0.05243302, %v3781_v33  ;;  %v3828_v57 = vmul.f32 3.8918573e-05, %v9285_v8  ;;  %v3729_v16 = vand.u32 2147483648, %v9230_v38 }
 0x4b9   : > { %v3756_v29 = vmul.f32 %v3755_v24, %v9161_v7  ;;  %v3793_v28 = vadd.f32 0.112945676, %v3792_v52  ;;  %v3818_v3 = vadd.f32 0.00028619796, %v3817_v31  ;;  %vm3724_vm13 = vweird.f32 %v5284_v30 }
 0x4ba   : > { %v3721_v55 = vmul.f32 %v5284_v30, %v3720_v15  ;;  %v3745_v40 = vmul.f32 %v3744_v59, %v9161_v7  ;;  %v3829_v6 = vadd.f32 0.001143296, %v3828_v57  ;;  %v4334_v9 = vadd.f32 %v9116_v37, %v4285_v62 }
 0x4bb   : > { %v9317_v13 = vadd.f32 1.0, %v3756_v29  ;;  %v3794_v49 = vmul.f32 %v3793_v28, %v9210_v2  ;;  %v3819_v33 = vmul.f32 %v3818_v3, %v9285_v8  ;;  %vm3723_vm10 = vweird.f32 %v9230_v38  ;;  %v9331_v38 = vpop.f32.mrf.mxu2 }
 0x4bc   : > { %v3722_v41 = vadd.f32 %v5284_v30, %v3721_v55  ;;  %v3783_v24 = vmul.f32 %v3782_v5, %v9210_v2  ;;  %v3830_v52 = vmul.f32 %v3829_v6, %v9285_v8  ;;  %v3681_v31 = vmul.f32 %v9232_v20, %v3680_v17  ;;  %vm3725_vm4 = vmor %vm3723_vm10, %vm3724_vm13 }
 0x4bd   : > { %v3730_v7 = vor.u32 1.1754944e-38, %v3729_v16  ;;  %5285 = vrcp.f32 %v9317_v13  ;;  %v4383_v59 = vadd.f32 %v9133_v0, %v4334_v9  ;;  %v3651_v28 = vsel %vm9280_vm14, %v9243_v34, %v3646_v18  ;;  %v4296_v0 = vpop.f32.mrf.mxu0 }
 0x4be   : > { %v3726_v37 = vsel %vm3725_vm4, %v5284_v30, %v3722_v41  ;;  %vm3728_vm0 = vcmp.eq.f32.partialorder %v3727_v51, 8.507059e+37  ;;  %v3795_v55 = vadd.f32 0.4994258, %v3794_v49  ;;  %v3746_v15 = vadd.f32 1.1283791, %v3745_v40  ;;  %v9335_v6 = vpop.f32.mrf.mxu1  ;;  %v9352_v49 = vpop.f32.mrf.mxu3 }
 0x4bf   : > { %v3731_v62 = vsel %vm3728_vm0, %v3730_v7, %v3726_v37  ;;  %v3820_v5 = vadd.f32 0.0036580483, %v3819_v33  ;;  %v3831_v57 = vadd.f32 0.014752088, %v3830_v52  ;;  %v4827_v17 = vclamps-f32 %v9275_v1, 1.0 }
 0x4c0   : > { %v3732_v16 = vmul.f32 %v3731_v62, %v3707_v25  ;;  %v3784_v29 = vadd.f32 0.18741608, %v3783_v24  ;;  %v3796_v3 = vmul.f32 %v3795_v55, %v9210_v2  ;;  %v4432_v41 = vadd.f32 %v9135_v50, %v4383_v59 }
 0x4c1   : > { %v3832_v34 = vmul.f32 %v3831_v57, %v9285_v8  ;;  %v4287_v30 = vadd.f32 %v9272_v54, %v9147_v45  ;;  %v4290_v40 = vadd.f32 %v9272_v54, %v9202_v26  ;;  %v9344_v46 = vmul.f32 %v3651_v28, %v9217_v12 }
 0x4c2   : > { %v9347_v25 = vadd.f32 %v9232_v20, %v3681_v31  ;;  %v3767_v51 = vand.u32 2147483647, %v9317_v13  ;;  %v9350_v18 = vadd.f32 1.0, %v3796_v3  ;;  %v4830_v50 = vclamps-f32 %v3732_v16, 1.0  ;;  %4471 = vst [vmem:[%s9358_s17] sm:$0xff] %v4432_v41 }
 0x4c3   : > { %v5286_v33 = vpop.eup %5285  ;;  %v3747_v9 = vmul.f32 %v3746_v15, %v9128_v47  ;;  %v3821_v45 = vmul.f32 %v3820_v5, %v9285_v8  ;;  %v3833_v24 = vadd.f32 0.112945676, %v3832_v34  ;;  %v4336_v12 = vadd.f32 %v9149_v19, %v4287_v30 }
 0x4c4   : > { %v3759_v26 = vmul.f32 %v5286_v33, %v9317_v13  ;;  %5287 = vrcp.f32 %v9350_v18  ;;  %v4292_v52 = vadd.f32 %v9272_v54, %v9253_v10  ;;  %vm3763_vm1 = vweird.f32 %v9317_v13  ;;  %v4394_v10 = vpop.f32.mrf.mxu2 }
 0x4c5   : > { %v3769_v47 = vand.u32 2147483648, %v9317_v13  ;;  %v3785_v31 = vmul.f32 %v3784_v29, %v9210_v2  ;;  %v4339_v7 = vadd.f32 %v9204_v48, %v4290_v40  ;;  %vm3684_vm2 = vweird.f32 %v9232_v20  ;;  %v4299_v16 = vpop.f32.mrf.mxu0 }
 0x4c6   : > { %v3760_v59 = vsub.f32 1.0, %v3759_v26  ;;  %vm9371_vm3 = vcmp.eq.f32.partialorder %v3767_v51, 8.507059e+37  ;;  %v3834_v19 = vmul.f32 %v3833_v24, %v9285_v8  ;;  %v4385_v37 = vadd.f32 %v9185_v43, %v4336_v12  ;;  %v4348_v29 = vpop.f32.mrf.mxu1  ;;  %v4443_v24 = vpop.f32.mrf.mxu3 }
 0x4c7   : > { %v3915_v55 = vadd.f32 1.0, %v4830_v50  ;;  %vm3764_vm5 = vweird.f32 %v5286_v33  ;;  %v3822_v62 = vadd.f32 0.05243302, %v3821_v45  ;;  %v4388_v15 = vadd.f32 %v9239_v58, %v4339_v7 }
 0x4c8   : > { %vm3683_vm6 = vweird.f32 %v9169_v22  ;;  %v3761_v48 = vmul.f32 %v5286_v33, %v3760_v59  ;;  %v3835_v2 = vadd.f32 0.4994258, %v3834_v19  ;;  %v4434_v5 = vadd.f32 %v9187_v21, %v4385_v37  ;;  %vm3765_vm7 = vmor %vm3763_vm1, %vm3764_vm5 }
 0x4c9   : > { %v4341_v57 = vadd.f32 %v9255_v14, %v4292_v52  ;;  %v3770_v3 = vor.u32 1.1754944e-38, %v3769_v47  ;;  %v4437_v43 = vadd.f32 %v9241_v23, %v4388_v15  ;;  %v4295_v34 = vadd.f32 %v9272_v54, %v9310_v61  ;;  %vm9422_vm11 = vmor %vm3683_vm6, %vm3684_vm2 }
 0x4ca   : > { %v4297_v58 = vadd.f32 %v9272_v54, %v4296_v0  ;;  %v5288_v41 = vpop.eup %5287  ;;  %v3762_v30 = vadd.f32 %v5286_v33, %v3761_v48  ;;  %v3786_v40 = vadd.f32 1.1283791, %v3785_v31  ;;  %v3836_v51 = vmul.f32 %v3835_v2, %v9285_v8  ;;  %4472 = vst [vmem:[%s9358_s17 + $0x8] sm:$0xff] %v4434_v5 }
 0x4cb   : > { %v4390_v21 = vadd.f32 %v9290_v36, %v4341_v57  ;;  %v3979_v14 = vmul.f32 %v3915_v55, %v9156_v35  ;;  %v3799_v23 = vmul.f32 %v5288_v41, %v9350_v18  ;;  %v3823_v61 = vmul.f32 %v3822_v62, %v9285_v8  ;;  %4473 = vst [vmem:[%s9358_s17 + $0x10] sm:$0xff] %v4437_v43 }
 0x4cc   : > { %v4344_v0 = vadd.f32 %v9312_v44, %v4295_v34  ;;  %v10028_v50 = vand.u32 2147483647, %v9169_v22  ;;  %v3766_v36 = vsel %vm3765_vm7, %v5286_v33, %v3762_v30  ;;  %v9402_v35 = vadd.f32 1.0, %v3836_v51 }
 0x4cd   : > { %v4439_v13 = vadd.f32 %v9304_v56, %v4390_v21  ;;  %v4300_v26 = vadd.f32 %v9272_v54, %v4299_v16  ;;  %v3771_v12 = vsel %vm9371_vm3, %v3770_v3, %v3766_v36  ;;  %v3800_v52 = vsub.f32 1.0, %v3799_v23  ;;  %v4301_v55 = vpop.f32.mrf.mxu0 }
 0x4ce   : > { %vm9398_vm8 = vcmp.eq.f32.partialorder %v10028_v50, 8.507059e+37  ;;  %v4393_v44 = vadd.f32 %v9331_v38, %v4344_v0  ;;  %v4346_v47 = vadd.f32 %v9335_v6, %v4297_v58  ;;  %v3772_v31 = vmul.f32 %v3771_v12, %v3747_v9  ;;  %v4350_v62 = vpop.f32.mrf.mxu1 }
 0x4cf   : > { %v3807_v7 = vand.u32 2147483647, %v9350_v18  ;;  %v3809_v33 = vand.u32 2147483648, %v9350_v18  ;;  %5289 = vrcp.f32 %v9402_v35  ;;  %4474 = vst [vmem:[%s9358_s17 + $0x18] sm:$0xff] %v4439_v13  ;;  %v3801_v59 = vmul.f32 %v5288_v41, %v3800_v52 }
 0x4d0   : > { %vm3804_vm9 = vweird.f32 %v5288_v41  ;;  %v4442_v28 = vadd.f32 %v9352_v49, %v4393_v44  ;;  %v4395_v19 = vadd.f32 %v4394_v10, %v4346_v47  ;;  %v3912_v38 = vadd.f32 1.0, %v4827_v17 }
 0x4d1   : > { %v4831_v37 = vclamps-f32 %v3772_v31, 1.0  ;;  %v3824_v6 = vadd.f32 0.18741608, %v3823_v61  ;;  %v4011_v9 = vpack.c.bf16 %v3979_v14, %v9189_v27  ;;  %v3802_v49 = vadd.f32 %v5288_v41, %v3801_v59 }
 0x4d2   : > { %vm3803_vm12 = vweird.f32 %v9350_v18  ;;  %4475 = vst [vmem:[%s9358_s17 + $0x20] sm:$0xff] %v4442_v28  ;;  %v4444_v1 = vadd.f32 %v4443_v24, %v4395_v19  ;;  %v4349_v17 = vadd.f32 %v4348_v29, %v4300_v26  ;;  %v4828_v10 = vclamps-f32 %v9344_v46, 1.0  ;;  %v10033_v26 = vld [vmem:[#allocation57_spill] sm:$0xff] }
 0x4d3   : > { %v3686_v27 = vsel %vm9422_vm11, %v9232_v20, %v9347_v25  ;;  %v3916_v48 = vadd.f32 1.0, %v4831_v37  ;;  %vm3805_vm14 = vmor %vm3803_vm12, %vm3804_vm9  ;;  %v3810_v22 = vor.u32 1.1754944e-38, %v3809_v33  ;;  %4318 = vmatmul.bf16.gmra.mxu0 %v4011_v9  ;;  %v3787_v2 = vmul.f32 %v3786_v40, %v9164_v60  ;;  %v10034_v9 = vld [vmem:[#allocation37_spill] sm:$0xff] }
 0x4d4   : > { %v3806_v5 = vsel %vm3805_vm14, %v5288_v41, %v3802_v49  ;;  %vm3808_vm15 = vcmp.eq.f32.partialorder %v3807_v7, 8.507059e+37  ;;  %4476 = vst [vmem:[%s9358_s17 + $0x28] sm:$0xff] %v4444_v1  ;;  %v3976_v16 = vmul.f32 %v3912_v38, %v9153_v11  ;;  %v3825_v3 = vmul.f32 %v3824_v6, %v9285_v8 }
 0x4d5   : > { %v5290_v57 = vpop.eup %5289  ;;  %v3980_v46 = vmul.f32 %v3916_v48, %v9158_v63  ;;  %v3811_v29 = vsel %vm3808_vm15, %v3810_v22, %v3806_v5  ;;  %v3691_v20 = vsel %vm9398_vm8, %v9261_v53, %v3686_v27  ;;  %v4302_v60 = vadd.f32 %v9272_v54, %v4301_v55 }
 0x4d6   : > { %v3812_v25 = vmul.f32 %v3811_v29, %v3787_v2  ;;  %v3839_v43 = vmul.f32 %v5290_v57, %v9402_v35  ;;  %v1225_v34 = vmul.f32 0.5, %v9037_v39  ;;  %v3913_v58 = vadd.f32 1.0, %v4828_v10  ;;  %v4304_v39 = vpop.f32.mrf.mxu0  ;;  %v4353_v0 = vpop.f32.mrf.mxu1 }
 0x4d7   : > { %v3667_v11 = vmul.f32 %v9208_v42, %v9046_v32  ;;  %v4012_v41 = vpack.c.bf16 %v3980_v46, %v3976_v16  ;;  %v1229_v8 = vmul.f32 0.5, %v9142_v4  ;;  %v3826_v14 = vadd.f32 1.1283791, %v3825_v3 }
 0x4d8   : > { %v4832_v40 = vclamps-f32 %v3812_v25, 1.0  ;;  %v3840_v51 = vsub.f32 1.0, %v3839_v43  ;;  %v3847_v23 = vand.u32 2147483647, %v9402_v35  ;;  %v3849_v61 = vand.u32 2147483648, %v9402_v35 }
 0x4d9   : > { %v3692_v21 = vmul.f32 %v3691_v20, %v3667_v11  ;;  %4367 = vmatmul.bf16.gmra.mxu1 %v4012_v41  ;;  %vm3844_vm13 = vweird.f32 %v5290_v57  ;;  %v4351_v42 = vadd.f32 %v4350_v62, %v4302_v60  ;;  %v3977_v45 = vmul.f32 %v3913_v58, %v1225_v34  ;;  %v10035_v62 = vld [vmem:[#allocation43_spill] sm:$0xff] }
 0x4da   : > { %v4397_v56 = vpop.f32.mrf.mxu2  ;;  %v3917_v50 = vadd.f32 1.0, %v4832_v40  ;;  %v3841_v32 = vmul.f32 %v5290_v57, %v3840_v51  ;;  %vm3843_vm10 = vweird.f32 %v9402_v35  ;;  %v3827_v12 = vmul.f32 %v3826_v14, %v10033_v26 }
 0x4db   : > { %v4398_v18 = vadd.f32 %v4397_v56, %v4349_v17  ;;  %v4829_v24 = vclamps-f32 %v3692_v21, 1.0  ;;  %vm3845_vm4 = vmor %vm3843_vm10, %vm3844_vm13  ;;  %v3850_v52 = vor.u32 1.1754944e-38, %v3849_v61  ;;  %vm3848_vm0 = vcmp.eq.f32.partialorder %v3847_v23, 8.507059e+37 }
 0x4dc   : > { %v3981_v36 = vmul.f32 %v3917_v50, %v1229_v8  ;;  %v3842_v4 = vadd.f32 %v5290_v57, %v3841_v32  ;;  %v4305_v31 = vadd.f32 %v9272_v54, %v4304_v39  ;;  %v1226_v55 = vmul.f32 0.5, %v10034_v9 }
 0x4dd   : > { %v3914_v38 = vadd.f32 1.0, %v4829_v24  ;;  %v1230_v15 = vmul.f32 0.5, %v10035_v62 }
 0x4de   : > { %v3846_v44 = vsel %vm3845_vm4, %v5290_v57, %v3842_v4  ;;  %v4013_v47 = vpack.c.bf16 %v3981_v36, %v3977_v45  ;;  %v4306_v19 = vpop.f32.mrf.mxu0  ;;  %v4355_v35 = vpop.f32.mrf.mxu1  ;;  %v4354_v6 = vadd.f32 %v4353_v0, %v4305_v31 }
 0x4df   : > { %v3851_v7 = vsel %vm3848_vm0, %v3850_v52, %v3846_v44  ;;  %v3978_v17 = vmul.f32 %v3914_v38, %v1226_v55  ;;  %v4307_v27 = vadd.f32 %v9272_v54, %v4306_v19 }
 0x4e0   : > { %v3852_v59 = vmul.f32 %v3851_v7, %v3827_v12  ;;  %4416 = vmatmul.bf16.gmra.mxu2 %v4013_v47 }
 0x4e1   : > { %v4356_v57 = vadd.f32 %v4355_v35, %v4307_v27 }
 0x4e2   : > { %v4399_v30 = vpop.f32.mrf.mxu2  ;;  %v4833_v37 = vclamps-f32 %v3852_v59, 1.0 }
 0x4e3   : > { %v4446_v63 = vpop.f32.mrf.mxu3  ;;  %v4400_v13 = vadd.f32 %v4399_v30, %v4351_v42 }
 0x4e4   : > { %v4447_v53 = vadd.f32 %v4446_v63, %v4398_v18  ;;  %v3918_v49 = vadd.f32 1.0, %v4833_v37 }
 0x4e6   : > { %4477 = vst [vmem:[%s9358_s17 + $0x30] sm:$0xff] %v4447_v53  ;;  %v3982_v10 = vmul.f32 %v3918_v49, %v1230_v15  ;;  %v4309_v18 = vpop.f32.mrf.mxu0  ;;  %v4358_v16 = vpop.f32.mrf.mxu1 }
 0x4e7   : > { %v4310_v29 = vadd.f32 %v9272_v54, %v4309_v18 }
 0x4e8   : > { %v4014_v2 = vpack.c.bf16 %v3982_v10, %v3978_v17 }
 0x4e9   : > { %v4359_v60 = vadd.f32 %v4358_v16, %v4310_v29 }
 0x4ea   : > { %4465 = vmatmul.bf16.gmra.mxu3 %v4014_v2 }
 0x4eb   : > { %v4448_v33 = vpop.f32.mrf.mxu3  ;;  %v4402_v56 = vpop.f32.mrf.mxu2 }
 0x4ec   : > { %v4449_v28 = vadd.f32 %v4448_v33, %v4400_v13  ;;  %v4403_v1 = vadd.f32 %v4402_v56, %v4354_v6 }
 0x4ee   : > { %4478 = vst [vmem:[%s9358_s17 + $0x38] sm:$0xff] %v4449_v28  ;;  %v4311_v43 = vpop.f32.mrf.mxu0  ;;  %v4360_v58 = vpop.f32.mrf.mxu1 }
 0x4ef   : > { %v4312_v11 = vadd.f32 %v9272_v54, %v4311_v43 }
 0x4f1   : > { %v4361_v40 = vadd.f32 %v4360_v58, %v4312_v11 }
 0x4f3   : > { %v4451_v48 = vpop.f32.mrf.mxu3  ;;  %v4404_v22 = vpop.f32.mrf.mxu2 }
 0x4f4   : > { %v4452_v5 = vadd.f32 %v4451_v48, %v4403_v1  ;;  %v4405_v46 = vadd.f32 %v4404_v22, %v4356_v57 }
 0x4f6   : > { %4479 = vst [vmem:[%s9358_s17 + $0x40] sm:$0xff] %v4452_v5  ;;  %v4314_v8 = vpop.f32.mrf.mxu0  ;;  %v4363_v21 = vpop.f32.mrf.mxu1 }
 0x4f7   : > { %v4315_v53 = vadd.f32 %v9272_v54, %v4314_v8 }
 0x4f9   : > { %v4364_v39 = vadd.f32 %v4363_v21, %v4315_v53 }
 0x4fb   : > { %v4453_v3 = vpop.f32.mrf.mxu3  ;;  %v4407_v20 = vpop.f32.mrf.mxu2 }
 0x4fc   : > { %v4454_v25 = vadd.f32 %v4453_v3, %v4405_v46  ;;  %v4408_v34 = vadd.f32 %v4407_v20, %v4359_v60 }
 0x4fe   : > { %4480 = vst [vmem:[%s9358_s17 + $0x48] sm:$0xff] %v4454_v25  ;;  %v4316_v0 = vpop.f32.mrf.mxu0  ;;  %v4365_v36 = vpop.f32.mrf.mxu1 }
 0x4ff   : > { %v4317_v32 = vadd.f32 %v9272_v54, %v4316_v0 }
 0x501   : > { %v4366_v13 = vadd.f32 %v4365_v36, %v4317_v32 }
 0x503   : > { %v4456_v41 = vpop.f32.mrf.mxu3  ;;  %v4409_v63 = vpop.f32.mrf.mxu2 }
 0x504   : > { %v4457_v30 = vadd.f32 %v4456_v41, %v4408_v34  ;;  %v4410_v51 = vadd.f32 %v4409_v63, %v4361_v40 }
 0x506   : > { %4481 = vst [vmem:[%s9358_s17 + $0x50] sm:$0xff] %v4457_v30 }
 0x50b   : > { %v4458_v14 = vpop.f32.mrf.mxu3  ;;  %v4412_v23 = vpop.f32.mrf.mxu2 }
 0x50c   : > { %v4459_v61 = vadd.f32 %v4458_v14, %v4410_v51  ;;  %v4413_v50 = vadd.f32 %v4412_v23, %v4364_v39 }
 0x50e   : > { %4482 = vst [vmem:[%s9358_s17 + $0x58] sm:$0xff] %v4459_v61 }
 0x513   : > { %v4461_v42 = vpop.f32.mrf.mxu3  ;;  %v4414_v4 = vpop.f32.mrf.mxu2 }
 0x514   : > { %v4462_v45 = vadd.f32 %v4461_v42, %v4413_v50  ;;  %v4415_v24 = vadd.f32 %v4414_v4, %v4366_v13 }
 0x516   : > { %4483 = vst [vmem:[%s9358_s17 + $0x60] sm:$0xff] %v4462_v45 }
 0x51b   : > { %v4463_v26 = vpop.f32.mrf.mxu3 }
 0x51c   : > { %v4464_v12 = vadd.f32 %v4463_v26, %v4415_v24 }
 0x51e   : > { %4484 = vst [vmem:[%s9358_s17 + $0x68] sm:$0xff] %v4464_v12 }
 0x550   : > { %v4319_v52 = vpop.f32.mrf.mxu0 }
 0x551   : > { %v4320_v44 = vadd.f32 %v9272_v54, %v4319_v52 }
 0x556   : > { %v4368_v47 = vpop.f32.mrf.mxu1 }
 0x557   : > { %v4369_v7 = vadd.f32 %v4368_v47, %v4320_v44 }
 0x558   : > { %v4321_v33 = vpop.f32.mrf.mxu0 }
 0x559   : > { %v4322_v59 = vadd.f32 %v9272_v54, %v4321_v33 }
 0x55e   : > { %v4370_v35 = vpop.f32.mrf.mxu1 }
 0x55f   : > { %v4371_v37 = vadd.f32 %v4370_v35, %v4322_v59 }
 0x563   : > { %v4417_v31 = vpop.f32.mrf.mxu2 }
 0x564   : > { %v4418_v56 = vadd.f32 %v4417_v31, %v4369_v7 }
 0x56b   : > { %v4419_v38 = vpop.f32.mrf.mxu2 }
 0x56c   : > { %v4420_v6 = vadd.f32 %v4419_v38, %v4371_v37 }
 0x56d   : > { %v4466_v28 = vpop.f32.mrf.mxu3 }
 0x56e   : > { %v4467_v19 = vadd.f32 %v4466_v28, %v4418_v56 }
 0x570   : > { %4485 = vst [vmem:[%s9358_s17 + $0x70] sm:$0xff] %v4467_v19 }
 0x574   : > { %4494 = sbr.rel (!%p5646_p11) target bundleno = 1432 (0x598), region = 72 }
 0x575   : > { %v4468_v9 = vpop.f32.mrf.mxu3 }
 0x576   : > { %v4469_v55 = vadd.f32 %v4468_v9, %v4420_v6 }
 0x578   : > { %4486 = vst [vmem:[%s9358_s17 + $0x78] sm:$0xff] %v4469_v55 }
 0x579   : > { %s10046_s20 = smov (!%p4497_p6, %s4496_s20), 16 }
 0x57a   : > { %s4964_s19 = sshll.u32 %s10046_s20, 3 }
 0x57b   : > { %s4500_s29 = ssub.s32 128, %s4964_s19 }
 0x57c   : > { %s4501_s4 = sshll.u32 %s4500_s29, 4 }
 0x57d   : > { %4502 = vsyncadd %s4488_s1, %s4501_s4  ;;  %p9481_p9 = scmp.ne.s32.totalorder %s4964_s19, 0  ;;  %s5036_s9 = sshll.u32 %s5615_s28, 7 }
 0x57e   : > { %s4505_s8 = scalar_lea.hbm %s9541_s7, %s5036_s9  ;;  %s4507_s12 = sshll.u32 %s9358_s17, 4  ;;  %s9490_s12 = int_to_ptr.vmem [resolvable:$true] %s4507_s12 }
 0x57f   : > { %s4509_s15 = sshll.u32 %s4505_s8, 4  ;;  %s4968_s23 = sshll.u32 %s10046_s20, 7  ;;  %s9492_s15 = int_to_ptr.hbm [resolvable:$true] %s4509_s15 }
 0x580   : > { %s5452_s30 = sshra.s32 %s9490_s12, 4  ;;  %s5454_s11 = sshrl.u32 %s4968_s23, 4  ;;  %s5453_s30 = int_to_ptr.vmem [resolvable:$true] %s5452_s30 }
 0x581   : > { %s5459_s16 = scalar_lea.vmem %s5453_s30, %s5454_s11  ;;  %s5551_s28 = smov [#allocation11]  }
 0x582   : > { %p5460_p11 = scmp.ne.s32.totalorder %s5453_s30, %s5459_s16  ;;  %s5463_s18 = scalar_lea.vmem %s5551_s28, 256 }
 0x583   : > { %p5465_p0 = scmp.lt.s32.totalorder %s5463_s18, %s5459_s16 }
 0x584   : > { %p5461_p10 = pnand %p5460_p11, %p9481_p9 }
 0x586   : > { %p5462_p1 = pneg %p5461_p10 }
 0x588   : > { %p5467_p2 = pnand %p5465_p0, %p5462_p1 }
 0x58a   : > { %5470 = shalt.err (!%p5467_p2)
}
 0x58b   : > { %s5471_s17 = sshra.s32 %s9492_s15, 4  ;;  %s5482_s9 = scalar_lea.hbm %s9541_s7, 392  ;;  %s5472_s17 = int_to_ptr.hbm [resolvable:$true] %s5471_s17 }
 0x58c   : > { %s5478_s19 = scalar_lea.hbm %s5472_s17, %s5454_s11  ;;  %p5483_p4 = scmp.lt.s32.totalorder %s5472_s17, %s9541_s7 }
 0x58d   : > { %p5479_p3 = scmp.ne.s32.totalorder %s5472_s17, %s5478_s19  ;;  %p5484_p12 = scmp.lt.s32.totalorder %s5482_s9, %s5478_s19 }
 0x58f   : > { %p5480_p7 = pnand %p5479_p3, %p9481_p9  ;;  %p5485_p13 = por %p5484_p12, %p5483_p4 }
 0x591   : > { %p5481_p8 = pneg %p5480_p7 }
 0x593   : > { %p5486_p5 = pnand %p5485_p13, %p5481_p8 }
 0x595   : > { %5489 = shalt.err (!%p5486_p5)
}
 0x596   : > { %s5552_s8 = smov 128   ;;  %s5553_s30 = smov 8  }
 0x597   : > { %4515 = dma.vmem_to_hbm [thread:$0]  (%p9481_p9), %s9490_s12, %s4968_s23, %s9492_s15, %s4488_s1, %s5552_s8, %s5552_s8, %s5553_s30  }
 0x598 PF: > { %p5080_p6 = scmp.ge.s32.totalorder %s5537_s27, 2  ;;  %s4524_s11 = sand.u32 1, %s5525_s24  }
 0x599   : > { %p10037_p11 = scmp.ne.s32.totalorder %s9627_s14, 0  ;;  %s4525_s16 = scalar_lea.sflag [#allocation4], %s4524_s11 }
 0x59b   : > { %p5069_p10 = pnand %p5080_p6, %p10037_p11 }
 0x59d   : > { %p5070_p1 = pneg %p5069_p10 }
 0x59f   : > { %5520 = dma.done.wait (%p5070_p1), %s4525_s16, 2048  }
 0x5a0   : > { %5522 = vsyncadd (%p5070_p1), %s4525_s16, 4294965248  ;;  %s10038_s27 = sld [smem:[#allocation16_spill]]  ;;  %s10040_s24 = smov %s5529_s25 }
 0x5a1   : > { %s10039_s13 = sld [smem:[#allocation17_spill]]  ;;  %s10041_s25 = smov %s5533_s26 }
 0x5a6   : > { %p22_p0 = scmp.ge.s32.totalorder %s10038_s27, 6  }
 0x5a7   : > { %s10042_s26 = smov %s10039_s13 }
 0x5a8   :  { %24 = sbr.rel (!%p22_p0) target bundleno = 10 (0xa), region = 109 }
 0x5ad   :  { %4531 = vsyncpa [#allocation3], 1 }
 0x5ae   :  { %4533 = vsyncpa [#allocation3 + $0x1], 1 }
 0x5af   :  { %4534 = vsyncpa [#allocation6], 1 }
 0x5b0   :  { %4535 = vsyncpa [#allocation9], 1 }
 0x5b1   :  { %4536 = vsyncpa [#allocation4], 1 }
 0x5b2   :  { %4538 = vsyncpa [#allocation4 + $0x1], 1 }

</bundles_post_ra>
